<compile_context>
chip_gen: v5e
topology: v5e:2x2
jax: 0.10.0
libtpu: 0.0.40
codegen_flags: <defaults>
</compile_context>

<pallas_src>
import functools

import numpy as np
import jax
import jax.numpy as jnp
from jax.experimental import pallas as pl
from jax.experimental.pallas import tpu as pltpu


# ----------------------------------------------------------------------------
# Kernel
# ----------------------------------------------------------------------------
def _ctrgc_kernel(x_ref, w125_ref, w34_ref, wab_ref, wg_ref, pt_ref, pv_ref,
                  shift_ref, erf_ref, euv_ref, gz_ref, gc_ref, A_ref,
                  b125_ref, colsR_ref, colsO_ref, out_ref,
                  *, alpha, B, R, T):
    f32 = jnp.float32
    BR = B * R

    def mm(a, b):
        return jnp.dot(a, b, preferred_element_type=f32)

    x = x_ref[...]                                     # (B*C, T*V) f32

    # conv1 / conv2 / conv5 as ONE block-diagonal matmul (+ packed bias column).
    x125 = mm(w125_ref[...], x) + b125_ref[...]        # (3*BR, T*V)

    # x1 / x2: the mean over T commutes with the 1x1 conv (+ bias).
    x12 = mm(x125[:2 * BR], pt_ref[...])               # (2*BR, V)
    x3 = x125[2 * BR:]                                 # (BR, T*V)   conv5(x)

    # ---------------- RouteFuncMLP(x3) ----------------
    xp = mm(x3, pv_ref[...])                           # (BR, T)  avg-pool over V
    g = jnp.mean(xp, axis=1, keepdims=True)            # (BR, 1)  global avg-pool
    h = xp + mm(wg_ref[...], g) + colsR_ref[:, 0:1]    # x + self.g(g)

    sm1 = shift_ref[0]                                 # (T, T): h[:, t-1]
    sp1 = shift_ref[1]                                 # (T, T): h[:, t+1]

    def tconv(hin, w_cat):                             # temporal conv, k=3, pad=1
        hcat = jnp.concatenate([mm(hin, sm1), hin, mm(hin, sp1)], axis=0)
        return mm(w_cat, hcat)                         # (BR, T) — single [W0|W1|W2] matmul

    ha = tconv(h, wab_ref[0]) + colsR_ref[:, 1:2]      # conv_rf.a
    hb = jnp.maximum(ha * colsR_ref[:, 2:3] + colsR_ref[:, 3:4], 0.0)  # BN(eval)+ReLU
    rf = tconv(hb, wab_ref[1]) + 1.0                   # conv_rf.b(...) + 1   (BR, T)

    # Calibrate x3 and apply conv3 (lane-dense, full 128-lane matmuls).
    x3c = x3 * mm(rf, erf_ref[...])                    # rf broadcast over V
    z3 = mm(w34_ref[0], x3c) + colsO_ref[:, 0:1]       # (B*O, T*V)

    # a1 = conv4(tanh(x1[u] - x2[v])) * alpha + A   (subtraction fused into E_uv)
    x12cat = jnp.concatenate([x12[:BR], x12[BR:]], axis=1)    # (BR, 2V)
    d = jnp.tanh(mm(x12cat, euv_ref[...]))             # (BR, V*V)
    a1 = mm(w34_ref[1], d) * alpha + colsO_ref[:, 1:2] + A_ref[...]   # (B*O, V*V)

    # einsum 'ncuv,nctv->nctu' in lane-dense form:
    #   out[p, t*V+u] = sum_v a1[p, u*V+v] * z3[p, t*V+v]
    z3e = mm(z3, gz_ref[...])                          # (B*O, T*V*V) broadcast over u
    a1e = jnp.concatenate([a1] * T, axis=1)            # (B*O, T*V*V) broadcast over t
    out_ref[...] = mm(a1e * z3e, gc_ref[...]).astype(out_ref.dtype)   # (B*O, T*V)


# ----------------------------------------------------------------------------
# Host-side precomputation of all constant matrices (review item #1)
# ----------------------------------------------------------------------------
def _build_constants(params, A, alpha, B, C, R, O, T, V):
    f32 = np.float32
    BR, BO = B * R, B * O
    VV = V * V

    def g(name):
        return np.asarray(params[name], f32)

    def bd(block, n):                                  # block-diagonal over samples
        a, b = block.shape
        out = np.zeros((n * a, n * b), f32)
        for i in range(n):
            out[i * a:(i + 1) * a, i * b:(i + 1) * b] = block
        return out

    # conv1/conv2/conv5 fused: rows grouped conv-major, then sample-major.
    w125 = np.zeros((3 * BR, B * C), f32)
    for k, wk in enumerate([g('w1'), g('w2'), g('w5')]):
        for b in range(B):
            w125[k * BR + b * R:k * BR + (b + 1) * R, b * C:(b + 1) * C] = wk
    b125 = np.concatenate([np.tile(g('b1'), B), np.tile(g('b2'), B),
                           np.tile(g('b5'), B)]).reshape(3 * BR, 1)

    # conv3 / conv4.
    w34 = np.stack([bd(g('w3'), B), bd(g('w4'), B)])   # (2, BO, BR)

    # RouteFuncMLP temporal convs as a single [W0|W1|W2] per-sample block matrix.
    def cat_bd(w):                                     # (3, R, R) -> (BR, 3*BR)
        out = np.zeros((BR, 3 * BR), f32)
        for k in range(3):
            for b in range(B):
                out[b * R:(b + 1) * R, k * BR + b * R:k * BR + (b + 1) * R] = w[k]
        return out
    wab = np.stack([cat_bd(g('wa')), cat_bd(g('wb'))])   # (2, BR, 3*BR)
    wg = bd(g('wg'), B)                                  # (BR, BR)

    # Exact 0/1 projection / shift / expansion matrices (shared across samples).
    p_t = np.tile(np.eye(V, dtype=f32), (T, 1)) / T                     # (TV, V)  mean over T
    p_v = np.kron(np.eye(T, dtype=f32), np.ones((V, 1), f32)) / V       # (TV, T)  mean over V
    shift = np.stack([np.eye(T, k=1, dtype=f32),                        # -> h[:, t-1]
                      np.eye(T, k=-1, dtype=f32)])                      # -> h[:, t+1]
    e_rf = np.kron(np.eye(T, dtype=f32), np.ones((1, V), f32))          # (T, TV) bcast over V
    e_u = np.kron(np.eye(V, dtype=f32), np.ones((1, V), f32))           # x1[u] -> col u*V+v
    e_v = np.tile(np.eye(V, dtype=f32), (1, V))                         # x2[v] -> col u*V+v
    e_uv = np.concatenate([e_u, -e_v], axis=0)                          # (2V, VV) fused x1-x2

    # Final contraction matrices: out[p, t*V+u] = sum_v a1[p,u*V+v] * z3[p,t*V+v]
    gz = np.kron(np.eye(T, dtype=f32), e_v)                             # (TV, T*VV)
    gc = np.kron(np.eye(T, dtype=f32),
                 np.kron(np.eye(V, dtype=f32), np.ones((V, 1), f32)))   # (T*VV, TV)

    # BatchNorm (eval-mode) folded into a per-channel affine.
    bn_s = g('bn_gamma') / np.sqrt(g('bn_var') + params['bn_eps'])
    bn_b = g('bn_beta') - g('bn_mean') * bn_s
    cols_r = np.stack([np.tile(g('bg'), B), np.tile(g('ba'), B),
                       np.tile(bn_s, B), np.tile(bn_b, B)], axis=1)     # (BR, 4)
    cols_o = np.stack([np.tile(g('b3'), B),
                       alpha * np.tile(g('b4'), B)], axis=1)            # (BO, 2)

    a_flat = np.asarray(A, f32).reshape(1, VV)

    return [w125, w34, wab, wg, p_t, p_v, shift, e_rf, e_uv, gz, gc,
            a_flat, b125, cols_r, cols_o]


def _pick_block_batch(N, C, O):
    """Largest per-step sample count B that divides N, keeps the grid >= 2
    (so both v7x TensorCores get work; on 1-TC v5e/v6e pass samples_per_step=N)
    and keeps the row-block sizes (B*C, B*O) sublane (8) aligned."""
    if N <= 1:
        return 1
    target = (N + 1) // 2
    for b in range(target, 0, -1):
        if N % b == 0 and (b * C) % 8 == 0 and (b * O) % 8 == 0:
            return b
    return 1


# ----------------------------------------------------------------------------
# Wrapper
# ----------------------------------------------------------------------------
def ctrgc_pallas(x, A, params, alpha=1.0, samples_per_step=None):
    N, C, T, V = x.shape
    R = params['w1'].shape[0]
    O = params['w3'].shape[0]
    TV, VV, TVV = T * V, V * V, T * V * V
    f32 = jnp.float32

    B = samples_per_step if samples_per_step is not None else _pick_block_batch(N, C, O)
    assert N % B == 0, "samples_per_step must divide the batch"
    grid_steps = N // B
    BR, BC, BO = B * R, B * C, B * O
    assert BC % 8 == 0 and BO % 8 == 0, "row blocks must be sublane (8) aligned"

    consts = [jnp.asarray(c) for c in
              _build_constants(params, A, float(alpha), B, C, R, O, T, V)]

    # Sample-major rows, lane-dense (T*V) columns: one block = B samples.
    x_rows = x.astype(f32).reshape(N * C, TV)

    def const_spec(a):
        nd = a.ndim
        return pl.BlockSpec(a.shape, lambda i: (0,) * nd)   # resident, DMA'd once

    in_specs = [pl.BlockSpec((BC, TV), lambda i: (i, 0))] + [const_spec(c) for c in consts]
    out_spec = pl.BlockSpec((BO, TV), lambda i: (i, 0))

    kernel = functools.partial(_ctrgc_kernel, alpha=float(alpha), B=B, R=R, T=T)

    # Advisory scheduling hint for XLA (approximate executed MXU flops).
    mxu_flops_per_step = 2 * (
        3 * BR * BC * TV            # fused conv1/2/5
        + 2 * BR * TV * V           # mean over T
        + BR * TV * T               # avg-pool over V
        + 2 * (3 * BR * BR * T)     # temporal convs
        + BR * T * TV               # rf broadcast over V
        + BO * BR * (TV + VV)       # conv3 / conv4
        + BR * 2 * V * VV           # tanh-difference expansion
        + 2 * BO * TVV * TV)        # final contraction
    cost = pl.CostEstimate(
        flops=int(grid_steps * mxu_flops_per_step),
        transcendentals=int(N * R * VV),
        bytes_accessed=int(4 * (x_rows.size + N * O * TV + sum(c.size for c in consts))))

    out_rows = pl.pallas_call(
        kernel,
        grid=(grid_steps,),
        in_specs=in_specs,
        out_specs=out_spec,
        out_shape=jax.ShapeDtypeStruct((N * O, TV), f32),
        compiler_params=pltpu.CompilerParams(dimension_semantics=("parallel",)),
        cost_estimate=cost,
    )(x_rows, *consts)
    return out_rows.reshape(N, O, T, V)


# ----------------------------------------------------------------------------
# Synthetic parameters + pure-JAX reference
# ----------------------------------------------------------------------------
def init_params(key, c_in, out_channels, rel_reduction=8):
    R = 8 if c_in in (3, 9) else c_in // rel_reduction
    O = out_channels
    ks = jax.random.split(key, 16)

    def kaiming(k, shape, fan_out):
        return jax.random.normal(k, shape, dtype=jnp.float32) * np.sqrt(2.0 / fan_out)

    def small(k, shape):
        return 0.05 * jax.random.normal(k, shape, dtype=jnp.float32)

    p = dict(
        w1=kaiming(ks[0], (R, c_in), R), b1=small(ks[1], (R,)),
        w2=kaiming(ks[2], (R, c_in), R), b2=small(ks[3], (R,)),
        w5=kaiming(ks[4], (R, c_in), R), b5=small(ks[5], (R,)),
        w3=kaiming(ks[6], (O, R), O),    b3=small(ks[7], (O,)),
        w4=kaiming(ks[8], (O, R), O),    b4=small(ks[9], (O,)),
        wg=kaiming(ks[10], (R, R), R),   bg=small(ks[11], (R,)),
        # conv_rf.a weight (R, R, 3, 1) stored as (3, R, R); fan_out = R*3
        wa=kaiming(ks[12], (3, R, R), R * 3), ba=small(ks[13], (R,)),
        # conv_rf.b is zero-init in the module; small non-zero here to exercise the path
        wb=small(ks[14], (3, R, R)),
        bn_gamma=jnp.ones((R,), jnp.float32), bn_beta=jnp.zeros((R,), jnp.float32),
        bn_mean=jnp.zeros((R,), jnp.float32), bn_var=jnp.ones((R,), jnp.float32),
        bn_eps=1e-5,
    )
    return p, R, O


def ctrgc_ref(x, A, p, alpha=1.0):
    """Pure-JAX reference mirroring the PyTorch forward (eval-mode BN)."""
    hp = 'highest'

    def conv1x1(w, b, xx):
        y = jnp.einsum('oc,nc...->no...', w, xx, precision=hp)
        return y + b.reshape((1, -1) + (1,) * (y.ndim - 2))

    x1 = conv1x1(p['w1'], p['b1'], x).mean(-2)           # (N,R,V)
    x2 = conv1x1(p['w2'], p['b2'], x).mean(-2)           # (N,R,V)
    x3 = conv1x1(p['w5'], p['b5'], x)                    # (N,R,T,V)

    g = x3.mean(axis=(2, 3), keepdims=True)              # (N,R,1,1)
    xp = x3.mean(axis=3)                                 # (N,R,T)
    gg = conv1x1(p['wg'], p['bg'], g)[..., 0, 0]         # (N,R)
    h = xp + gg[..., None]

    def tconv(w, hh, b):
        T = hh.shape[-1]
        hpad = jnp.pad(hh, ((0, 0), (0, 0), (1, 1)))
        out = sum(jnp.einsum('oc,nct->not', w[k], hpad[:, :, k:k + T], precision=hp)
                  for k in range(3))
        return out if b is None else out + b[None, :, None]

    s = p['bn_gamma'] / jnp.sqrt(p['bn_var'] + p['bn_eps'])
    bb = p['bn_beta'] - p['bn_mean'] * s
    ha = tconv(p['wa'], h, p['ba'])
    hb = jax.nn.relu(ha * s[None, :, None] + bb[None, :, None])
    rf = tconv(p['wb'], hb, None) + 1.0                  # (N,R,T)

    x3 = x3 * rf[..., None]
    z3 = conv1x1(p['w3'], p['b3'], x3)                   # (N,O,T,V)
    d = jnp.tanh(x1[..., :, None] - x2[..., None, :])    # (N,R,V,V)
    a1 = conv1x1(p['w4'], p['b4'], d) * alpha + A[None, None]
    return jnp.einsum('ncuv,nctv->nctu', a1, z3, precision=hp)


if __name__ == "__main__":
    key = jax.random.PRNGKey(0)
    kx, kA, kp = jax.random.split(key, 3)

    N, C_in, T, V = 8, 32, 8, 16      # T*V = 128 -> exactly one lane width
    out_channels = 32

    params, R, O = init_params(kp, C_in, out_channels)
    x = jax.random.normal(kx, (N, C_in, T, V), dtype=jnp.float32)
    A = 0.1 * jax.random.normal(kA, (V, V), dtype=jnp.float32)

    out = ctrgc_pallas(x, A, params, alpha=1.0)   # B=4 samples/step, grid=2
    out = jax.block_until_ready(out)
    assert out.shape == (N, O, T, V)

    ref = ctrgc_ref(x, A, params, alpha=1.0)
    np.testing.assert_allclose(np.asarray(out), np.asarray(ref), rtol=1e-3, atol=1e-3)

    print("KERNEL_OK")
</pallas_src>

<mosaic_0001>
module attributes {stable_mosaic.version = 11 : i64} {
  func.func @_ctrgc_kernel(%arg0: i32, %arg1: memref<128x128xf32, #tpu.memory_space<vmem>>, %arg2: memref<48x128xf32, #tpu.memory_space<vmem>>, %arg3: memref<2x128x16xf32, #tpu.memory_space<vmem>>, %arg4: memref<2x16x48xf32, #tpu.memory_space<vmem>>, %arg5: memref<16x16xf32, #tpu.memory_space<vmem>>, %arg6: memref<128x16xf32, #tpu.memory_space<vmem>>, %arg7: memref<128x8xf32, #tpu.memory_space<vmem>>, %arg8: memref<2x8x8xf32, #tpu.memory_space<vmem>>, %arg9: memref<8x128xf32, #tpu.memory_space<vmem>>, %arg10: memref<32x256xf32, #tpu.memory_space<vmem>>, %arg11: memref<128x2048xf32, #tpu.memory_space<vmem>>, %arg12: memref<2048x128xf32, #tpu.memory_space<vmem>>, %arg13: memref<1x256xf32, #tpu.memory_space<vmem>>, %arg14: memref<48x1xf32, #tpu.memory_space<vmem>>, %arg15: memref<16x4xf32, #tpu.memory_space<vmem>>, %arg16: memref<128x2xf32, #tpu.memory_space<vmem>>, %arg17: memref<128x128xf32, #tpu.memory_space<vmem>>) attributes {dimension_semantics = [#tpu.dimension_semantics<parallel>], iteration_bounds = array<i64: 2>, scalar_prefetch = 0 : i64, scratch_operands = 0 : i64, tpu.core_type = #tpu.core_type<tc>, window_params = [{transform_indices = @transform_0, window_bounds = array<i64: 128, 128>}, {pipeline_mode = #tpu.pipeline_mode<synchronous>, transform_indices = @transform_1, window_bounds = array<i64: 48, 128>}, {pipeline_mode = #tpu.pipeline_mode<synchronous>, transform_indices = @transform_2, window_bounds = array<i64: 2, 128, 16>}, {pipeline_mode = #tpu.pipeline_mode<synchronous>, transform_indices = @transform_3, window_bounds = array<i64: 2, 16, 48>}, {pipeline_mode = #tpu.pipeline_mode<synchronous>, transform_indices = @transform_4, window_bounds = array<i64: 16, 16>}, {pipeline_mode = #tpu.pipeline_mode<synchronous>, transform_indices = @transform_5, window_bounds = array<i64: 128, 16>}, {pipeline_mode = #tpu.pipeline_mode<synchronous>, transform_indices = @transform_6, window_bounds = array<i64: 128, 8>}, {pipeline_mode = #tpu.pipeline_mode<synchronous>, transform_indices = @transform_7, window_bounds = array<i64: 2, 8, 8>}, {pipeline_mode = #tpu.pipeline_mode<synchronous>, transform_indices = @transform_8, window_bounds = array<i64: 8, 128>}, {pipeline_mode = #tpu.pipeline_mode<synchronous>, transform_indices = @transform_9, window_bounds = array<i64: 32, 256>}, {pipeline_mode = #tpu.pipeline_mode<synchronous>, transform_indices = @transform_10, window_bounds = array<i64: 128, 2048>}, {pipeline_mode = #tpu.pipeline_mode<synchronous>, transform_indices = @transform_11, window_bounds = array<i64: 2048, 128>}, {pipeline_mode = #tpu.pipeline_mode<synchronous>, transform_indices = @transform_12, window_bounds = array<i64: 1, 256>}, {pipeline_mode = #tpu.pipeline_mode<synchronous>, transform_indices = @transform_13, window_bounds = array<i64: 48, 1>}, {pipeline_mode = #tpu.pipeline_mode<synchronous>, transform_indices = @transform_14, window_bounds = array<i64: 16, 4>}, {pipeline_mode = #tpu.pipeline_mode<synchronous>, transform_indices = @transform_15, window_bounds = array<i64: 128, 2>}, {transform_indices = @transform_16, window_bounds = array<i64: 128, 128>}]} {
    %c0 = arith.constant 0 : index
    %c0_0 = arith.constant 0 : index
    %0 = vector.load %arg1[%c0, %c0_0] : memref<128x128xf32, #tpu.memory_space<vmem>>, vector<128x128xf32>
    %c0_1 = arith.constant 0 : index
    %c0_2 = arith.constant 0 : index
    %1 = vector.load %arg2[%c0_1, %c0_2] : memref<48x128xf32, #tpu.memory_space<vmem>>, vector<48x128xf32>
    %cst = arith.constant dense<0.000000e+00> : vector<48x128xf32>
    %2 = tpu.matmul %1, %0, %cst {dimension_numbers = #tpu.dot_dimension_numbers<[1], [0], [0], [1], [0, 0, 1, 1], [], []>} : vector<48x128xf32>, vector<128x128xf32>, vector<48x128xf32> -> vector<48x128xf32>
    %c0_3 = arith.constant 0 : index
    %c0_4 = arith.constant 0 : index
    %3 = vector.load %arg14[%c0_3, %c0_4] : memref<48x1xf32, #tpu.memory_space<vmem>>, vector<48x1xf32>
    %4 = vector.broadcast %3 : vector<48x1xf32> to vector<48x128xf32>
    %5 = arith.addf %2, %4 : vector<48x128xf32>
    %6 = vector.extract_strided_slice %5 {offsets = [0, 0], sizes = [32, 128], strides = [1, 1]} : vector<48x128xf32> to vector<32x128xf32>
    %c0_5 = arith.constant 0 : index
    %c0_6 = arith.constant 0 : index
    %7 = vector.load %arg6[%c0_5, %c0_6] : memref<128x16xf32, #tpu.memory_space<vmem>>, vector<128x16xf32>
    %cst_7 = arith.constant dense<0.000000e+00> : vector<32x16xf32>
    %8 = tpu.matmul %6, %7, %cst_7 {dimension_numbers = #tpu.dot_dimension_numbers<[1], [0], [0], [1], [0, 0, 1, 1], [], []>} : vector<32x128xf32>, vector<128x16xf32>, vector<32x16xf32> -> vector<32x16xf32>
    %9 = vector.extract_strided_slice %5 {offsets = [32, 0], sizes = [16, 128], strides = [1, 1]} : vector<48x128xf32> to vector<16x128xf32>
    %c0_8 = arith.constant 0 : index
    %c0_9 = arith.constant 0 : index
    %10 = vector.load %arg7[%c0_8, %c0_9] : memref<128x8xf32, #tpu.memory_space<vmem>>, vector<128x8xf32>
    %cst_10 = arith.constant dense<0.000000e+00> : vector<16x8xf32>
    %11 = tpu.matmul %9, %10, %cst_10 {dimension_numbers = #tpu.dot_dimension_numbers<[1], [0], [0], [1], [0, 0, 1, 1], [], []>} : vector<16x128xf32>, vector<128x8xf32>, vector<16x8xf32> -> vector<16x8xf32>
    %cst_11 = arith.constant dense<0.000000e+00> : vector<16xf32>
    %12 = vector.multi_reduction <add>, %11, %cst_11 [1] : vector<16x8xf32> to vector<16xf32>
    %13 = vector.shape_cast %12 : vector<16xf32> to vector<16x1xf32>
    %cst_12 = arith.constant 8.000000e+00 : f32
    %14 = vector.broadcast %cst_12 : f32 to vector<16x1xf32>
    %15 = arith.divf %13, %14 : vector<16x1xf32>
    %c0_13 = arith.constant 0 : index
    %c0_14 = arith.constant 0 : index
    %16 = vector.load %arg5[%c0_13, %c0_14] : memref<16x16xf32, #tpu.memory_space<vmem>>, vector<16x16xf32>
    %cst_15 = arith.constant dense<0.000000e+00> : vector<16x1xf32>
    %17 = tpu.matmul %16, %15, %cst_15 {dimension_numbers = #tpu.dot_dimension_numbers<[1], [0], [0], [1], [0, 0, 1, 1], [], []>} : vector<16x16xf32>, vector<16x1xf32>, vector<16x1xf32> -> vector<16x1xf32>
    %18 = vector.broadcast %17 : vector<16x1xf32> to vector<16x8xf32>
    %19 = arith.addf %11, %18 : vector<16x8xf32>
    %c0_16 = arith.constant 0 : index
    %c0_17 = arith.constant 0 : index
    %20 = vector.load %arg15[%c0_16, %c0_17] : memref<16x4xf32, #tpu.memory_space<vmem>>, vector<16x1xf32>
    %21 = vector.broadcast %20 : vector<16x1xf32> to vector<16x8xf32>
    %22 = arith.addf %19, %21 : vector<16x8xf32>
    %c0_18 = arith.constant 0 : index
    %c0_19 = arith.constant 0 : index
    %c0_20 = arith.constant 0 : index
    %23 = vector.load %arg8[%c0_18, %c0_19, %c0_20] : memref<2x8x8xf32, #tpu.memory_space<vmem>>, vector<1x8x8xf32>
    %24 = vector.shape_cast %23 : vector<1x8x8xf32> to vector<8x8xf32>
    %c1 = arith.constant 1 : index
    %c0_21 = arith.constant 0 : index
    %c0_22 = arith.constant 0 : index
    %25 = vector.load %arg8[%c1, %c0_21, %c0_22] : memref<2x8x8xf32, #tpu.memory_space<vmem>>, vector<1x8x8xf32>
    %26 = vector.shape_cast %25 : vector<1x8x8xf32> to vector<8x8xf32>
    %c0_23 = arith.constant 0 : index
    %c0_24 = arith.constant 0 : index
    %c0_25 = arith.constant 0 : index
    %27 = vector.load %arg4[%c0_23, %c0_24, %c0_25] : memref<2x16x48xf32, #tpu.memory_space<vmem>>, vector<1x16x48xf32>
    %28 = vector.shape_cast %27 : vector<1x16x48xf32> to vector<16x48xf32>
    %cst_26 = arith.constant dense<0.000000e+00> : vector<16x8xf32>
    %29 = tpu.matmul %22, %24, %cst_26 {dimension_numbers = #tpu.dot_dimension_numbers<[1], [0], [0], [1], [0, 0, 1, 1], [], []>} : vector<16x8xf32>, vector<8x8xf32>, vector<16x8xf32> -> vector<16x8xf32>
    %cst_27 = arith.constant dense<0.000000e+00> : vector<16x8xf32>
    %30 = tpu.matmul %22, %26, %cst_27 {dimension_numbers = #tpu.dot_dimension_numbers<[1], [0], [0], [1], [0, 0, 1, 1], [], []>} : vector<16x8xf32>, vector<8x8xf32>, vector<16x8xf32> -> vector<16x8xf32>
    %31 = tpu.concatenate %29, %22, %30 in 0 : vector<16x8xf32>, vector<16x8xf32>, vector<16x8xf32> -> vector<48x8xf32>
    %cst_28 = arith.constant dense<0.000000e+00> : vector<16x8xf32>
    %32 = tpu.matmul %28, %31, %cst_28 {dimension_numbers = #tpu.dot_dimension_numbers<[1], [0], [0], [1], [0, 0, 1, 1], [], []>} : vector<16x48xf32>, vector<48x8xf32>, vector<16x8xf32> -> vector<16x8xf32>
    %c0_29 = arith.constant 0 : index
    %c1_30 = arith.constant 1 : index
    %33 = vector.load %arg15[%c0_29, %c1_30] : memref<16x4xf32, #tpu.memory_space<vmem>>, vector<16x1xf32>
    %34 = vector.broadcast %33 : vector<16x1xf32> to vector<16x8xf32>
    %35 = arith.addf %32, %34 : vector<16x8xf32>
    %c0_31 = arith.constant 0 : index
    %c2 = arith.constant 2 : index
    %36 = vector.load %arg15[%c0_31, %c2] : memref<16x4xf32, #tpu.memory_space<vmem>>, vector<16x1xf32>
    %37 = vector.broadcast %36 : vector<16x1xf32> to vector<16x8xf32>
    %38 = arith.mulf %35, %37 : vector<16x8xf32>
    %c0_32 = arith.constant 0 : index
    %c3 = arith.constant 3 : index
    %39 = vector.load %arg15[%c0_32, %c3] : memref<16x4xf32, #tpu.memory_space<vmem>>, vector<16x1xf32>
    %40 = vector.broadcast %39 : vector<16x1xf32> to vector<16x8xf32>
    %41 = arith.addf %38, %40 : vector<16x8xf32>
    %cst_33 = arith.constant 0.000000e+00 : f32
    %42 = vector.broadcast %cst_33 : f32 to vector<16x8xf32>
    %43 = arith.maximumf %41, %42 : vector<16x8xf32>
    %c1_34 = arith.constant 1 : index
    %c0_35 = arith.constant 0 : index
    %c0_36 = arith.constant 0 : index
    %44 = vector.load %arg4[%c1_34, %c0_35, %c0_36] : memref<2x16x48xf32, #tpu.memory_space<vmem>>, vector<1x16x48xf32>
    %45 = vector.shape_cast %44 : vector<1x16x48xf32> to vector<16x48xf32>
    %cst_37 = arith.constant dense<0.000000e+00> : vector<16x8xf32>
    %46 = tpu.matmul %43, %24, %cst_37 {dimension_numbers = #tpu.dot_dimension_numbers<[1], [0], [0], [1], [0, 0, 1, 1], [], []>} : vector<16x8xf32>, vector<8x8xf32>, vector<16x8xf32> -> vector<16x8xf32>
    %cst_38 = arith.constant dense<0.000000e+00> : vector<16x8xf32>
    %47 = tpu.matmul %43, %26, %cst_38 {dimension_numbers = #tpu.dot_dimension_numbers<[1], [0], [0], [1], [0, 0, 1, 1], [], []>} : vector<16x8xf32>, vector<8x8xf32>, vector<16x8xf32> -> vector<16x8xf32>
    %48 = tpu.concatenate %46, %43, %47 in 0 : vector<16x8xf32>, vector<16x8xf32>, vector<16x8xf32> -> vector<48x8xf32>
    %cst_39 = arith.constant dense<0.000000e+00> : vector<16x8xf32>
    %49 = tpu.matmul %45, %48, %cst_39 {dimension_numbers = #tpu.dot_dimension_numbers<[1], [0], [0], [1], [0, 0, 1, 1], [], []>} : vector<16x48xf32>, vector<48x8xf32>, vector<16x8xf32> -> vector<16x8xf32>
    %cst_40 = arith.constant 1.000000e+00 : f32
    %50 = vector.broadcast %cst_40 : f32 to vector<16x8xf32>
    %51 = arith.addf %49, %50 : vector<16x8xf32>
    %c0_41 = arith.constant 0 : index
    %c0_42 = arith.constant 0 : index
    %52 = vector.load %arg9[%c0_41, %c0_42] : memref<8x128xf32, #tpu.memory_space<vmem>>, vector<8x128xf32>
    %cst_43 = arith.constant dense<0.000000e+00> : vector<16x128xf32>
    %53 = tpu.matmul %51, %52, %cst_43 {dimension_numbers = #tpu.dot_dimension_numbers<[1], [0], [0], [1], [0, 0, 1, 1], [], []>} : vector<16x8xf32>, vector<8x128xf32>, vector<16x128xf32> -> vector<16x128xf32>
    %54 = arith.mulf %9, %53 : vector<16x128xf32>
    %c0_44 = arith.constant 0 : index
    %c0_45 = arith.constant 0 : index
    %c0_46 = arith.constant 0 : index
    %55 = vector.load %arg3[%c0_44, %c0_45, %c0_46] : memref<2x128x16xf32, #tpu.memory_space<vmem>>, vector<1x128x16xf32>
    %56 = vector.shape_cast %55 : vector<1x128x16xf32> to vector<128x16xf32>
    %cst_47 = arith.constant dense<0.000000e+00> : vector<128x128xf32>
    %57 = tpu.matmul %56, %54, %cst_47 {dimension_numbers = #tpu.dot_dimension_numbers<[1], [0], [0], [1], [0, 0, 1, 1], [], []>} : vector<128x16xf32>, vector<16x128xf32>, vector<128x128xf32> -> vector<128x128xf32>
    %c0_48 = arith.constant 0 : index
    %c0_49 = arith.constant 0 : index
    %58 = vector.load %arg16[%c0_48, %c0_49] : memref<128x2xf32, #tpu.memory_space<vmem>>, vector<128x1xf32>
    %59 = vector.broadcast %58 : vector<128x1xf32> to vector<128x128xf32>
    %60 = arith.addf %57, %59 : vector<128x128xf32>
    %61 = vector.extract_strided_slice %8 {offsets = [0, 0], sizes = [16, 16], strides = [1, 1]} : vector<32x16xf32> to vector<16x16xf32>
    %62 = vector.extract_strided_slice %8 {offsets = [16, 0], sizes = [16, 16], strides = [1, 1]} : vector<32x16xf32> to vector<16x16xf32>
    %63 = tpu.concatenate %61, %62 in 1 : vector<16x16xf32>, vector<16x16xf32> -> vector<16x32xf32>
    %c0_50 = arith.constant 0 : index
    %c0_51 = arith.constant 0 : index
    %64 = vector.load %arg10[%c0_50, %c0_51] : memref<32x256xf32, #tpu.memory_space<vmem>>, vector<32x256xf32>
    %cst_52 = arith.constant dense<0.000000e+00> : vector<16x256xf32>
    %65 = tpu.matmul %63, %64, %cst_52 {dimension_numbers = #tpu.dot_dimension_numbers<[1], [0], [0], [1], [0, 0, 1, 1], [], []>} : vector<16x32xf32>, vector<32x256xf32>, vector<16x256xf32> -> vector<16x256xf32>
    %66 = math.tanh %65 : vector<16x256xf32>
    %c1_53 = arith.constant 1 : index
    %c0_54 = arith.constant 0 : index
    %c0_55 = arith.constant 0 : index
    %67 = vector.load %arg3[%c1_53, %c0_54, %c0_55] : memref<2x128x16xf32, #tpu.memory_space<vmem>>, vector<1x128x16xf32>
    %68 = vector.shape_cast %67 : vector<1x128x16xf32> to vector<128x16xf32>
    %cst_56 = arith.constant dense<0.000000e+00> : vector<128x256xf32>
    %69 = tpu.matmul %68, %66, %cst_56 {dimension_numbers = #tpu.dot_dimension_numbers<[1], [0], [0], [1], [0, 0, 1, 1], [], []>} : vector<128x16xf32>, vector<16x256xf32>, vector<128x256xf32> -> vector<128x256xf32>
    %cst_57 = arith.constant 1.000000e+00 : f32
    %70 = vector.broadcast %cst_57 : f32 to vector<128x256xf32>
    %71 = arith.mulf %69, %70 : vector<128x256xf32>
    %c0_58 = arith.constant 0 : index
    %c1_59 = arith.constant 1 : index
    %72 = vector.load %arg16[%c0_58, %c1_59] : memref<128x2xf32, #tpu.memory_space<vmem>>, vector<128x1xf32>
    %73 = vector.broadcast %72 : vector<128x1xf32> to vector<128x256xf32>
    %74 = arith.addf %71, %73 : vector<128x256xf32>
    %c0_60 = arith.constant 0 : index
    %c0_61 = arith.constant 0 : index
    %75 = vector.load %arg13[%c0_60, %c0_61] : memref<1x256xf32, #tpu.memory_space<vmem>>, vector<1x256xf32>
    %76 = vector.broadcast %75 : vector<1x256xf32> to vector<128x256xf32>
    %77 = arith.addf %74, %76 : vector<128x256xf32>
    %c0_62 = arith.constant 0 : index
    %c0_63 = arith.constant 0 : index
    %78 = vector.load %arg11[%c0_62, %c0_63] : memref<128x2048xf32, #tpu.memory_space<vmem>>, vector<128x2048xf32>
    %cst_64 = arith.constant dense<0.000000e+00> : vector<128x2048xf32>
    %79 = tpu.matmul %60, %78, %cst_64 {dimension_numbers = #tpu.dot_dimension_numbers<[1], [0], [0], [1], [0, 0, 1, 1], [], []>} : vector<128x128xf32>, vector<128x2048xf32>, vector<128x2048xf32> -> vector<128x2048xf32>
    %80 = tpu.concatenate %77, %77, %77, %77, %77, %77, %77, %77 in 1 : vector<128x256xf32>, vector<128x256xf32>, vector<128x256xf32>, vector<128x256xf32>, vector<128x256xf32>, vector<128x256xf32>, vector<128x256xf32>, vector<128x256xf32> -> vector<128x2048xf32>
    %81 = arith.mulf %80, %79 : vector<128x2048xf32>
    %c0_65 = arith.constant 0 : index
    %c0_66 = arith.constant 0 : index
    %82 = vector.load %arg12[%c0_65, %c0_66] : memref<2048x128xf32, #tpu.memory_space<vmem>>, vector<2048x128xf32>
    %cst_67 = arith.constant dense<0.000000e+00> : vector<128x128xf32>
    %83 = tpu.matmul %81, %82, %cst_67 {dimension_numbers = #tpu.dot_dimension_numbers<[1], [0], [0], [1], [0, 0, 1, 1], [], []>} : vector<128x2048xf32>, vector<2048x128xf32>, vector<128x128xf32> -> vector<128x128xf32>
    %c0_68 = arith.constant 0 : index
    %c0_69 = arith.constant 0 : index
    %84 = vector.load %arg17[%c0_68, %c0_69] : memref<128x128xf32, #tpu.memory_space<vmem>>, vector<128x128xf32>
    tpu.vector_store %arg17[%c0_68, %c0_69], %83 {strides = array<i32>} : memref<128x128xf32, #tpu.memory_space<vmem>>, vector<128x128xf32>,
    return
  }
  func.func @transform_0(%arg0: i32) -> (i32, i32) {
    %c0_i32 = arith.constant 0 : i32
    %c0_i32_0 = arith.constant 0 : i32
    return %arg0, %c0_i32 : i32, i32
  }
  func.func @transform_1(%arg0: i32) -> (i32, i32) {
    %c0_i32 = arith.constant 0 : i32
    %c0_i32_0 = arith.constant 0 : i32
    %c0_i32_1 = arith.constant 0 : i32
    return %c0_i32, %c0_i32_0 : i32, i32
  }
  func.func @transform_2(%arg0: i32) -> (i32, i32, i32) {
    %c0_i32 = arith.constant 0 : i32
    %c0_i32_0 = arith.constant 0 : i32
    %c0_i32_1 = arith.constant 0 : i32
    %c0_i32_2 = arith.constant 0 : i32
    return %c0_i32, %c0_i32_0, %c0_i32_1 : i32, i32, i32
  }
  func.func @transform_3(%arg0: i32) -> (i32, i32, i32) {
    %c0_i32 = arith.constant 0 : i32
    %c0_i32_0 = arith.constant 0 : i32
    %c0_i32_1 = arith.constant 0 : i32
    %c0_i32_2 = arith.constant 0 : i32
    return %c0_i32, %c0_i32_0, %c0_i32_1 : i32, i32, i32
  }
  func.func @transform_4(%arg0: i32) -> (i32, i32) {
    %c0_i32 = arith.constant 0 : i32
    %c0_i32_0 = arith.constant 0 : i32
    %c0_i32_1 = arith.constant 0 : i32
    return %c0_i32, %c0_i32_0 : i32, i32
  }
  func.func @transform_5(%arg0: i32) -> (i32, i32) {
    %c0_i32 = arith.constant 0 : i32
    %c0_i32_0 = arith.constant 0 : i32
    %c0_i32_1 = arith.constant 0 : i32
    return %c0_i32, %c0_i32_0 : i32, i32
  }
  func.func @transform_6(%arg0: i32) -> (i32, i32) {
    %c0_i32 = arith.constant 0 : i32
    %c0_i32_0 = arith.constant 0 : i32
    %c0_i32_1 = arith.constant 0 : i32
    return %c0_i32, %c0_i32_0 : i32, i32
  }
  func.func @transform_7(%arg0: i32) -> (i32, i32, i32) {
    %c0_i32 = arith.constant 0 : i32
    %c0_i32_0 = arith.constant 0 : i32
    %c0_i32_1 = arith.constant 0 : i32
    %c0_i32_2 = arith.constant 0 : i32
    return %c0_i32, %c0_i32_0, %c0_i32_1 : i32, i32, i32
  }
  func.func @transform_8(%arg0: i32) -> (i32, i32) {
    %c0_i32 = arith.constant 0 : i32
    %c0_i32_0 = arith.constant 0 : i32
    %c0_i32_1 = arith.constant 0 : i32
    return %c0_i32, %c0_i32_0 : i32, i32
  }
  func.func @transform_9(%arg0: i32) -> (i32, i32) {
    %c0_i32 = arith.constant 0 : i32
    %c0_i32_0 = arith.constant 0 : i32
    %c0_i32_1 = arith.constant 0 : i32
    return %c0_i32, %c0_i32_0 : i32, i32
  }
  func.func @transform_10(%arg0: i32) -> (i32, i32) {
    %c0_i32 = arith.constant 0 : i32
    %c0_i32_0 = arith.constant 0 : i32
    %c0_i32_1 = arith.constant 0 : i32
    return %c0_i32, %c0_i32_0 : i32, i32
  }
  func.func @transform_11(%arg0: i32) -> (i32, i32) {
    %c0_i32 = arith.constant 0 : i32
    %c0_i32_0 = arith.constant 0 : i32
    %c0_i32_1 = arith.constant 0 : i32
    return %c0_i32, %c0_i32_0 : i32, i32
  }
  func.func @transform_12(%arg0: i32) -> (i32, i32) {
    %c0_i32 = arith.constant 0 : i32
    %c0_i32_0 = arith.constant 0 : i32
    %c0_i32_1 = arith.constant 0 : i32
    return %c0_i32, %c0_i32_0 : i32, i32
  }
  func.func @transform_13(%arg0: i32) -> (i32, i32) {
    %c0_i32 = arith.constant 0 : i32
    %c0_i32_0 = arith.constant 0 : i32
    %c0_i32_1 = arith.constant 0 : i32
    return %c0_i32, %c0_i32_0 : i32, i32
  }
  func.func @transform_14(%arg0: i32) -> (i32, i32) {
    %c0_i32 = arith.constant 0 : i32
    %c0_i32_0 = arith.constant 0 : i32
    %c0_i32_1 = arith.constant 0 : i32
    return %c0_i32, %c0_i32_0 : i32, i32
  }
  func.func @transform_15(%arg0: i32) -> (i32, i32) {
    %c0_i32 = arith.constant 0 : i32
    %c0_i32_0 = arith.constant 0 : i32
    %c0_i32_1 = arith.constant 0 : i32
    return %c0_i32, %c0_i32_0 : i32, i32
  }
  func.func @transform_16(%arg0: i32) -> (i32, i32) {
    %c0_i32 = arith.constant 0 : i32
    %c0_i32_0 = arith.constant 0 : i32
    return %arg0, %c0_i32 : i32, i32
  }
}

</mosaic_0001>

<bundles_post_ra>
// kernel: tpu_custom_call.1
= control target key start
LH: loop header
LB: loop body
LE: loop exit
PB: predicated region body
PF: predicated region fallthrough
CT: control target
= control target key end

     0   :  { %s7599_s0 = inlined_call_operand.vmem [shape: f32[256,128], index: 0, kind: input, shape index: {}]   ;;  %s7600_s1 = inlined_call_operand.vmem [shape: f32[48,128], index: 1, kind: input, shape index: {}]   ;;  %s7601_s2 = inlined_call_operand.vmem [shape: f32[2,128,16], index: 2, kind: input, shape index: {}]   ;;  %s7602_s3 = inlined_call_operand.vmem [shape: f32[2,16,48], index: 3, kind: input, shape index: {}]   ;;  %s7603_s4 = inlined_call_operand.vmem [shape: f32[16,16], index: 4, kind: input, shape index: {}]   ;;  %s7604_s5 = inlined_call_operand.vmem [shape: f32[128,16], index: 5, kind: input, shape index: {}]   ;;  %s7605_s6 = inlined_call_operand.vmem [shape: f32[128,8], index: 6, kind: input, shape index: {}]   ;;  %s7606_s7 = inlined_call_operand.vmem [shape: f32[2,8,8], index: 7, kind: input, shape index: {}]   ;;  %s7607_s8 = inlined_call_operand.vmem [shape: f32[8,128], index: 8, kind: input, shape index: {}]   ;;  %s7608_s9 = inlined_call_operand.vmem [shape: f32[32,256], index: 9, kind: input, shape index: {}]   ;;  %s7609_s10 = inlined_call_operand.hbm [shape: f32[128,2048], index: 10, kind: input, shape index: {}]   ;;  %s7610_s11 = inlined_call_operand.hbm [shape: f32[2048,128], index: 11, kind: input, shape index: {}]   ;;  %s7611_s12 = inlined_call_operand.vmem [shape: f32[1,256], index: 12, kind: input, shape index: {}]   ;;  %s7612_s13 = inlined_call_operand.vmem [shape: f32[48,1], index: 13, kind: input, shape index: {}]   ;;  %s7613_s14 = inlined_call_operand.vmem [shape: f32[16,4], index: 14, kind: input, shape index: {}]   ;;  %s7614_s15 = inlined_call_operand.vmem [shape: f32[128,2], index: 15, kind: input, shape index: {}]   ;;  %s7615_s16 = inlined_call_operand.hbm [shape: f32[256,128], index: 16, kind: output, shape index: {}]  }
   0x1   :  { %7646 = sst [smem:[#allocation217_spill]] %s7599_s0 }
   0x2   :  { %7647 = sst [smem:[#allocation218_spill]] %s7600_s1 }
   0x3   :  { %7648 = sst [smem:[#allocation219_spill]] %s7601_s2 }
   0x4   :  { %21 = vsyncpa [#allocation3], 0 }
   0x5   :  { %22 = vsyncpa [#allocation6], 0 }
   0x6   :  { %23 = vsyncpa [#allocation4], 0 }
   0x7   :  { %25 = vsyncpa [#allocation4 + $0x1], 0  ;;  %s5035_s21 = smov 0   ;;  %s5037_s22 = smov 0  }
   0x8   :  { %s5039_s23 = smov 0   ;;  %s5041_s24 = smov 0  }
   0x9 LB: > { %7649 = sst [smem:[#allocation11_spill]] %s4923_s21  ;;  %s5056_s25 = sadd.s32 4294967295, %s4935_s24   ;;  %s4935_s24 = sphi %s5041_s24, %s8210_s24   ;;  %s4931_s23 = sphi %s5039_s23, %s8215_s23   ;;  %s4927_s22 = sphi %s5037_s22, %s8214_s22   ;;  %s4923_s21 = sphi %s5035_s21, %s8213_s21  }
   0xa   : > { %7650 = sst [smem:[#allocation12_spill]] %s4931_s23  ;;  %s4602_s26 = sadd.s32 4294967294, %s4935_s24  }
   0xb   : > { %7651 = sst [smem:[#allocation13_spill]] %s4935_s24  ;;  %s5060_s27 = sadd.s32 1, %s4935_s24  }
   0xc   : > { %7652 = sst [smem:[#allocation14_spill]] %s5060_s27  ;;  %s379_s28 = sadd.s32 1, %s4931_s23 }
   0xd   : > { %s376_s29 = ssub.s32 %s4935_s24, %s5060_s27  ;;  %p389_p0 = scmp.ne.s32.totalorder %s4931_s23, %s4927_s22 }
   0xe   : > { %p377_p1 = scmp.eq.s32.totalorder %s376_s29, 0  ;;  %p390_p2 = scmp.eq.s32.totalorder %s5056_s25, 1 }
   0xf   : > { %p395_p3 = scmp.ne.s32.totalorder %s4927_s22, %s4923_s21  ;;  %p396_p4 = scmp.eq.s32.totalorder %s4602_s26, 1 }
  0x10   : > { %s5071_s30 = scalar_select %p377_p1, %s4931_s23, %s379_s28  }
  0x11   : > { %p5073_p5 = por %p390_p2, %p389_p0  ;;  %p5077_p6 = por %p396_p4, %p395_p3 }
  0x12   : > { %7653 = sst [smem:[#allocation15_spill]] %s5071_s30  ;;  %p4603_p7 = scmp.ge.s32.totalorder %s4935_s24, 1 }
  0x13   : > { %s7655_s17 = scalar_select %p5077_p6, 1, 0 }
  0x14   : > { %p403_p8 = scmp.lt.s32.totalorder %s4935_s24, 3  ;;  %p4731_p9 = scmp.eq.s32.totalorder %s5056_s25, 0 }
  0x15   : > { %7656 = sst [smem:[#allocation16_spill]] %s7655_s17  ;;  %s441_s26 = sshll.u32 %s7609_s10, 4  ;;  %s442_s26 = int_to_ptr.hbm [resolvable:$true] %s441_s26 }
  0x16   : > { %p5084_p10 = pnand %p4603_p7, %p403_p8  ;;  %s4937_s28 = smov [#allocation2]  }
  0x17   : > { %s443_s29 = sshll.u32 %s4937_s28, 4  ;;  %s455_s27 = sshll.u32 %s7610_s11, 4  ;;  %s444_s29 = int_to_ptr.vmem [resolvable:$true] %s443_s29  ;;  %s456_s27 = int_to_ptr.hbm [resolvable:$true] %s455_s27 }
  0x18   : > { %p4720_p11 = pneg %p5084_p10  ;;  %s4938_s17 = smov 2048  }
  0x19   : > { %s4939_s21 = smov 128   ;;  %s4940_s24 = smov [#allocation5]  }
  0x1a   : > { %p4721_p12 = pnand %p4731_p9, %p4720_p11  ;;  %s457_s19 = sshll.u32 %s4940_s24, 4  ;;  %s458_s19 = int_to_ptr.vmem [resolvable:$true] %s457_s19 }
  0x1b   : > { %s4941_s20 = smov 8   ;;  %494 = sbr.rel (%p5084_p10) target bundleno = 2910 (0xb5e), region = 84 }
  0x1c   : > { %4723 = dma.hbm_to_vmem [thread:$0]  (!%p4721_p12), %s442_s26, 32768, %s444_s29, [#allocation3], %s4938_s17, %s4938_s17, %s4939_s21  }
  0x1d   : > { %4726 = dma.hbm_to_vmem [thread:$0]  (!%p4721_p12), %s456_s27, 32768, %s458_s19, [#allocation6], %s4939_s21, %s4939_s21, %s4941_s20  }
  0x20   : > { %4910 = dma.done.wait (%p4731_p9), [#allocation3], 32768  }
  0x21   : > { %4912 = vsyncadd (%p4731_p9), [#allocation3], 4294934528 }
  0x22   : > { %4914 = dma.done.wait (%p4731_p9), [#allocation6], 32768  }
  0x23   : > { %4916 = vsyncadd (%p4731_p9), [#allocation6], 4294934528  ;;  %s4611_s23 = sshll.u32 %s5056_s25, 4  ;;  %s7658_s30 = sld [smem:[#allocation217_spill]]  ;;  %v4942_v2 = vmov 0   ;;  %v579_v5 = vld [vmem:[%s7612_s13] sm:$0xff] }
  0x24   : > { %p551_p13 = scmp.lt.s32.totalorder %s4611_s23, 31  ;;  %4781 = vset.pattern.permute.xlu0 %v4942_v2  ;;  %4782 = vset.pattern.permute.xlu1 %v4942_v2  ;;  %v580_v9 = vld [vmem:[%s7612_s13 + $0x8] sm:$0xff]  ;;  %v581_v13 = vld [vmem:[%s7612_s13 + $0x10] sm:$0xff]  ;;  %v582_v18 = vld [vmem:[%s7612_s13 + $0x18] sm:$0xff]  ;;  %s7659_s1 = sld [smem:[#allocation218_spill]]  ;;  %vm734_vm0 = vcmask 64512  }
  0x25   : > { %4783 = vset.pattern.permute.xlu2 %v4942_v2  ;;  %587 = vperm.xlu0 %4781, %v579_v5   ;;  %v583_v23 = vld [vmem:[%s7612_s13 + $0x20] sm:$0xff]  ;;  %v665_v24 = vld [vmem:[%s7604_s5 + $0x78] sm:$0xff]  ;;  %v664_v25 = vld [vmem:[%s7604_s5 + $0x70] sm:$0xff]  ;;  %s4944_s24 = smov 16   ;;  %vm752_vm2 = vcmask 130048   ;;  %vm873_vm3 = vcmask 392192  }
  0x26   : > { %s8217_s23 = smov (!%p551_p13, %s4611_s23), 31  ;;  %597 = vperm.xlu1 %4782, %v581_v13   ;;  %607 = vperm.xlu2 %4783, %v583_v23   ;;  %v663_v26 = vld [vmem:[%s7604_s5 + $0x68] sm:$0xff]  ;;  %v662_v28 = vld [vmem:[%s7604_s5 + $0x60] sm:$0xff]  ;;  %v661_v30 = vld [vmem:[%s7604_s5 + $0x58] sm:$0xff]  ;;  %vm1284_vm4 = vcmask 261120   ;;  %s7660_s2 = sld [smem:[#allocation219_spill]] }
  0x27   : > { %s4612_s21 = sshll.u32 %s8217_s23, 3  ;;  %666 = vmatpush.msra.mxu2 %v665_v24  ;;  %v584_v29 = vld [vmem:[%s7612_s13 + $0x28] sm:$0xff]  ;;  %v660_v31 = vld [vmem:[%s7604_s5 + $0x50] sm:$0xff]  ;;  %v658_v34 = vld [vmem:[%s7604_s5 + $0x40] sm:$0xff]  ;;  %s547_s27 = sand.u32 1, %s4927_s22  }
  0x28   : > { %v659_v32 = vld [vmem:[%s7604_s5 + $0x48] sm:$0xff]  ;;  %v5190_v35 = vld [vmem:[%s7613_s14] sm:$0xff]  ;;  %v657_v36 = vld [vmem:[%s7604_s5 + $0x38] sm:$0xff]  ;;  %s4705_s26 = sshll.u32 %s5056_s25, 7  ;;  %s4503_s25 = scalar_lea.sflag [#allocation4], %s547_s27 }
  0x29   : > { %s5112_s17 = scalar_lea.vmem %s7658_s30, %s4612_s21  ;;  %667 = vmatpush.msra.mxu2 %v664_v25  ;;  %v656_v37 = vld [vmem:[%s7604_s5 + $0x30] sm:$0xff]  ;;  %v655_v38 = vld [vmem:[%s7604_s5 + $0x28] sm:$0xff]  ;;  %v654_v41 = vld [vmem:[%s7604_s5 + $0x20] sm:$0xff]  ;;  %s4610_s30 = sshll.u32 %s547_s27, 7 }
  0x2a   : > { %v572_v0 = vld [vmem:[%s5112_s17 + $0x78] sm:$0xff]  ;;  %v571_v1 = vld [vmem:[%s5112_s17 + $0x70] sm:$0xff]  ;;  %v570_v3 = vld [vmem:[%s5112_s17 + $0x68] sm:$0xff]  ;;  %s7529_s18 = scalar_lea.vmem [#allocation7], %s4610_s30  ;;  %s4514_s19 = scalar_lea.hbm %s7615_s16, %s4705_s26 }
  0x2b   : > { %615 = vmatpush.msra.mxu0 %v572_v0  ;;  %v569_v4 = vld [vmem:[%s5112_s17 + $0x60] sm:$0xff]  ;;  %v568_v6 = vld [vmem:[%s5112_s17 + $0x58] sm:$0xff]  ;;  %v567_v7 = vld [vmem:[%s5112_s17 + $0x50] sm:$0xff]  ;;  %668 = vmatpush.msra.mxu2 %v663_v26  ;;  %s4517_s20 = sshll.u32 %s4514_s19, 4  ;;  %s4885_s26 = scalar_lea.hbm %s7615_s16, 256  ;;  %s4518_s20 = int_to_ptr.hbm [resolvable:$true] %s4517_s20 }
  0x2c   : > { %v566_v8 = vld [vmem:[%s5112_s17 + $0x48] sm:$0xff]  ;;  %v565_v10 = vld [vmem:[%s5112_s17 + $0x40] sm:$0xff]  ;;  %v564_v11 = vld [vmem:[%s5112_s17 + $0x38] sm:$0xff]  ;;  %s4879_s23 = sshra.s32 %s4518_s20, 4  ;;  %s4880_s23 = int_to_ptr.hbm [resolvable:$true] %s4879_s23 }
  0x2d   : > { %616 = vmatpush.msra.mxu0 %v571_v1  ;;  %592 = vperm.xlu0 %4781, %v580_v9   ;;  %v563_v12 = vld [vmem:[%s5112_s17 + $0x30] sm:$0xff]  ;;  %v562_v14 = vld [vmem:[%s5112_s17 + $0x28] sm:$0xff]  ;;  %v561_v15 = vld [vmem:[%s5112_s17 + $0x20] sm:$0xff]  ;;  %s4881_s21 = scalar_lea.hbm %s4880_s23, 128  ;;  %p4886_p3 = scmp.lt.s32.totalorder %s4880_s23, %s7615_s16 }
  0x2e   : > { %v560_v16 = vld [vmem:[%s5112_s17 + $0x18] sm:$0xff]  ;;  %v559_v17 = vld [vmem:[%s5112_s17 + $0x10] sm:$0xff]  ;;  %602 = vperm.xlu1 %4782, %v582_v18   ;;  %v558_v19 = vld [vmem:[%s5112_s17 + $0x8] sm:$0xff]  ;;  %669 = vmatpush.msra.mxu2 %v662_v28  ;;  %p4882_p0 = scmp.ne.s32.totalorder %s4880_s23, %s4881_s21  ;;  %p4887_p4 = scmp.lt.s32.totalorder %s4885_s26, %s4881_s21 }
  0x2f   : > { %617 = vmatpush.msra.mxu0 %v570_v3  ;;  %v557_v20 = vld [vmem:[%s5112_s17] sm:$0xff]  ;;  %v574_v22 = vld [vmem:[%s7659_s1 + $0x8] sm:$0xff]  ;;  %v575_v27 = vld [vmem:[%s7659_s1 + $0x10] sm:$0xff]  ;;  %612 = vperm.xlu2 %4783, %v584_v29   ;;  %s4515_s17 = sshll.u32 %s7529_s18, 4  ;;  %s4516_s17 = int_to_ptr.vmem [resolvable:$true] %s4515_s17 }
  0x30   : > { %v573_v21 = vld [vmem:[%s7659_s1] sm:$0xff]  ;;  %670 = vmatpush.msra.mxu2 %v661_v30  ;;  %v576_v33 = vld [vmem:[%s7659_s1 + $0x18] sm:$0xff]  ;;  %v578_v40 = vld [vmem:[%s7659_s1 + $0x28] sm:$0xff]  ;;  %p4883_p1 = pnand %p4882_p0, %p5073_p5  ;;  %p4888_p7 = por %p4887_p4, %p4886_p3 }
  0x31   : > { %618 = vmatpush.msra.mxu0 %v569_v4  ;;  %v577_v39 = vld [vmem:[%s7659_s1 + $0x20] sm:$0xff]  ;;  %v653_v42 = vld [vmem:[%s7604_s5 + $0x18] sm:$0xff]  ;;  %v652_v43 = vld [vmem:[%s7604_s5 + $0x10] sm:$0xff] }
  0x32   : > { %671 = vmatpush.msra.mxu2 %v660_v31  ;;  %v651_v44 = vld [vmem:[%s7604_s5 + $0x8] sm:$0xff]  ;;  %v650_v45 = vld [vmem:[%s7604_s5] sm:$0xff]  ;;  %v710_v46 = vld [vmem:[%s7605_s6 + $0x78] sm:$0xff]  ;;  %p4884_p2 = pneg %p4883_p1 }
  0x33   : > { %619 = vmatpush.msra.mxu0 %v568_v6  ;;  %v709_v47 = vld [vmem:[%s7605_s6 + $0x70] sm:$0xff]  ;;  %v708_v48 = vld [vmem:[%s7605_s6 + $0x68] sm:$0xff]  ;;  %v707_v49 = vld [vmem:[%s7605_s6 + $0x60] sm:$0xff] }
  0x34   : > { %672 = vmatpush.msra.mxu2 %v659_v32  ;;  %v706_v50 = vld [vmem:[%s7605_s6 + $0x58] sm:$0xff]  ;;  %v705_v51 = vld [vmem:[%s7605_s6 + $0x50] sm:$0xff]  ;;  %v704_v52 = vld [vmem:[%s7605_s6 + $0x48] sm:$0xff]  ;;  %p4889_p8 = pnand %p4888_p7, %p4884_p2 }
  0x35   : > { %620 = vmatpush.msra.mxu0 %v567_v7  ;;  %v703_v53 = vld [vmem:[%s7605_s6 + $0x40] sm:$0xff]  ;;  %v702_v54 = vld [vmem:[%s7605_s6 + $0x38] sm:$0xff]  ;;  %v701_v55 = vld [vmem:[%s7605_s6 + $0x30] sm:$0xff] }
  0x36   : > { %673 = vmatpush.msra.mxu2 %v658_v34  ;;  %v700_v56 = vld [vmem:[%s7605_s6 + $0x28] sm:$0xff]  ;;  %v699_v57 = vld [vmem:[%s7605_s6 + $0x20] sm:$0xff]  ;;  %v698_v58 = vld [vmem:[%s7605_s6 + $0x18] sm:$0xff] }
  0x37   : > { %621 = vmatpush.msra.mxu0 %v566_v8  ;;  %798 = vperm.xlu2 %4783, %v5190_v35   ;;  %v697_v59 = vld [vmem:[%s7605_s6 + $0x10] sm:$0xff]  ;;  %v696_v60 = vld [vmem:[%s7605_s6 + $0x8] sm:$0xff]  ;;  %v695_v0 = vld [vmem:[%s7605_s6] sm:$0xff] }
  0x38   : > { %674 = vmatpush.msra.mxu2 %v657_v36  ;;  %v795_v26 = vld [vmem:[%s7613_s14 + $0x8] sm:$0xff] }
  0x39   : > { %622 = vmatpush.msra.mxu0 %v565_v10 }
  0x3a   : > { %675 = vmatpush.msra.mxu2 %v656_v37 }
  0x3b   : > { %623 = vmatpush.msra.mxu0 %v564_v11 }
  0x3c   : > { %676 = vmatpush.msra.mxu2 %v655_v38 }
  0x3d   : > { %624 = vmatpush.msra.mxu0 %v563_v12 }
  0x3e   : > { %677 = vmatpush.msra.mxu2 %v654_v41 }
  0x3f   : > { %625 = vmatpush.msra.mxu0 %v562_v14 }
  0x40   : > { %678 = vmatpush.msra.mxu2 %v653_v42 }
  0x41   : > { %626 = vmatpush.msra.mxu0 %v561_v15 }
  0x42   : > { %679 = vmatpush.msra.mxu2 %v652_v43  ;;  %v4946_v43 = vmov 3  }
  0x43   : > { %627 = vmatpush.msra.mxu0 %v560_v16  ;;  %4786 = vset.pattern.permute.xlu0 %v4946_v43 }
  0x44   : > { %680 = vmatpush.msra.mxu2 %v651_v44  ;;  %v4947_v44 = vmov 2  }
  0x45   : > { %628 = vmatpush.msra.mxu0 %v559_v17 }
  0x46   : > { %681 = vmatpush.msra.mxu2 %v650_v45  ;;  %v808_v45 = vld [vmem:[%s7606_s7] sm:$0xff] }
  0x47   : > { %629 = vmatpush.msra.mxu0 %v558_v19  ;;  %v4943_v19 = vmov 1  }
  0x48   : > { %711 = vmatpush.msrb.mxu2 %v710_v46  ;;  %4787 = vset.pattern.permute.xlu1 %v4943_v19  ;;  %v4615_v46 = vld [vmem:[%s7606_s7 + $0x8] sm:$0xff] }
  0x49   : > { %630 = vmatpush.msra.mxu0 %v557_v20  ;;  %972 = vmatpush.msra.mxu1 %v4615_v46 }
  0x4a   : > { %631 = vmatmul.f32.vlgmr.msra.gmra.mxu0 %v573_v21  ;;  %712 = vmatpush.msrb.mxu2 %v709_v47 }
  0x4c   : > { %713 = vmatpush.msrb.mxu2 %v708_v48 }
  0x4e   : > { %714 = vmatpush.msrb.mxu2 %v707_v49 }
  0x50   : > { %715 = vmatpush.msrb.mxu2 %v706_v50 }
  0x52   : > { %634 = vmatmul.f32.gmra.mxu0 %v574_v22  ;;  %716 = vmatpush.msrb.mxu2 %v705_v51 }
  0x54   : > { %717 = vmatpush.msrb.mxu2 %v704_v52 }
  0x56   : > { %718 = vmatpush.msrb.mxu2 %v703_v53 }
  0x58   : > { %719 = vmatpush.msrb.mxu2 %v702_v54 }
  0x5a   : > { %637 = vmatmul.f32.gmra.mxu0 %v575_v27  ;;  %720 = vmatpush.msrb.mxu2 %v701_v55  ;;  %v4945_v27 = vmov 8.0  }
  0x5b   : > { %4795 = vrcp.f32 %v4945_v27 }
  0x5c   : > { %721 = vmatpush.msrb.mxu2 %v700_v56 }
  0x5e   : > { %722 = vmatpush.msrb.mxu2 %v699_v57  ;;  %v811_v57 = vld [vmem:[%s7602_s3] sm:$0xff] }
  0x60   : > { %723 = vmatpush.msrb.mxu2 %v698_v58  ;;  %v812_v58 = vld [vmem:[%s7602_s3 + $0x8] sm:$0xff] }
  0x61   : > { %v4796_v28 = vpop.eup %4795 }
  0x62   : > { %640 = vmatmul.f32.gmra.mxu0 %v576_v33  ;;  %724 = vmatpush.msrb.mxu2 %v697_v59  ;;  %v742_v29 = vmul.f32 8.0, %v4796_v28  ;;  %vm746_vm1 = vweird.f32 %v4796_v28 }
  0x64   : > { %725 = vmatpush.msrb.mxu2 %v696_v60  ;;  %v743_v30 = vsub.f32 1.0, %v742_v29  ;;  %v1282_v60 = vld [vmem:[%s7608_s9 + $0x30] sm:$0xff] }
  0x65   : > { %1303 = vmatpush.msrb.mxu1 %v1282_v60  ;;  %v1277_v60 = vld [vmem:[%s7608_s9 + $0x8] sm:$0xff] }
  0x66   : > { %726 = vmatpush.msrb.mxu2 %v695_v0  ;;  %v744_v31 = vmul.f32 %v4796_v28, %v743_v30 }
  0x68   : > { %v745_v32 = vadd.f32 %v4796_v28, %v744_v31  ;;  %v4623_v31 = vld [vmem:[%s7602_s3 + $0x18] sm:$0xff] }
  0x6a   : > { %643 = vmatmul.f32.gmra.mxu0 %v577_v39  ;;  %v747_v33 = vsel %vm746_vm1, %v4796_v28, %v745_v32  ;;  %v750_v39 = vld [vmem:[%s7603_s4] sm:$0xff] }
  0x72   : > { %646 = vmatmul.f32.gmra.mxu0 %v578_v40  ;;  %v751_v40 = vld [vmem:[%s7603_s4 + $0x8] sm:$0xff] }
  0x80   : > { %v608_v11 = vpop.permute.xlu2 %607 }
  0x89   : > { %v613_v14 = vpop.permute.xlu2 %612 }
  0x91   : > { %v799_v47 = vpop.permute.xlu2 %798 }
  0x97   : > { %v588_v61 = vpop.permute.xlu0 %587 }
  0x98   : > { %v598_v5 = vpop.permute.xlu1 %597 }
  0x9f   : > { %v593_v1 = vpop.permute.xlu0 %592 }
  0xa0   : > { %v603_v8 = vpop.permute.xlu1 %602 }
  0xc7   : > { %v632_v62 = vpop.f32.mrf.mxu0 }
  0xc8   : > { %v633_v63 = vadd.f32 %v632_v62, %v588_v61  ;;  %v1280_v61 = vld [vmem:[%s7608_s9 + $0x20] sm:$0xff]  ;;  %v1278_v62 = vld [vmem:[%s7608_s9 + $0x10] sm:$0xff] }
  0xc9   : > { %1304 = vmatpush.msrb.mxu1 %v1280_v61  ;;  %v1042_v61 = vld [vmem:[%s7660_s2 + $0x8] sm:$0xff] }
  0xca   : > { %682 = vmatmul.f32.vlgmr.msra.gmra.mxu2 %v633_v63  ;;  %v1276_v63 = vld [vmem:[%s7608_s9] sm:$0xff] }
  0xcb   : > { %1305 = vmatpush.msrb.mxu1 %v1278_v62  ;;  %v1055_v62 = vld [vmem:[%s7660_s2 + $0x70] sm:$0xff] }
  0xcd   : > { %1306 = vmatpush.msrb.mxu1 %v1276_v63  ;;  %v5476_v63 = vld [vmem:[%s7660_s2 + $0xa8] sm:$0xff] }
  0xcf   : > { %v635_v3 = vpop.f32.mrf.mxu0 }
  0xd0   : > { %v636_v4 = vadd.f32 %v635_v3, %v593_v1 }
  0xd2   : > { %685 = vmatmul.f32.gmra.mxu2 %v636_v4 }
  0xd7   : > { %v638_v6 = vpop.f32.mrf.mxu0 }
  0xd8   : > { %v639_v7 = vadd.f32 %v638_v6, %v598_v5 }
  0xda   : > { %688 = vmatmul.f32.gmra.mxu2 %v639_v7 }
  0xdf   : > { %v641_v9 = vpop.f32.mrf.mxu0 }
  0xe0   : > { %v642_v10 = vadd.f32 %v641_v9, %v603_v8 }
  0xe2   : > { %691 = vmatmul.f32.gmra.mxu2 %v642_v10 }
  0xe7   : > { %v644_v12 = vpop.f32.mrf.mxu0 }
  0xe8   : > { %v5271_v13 = vadd.f32 %v644_v12, %v608_v11 }
  0xea   : > { %727 = vmatmul.f32.vlgmr.msrb.gmra.mxu2 %v5271_v13 }
  0xef   : > { %v647_v15 = vpop.f32.mrf.mxu0 }
  0xf0   : > { %v5274_v16 = vadd.f32 %v647_v15, %v613_v14 }
  0xf2   : > { %730 = vmatmul.f32.gmra.mxu2 %v5274_v16 }
 0x14d   : > { %v5277_v17 = vpop.f32.mrf.mxu2 }
 0x155   : > { %v5279_v18 = vpop.f32.mrf.mxu2 }
 0x15d   : > { %v689_v20 = vpop.f32.mrf.mxu2 }
 0x165   : > { %v692_v21 = vpop.f32.mrf.mxu2 }
 0x16d   : > { %v728_v22 = vpop.f32.mrf.mxu2 }
 0x16e   : > { %v735_v23 = vsel %vm734_vm0, %v728_v22, 0.0 }
 0x16f   : > { %736 = vadd.xlane.f32.xlu1 %v735_v23 }
 0x175   : > { %v731_v24 = vpop.f32.mrf.mxu2 }
 0x176   : > { %v738_v25 = vsel %vm734_vm0, %v731_v24, 0.0 }
 0x177   : > { %739 = vadd.xlane.f32.xlu0 %v738_v25  ;;  %v1009_v25 = vld [vmem:[%s7607_s8] sm:$0xff] }
 0x188   : > { %870 = vperm.xlu1 %4787, %v795_v26  }
 0x18b   : > { %914 = vperm.xlu0 %4786, %v5190_v35  }
 0x190   : > { %1270 = vrot.lane.b32.xlu1 %v692_v21, %s4944_s24 }
 0x191   : > { %4790 = vset.pattern.permute.xlu1 %v4942_v2 }
 0x193   : > { %4791 = vset.pattern.permute.xlu0 %v4942_v2 }
 0x1e2   : > { %v737_v34 = vpop.xlane.xlu1 %736 }
 0x1e3   : > { %v748_v38 = vmul.f32 %v747_v33, %v737_v34 }
 0x1ea   : > { %v740_v36 = vpop.xlane.xlu0 %739 }
 0x1eb   : > { %v749_v37 = vmul.f32 %v747_v33, %v740_v36 }
 0x1ed   : > { %773 = vmatpush.msra.mxu3 %v749_v37 }
 0x1ef   : > { %774 = vmatpush.msra.mxu3 %v748_v38 }
 0x1f0   : > { %4613 = vmatmul.msk.f32.vlgmr.msra.gmra.mxu3 %vm752_vm2, %v750_v39  ;;  %v1058_v39 = vld [vmem:[%s7614_s15 + $0x8] sm:$0xff] }
 0x1f1   : > { %834 = vmatpush.msrb.mxu3 %v808_v45  ;;  %1080 = vperm.xlu1 %4790, %v1058_v39  }
 0x1f3   : > { %857 = vmatpush.msra.mxu3 %v4615_v46  ;;  %v1066_v46 = vld [vmem:[%s7614_s15 + $0x48] sm:$0xff] }
 0x1f8   : > { %4614 = vmatmul.msk.f32.gmra.mxu3 %vm752_vm2, %v751_v40  ;;  %v5375_v40 = vld [vmem:[%s7614_s15 + $0x20] sm:$0xff] }
 0x1f9   : > { %1095 = vperm.xlu1 %4790, %v5375_v40  }
 0x1fa   : > { %v871_v9 = vpop.permute.xlu1 %870 }
 0x1fd   : > { %v915_v5 = vpop.permute.xlu0 %914 }
 0x202   : > { %v1271_v23 = vpop.permute.xlu1 %1270 }
 0x273   : > { %v776_v41 = vpop.f32.mrf.mxu3 }
 0x274   : > { %784 = vperm.xlu2 %4783, %v776_v41   ;;  %v5380_v41 = vld [vmem:[%s7614_s15 + $0x18] sm:$0xff] }
 0x275   : > { %1090 = vperm.xlu0 %4791, %v5380_v41  }
 0x27b   : > { %v779_v42 = vpop.f32.mrf.mxu3 }
 0x27c   : > { %789 = vperm.xlu2 %4783, %v779_v42   ;;  %v5385_v42 = vld [vmem:[%s7614_s15] sm:$0xff] }
 0x284   : > { %803 = vperm.xlu2 %4783, %v795_v26  }
 0x28c   : > { %4784 = vset.pattern.permute.xlu2 %v4943_v19 }
 0x28d   : > { %866 = vperm.xlu2 %4784, %v5190_v35  }
 0x295   : > { %4785 = vset.pattern.permute.xlu2 %v4947_v44  ;;  %v5396_v44 = vld [vmem:[%s7614_s15 + $0x40] sm:$0xff] }
 0x296   : > { %904 = vperm.xlu2 %4785, %v5190_v35   ;;  %1115 = vperm.xlu0 %4791, %v5396_v44  }
 0x29e   : > { %908 = vperm.xlu2 %4785, %v795_v26  }
 0x2a6   : > { %4788 = vset.pattern.permute.xlu2 %v4946_v43  ;;  %v1063_v43 = vld [vmem:[%s7614_s15 + $0x30] sm:$0xff] }
 0x2a7   : > { %918 = vperm.xlu2 %4788, %v795_v26   ;;  %1105 = vperm.xlu1 %4790, %v1063_v43  }
 0x2af   : > { %1268 = vrot.lane.b32.xlu2 %v689_v20, %s4944_s24  ;;  %1120 = vperm.xlu1 %4790, %v1066_v46  }
 0x2b0   : > { %4789 = vset.pattern.permute.xlu2 %v4942_v2 }
 0x2b7   : > { %1075 = vperm.xlu2 %4789, %v5385_v42  }
 0x2ce   : > { %v785_v35 = vpop.permute.xlu2 %784 }
 0x2cf   : > { %v792_v48 = vadd.f32 %v785_v35, %v728_v22  ;;  %v5413_v35 = vld [vmem:[%s7614_s15 + $0x28] sm:$0xff] }
 0x2d1   : > { %v806_v49 = vadd.f32 %v799_v47, %v792_v48  ;;  %v5408_v47 = vld [vmem:[%s7614_s15 + $0x58] sm:$0xff] }
 0x2d2   : > { %1130 = vperm.xlu0 %4791, %v5408_v47  }
 0x2d3   : > { %4616 = vmatmul.msk.f32.vlgmr.msrb.gmra.mxu3 %vm734_vm0, %v806_v49 }
 0x2d4   : > { %949 = vmatpush.msrb.mxu3 %v808_v45  ;;  %v1059_v45 = vld [vmem:[%s7614_s15 + $0x10] sm:$0xff] }
 0x2d5   : > { %1085 = vperm.xlu2 %4789, %v1059_v45  }
 0x2d6   : > { %v790_v50 = vpop.permute.xlu2 %789 }
 0x2d7   : > { %v793_v2 = vadd.f32 %v790_v50, %v731_v24  ;;  %v5346_v24 = vsel %vm752_vm2, %v5279_v18, %v1271_v23  ;;  %v4622_v18 = vld [vmem:[%s7602_s3 + $0x10] sm:$0xff]  ;;  %v1879_v23 = vld [vmem:[#allocation2 + $0x788] sm:$0xff] }
 0x2d8   : > { %v5423_v50 = vld [vmem:[%s7614_s15 + $0x70] sm:$0xff] }
 0x2da   : > { %1145 = vperm.xlu0 %4791, %v5423_v50  }
 0x2dd   : > { %1100 = vperm.xlu2 %4789, %v5413_v35  }
 0x2de   : > { %v804_v51 = vpop.permute.xlu2 %803 }
 0x2df   : > { %v807_v52 = vadd.f32 %v804_v51, %v793_v2  ;;  %v1064_v2 = vld [vmem:[%s7614_s15 + $0x38] sm:$0xff] }
 0x2e1   : > { %4617 = vmatmul.msk.f32.gmra.mxu3 %vm734_vm0, %v807_v52 }
 0x2e2   : > { %4793 = vset.pattern.permute.xlu0 %v4943_v19 }
 0x2e3   : > { %1363 = vperm.xlu0 %4793, %v1058_v39   ;;  %v1798_v39 = vld [vmem:[#allocation2 + $0x500] sm:$0xff] }
 0x2e5   : > { %1110 = vperm.xlu2 %4789, %v1064_v2  }
 0x2e7   : > { %v867_v59 = vpop.permute.xlu2 %866 }
 0x2e9   : > { %4618 = vmatmul.msk.f32.vlgmr.msra.gmra.mxu3 %vm734_vm0, %v806_v49 }
 0x2ea   : > { %1031 = vmatpush.msra.mxu3 %v1009_v25  ;;  %v1862_v25 = vld [vmem:[#allocation2 + $0x700] sm:$0xff] }
 0x2eb   : > { %1383 = vperm.xlu0 %4793, %v1063_v43   ;;  %v1783_v43 = vld [vmem:[#allocation2 + $0x488] sm:$0xff] }
 0x2f0   : > { %v905_v0 = vpop.permute.xlu2 %904 }
 0x2f1   : > { %4619 = vmatmul.msk.f32.gmra.mxu3 %vm734_vm0, %v807_v52 }
 0x2f3   : > { %1395 = vperm.xlu0 %4793, %v1066_v46   ;;  %v1766_v46 = vld [vmem:[#allocation2 + $0x400] sm:$0xff] }
 0x2f8   : > { %v909_v3 = vpop.permute.xlu2 %908 }
 0x301   : > { %v919_v12 = vpop.permute.xlu2 %918 }
 0x309   : > { %v1269_v21 = vpop.permute.xlu2 %1268 }
 0x30a   : > { %v5340_v22 = vsel %vm752_vm2, %v5277_v17, %v1269_v21  ;;  %v5580_v21 = vld [vmem:[%s7660_s2 + $0xe0] sm:$0xff] }
 0x356   : > { %v836_v53 = vpop.f32.mrf.mxu3 }
 0x364   : > { %v839_v54 = vpop.f32.mrf.mxu3 }
 0x36c   : > { %v859_v55 = vpop.f32.mrf.mxu3 }
 0x374   : > { %v862_v56 = vpop.f32.mrf.mxu3 }
 0x375   : > { %890 = vmatpush.msra.mxu2 %v862_v56  ;;  %v1283_v56 = vld [vmem:[%s7608_s9 + $0x38] sm:$0xff] }
 0x377   : > { %891 = vmatpush.msra.mxu2 %v859_v55  ;;  %v1054_v55 = vld [vmem:[%s7660_s2 + $0x68] sm:$0xff] }
 0x379   : > { %892 = vmatpush.msra.mxu2 %v807_v52 }
 0x37b   : > { %893 = vmatpush.msra.mxu2 %v806_v49  ;;  %v1069_v49 = vld [vmem:[%s7614_s15 + $0x60] sm:$0xff] }
 0x37c   : > { %1135 = vperm.xlu1 %4790, %v1069_v49   ;;  %1407 = vperm.xlu0 %4793, %v1069_v49   ;;  %v5616_v49 = vld [vmem:[%s7660_s2 + $0xf0] sm:$0xff] }
 0x37d   : > { %894 = vmatpush.msra.mxu2 %v839_v54  ;;  %v1041_v54 = vld [vmem:[%s7660_s2] sm:$0xff] }
 0x37f   : > { %895 = vmatpush.msra.mxu2 %v836_v53 }
 0x380   : > { %4620 = vmatmul.msk.f32.vlgmr.msra.gmra.mxu2 %vm873_vm3, %v811_v57  ;;  %v1072_v57 = vld [vmem:[%s7614_s15 + $0x78] sm:$0xff] }
 0x384   : > { %1150 = vperm.xlu1 %4790, %v1072_v57   ;;  %1419 = vperm.xlu0 %4793, %v1072_v57   ;;  %v1719_v57 = vld [vmem:[#allocation2 + $0x288] sm:$0xff] }
 0x388   : > { %4621 = vmatmul.msk.f32.gmra.mxu2 %vm873_vm3, %v812_v58  ;;  %v1067_v58 = vld [vmem:[%s7614_s15 + $0x50] sm:$0xff] }
 0x389   : > { %1125 = vperm.xlu2 %4789, %v1067_v58  }
 0x38c   : > { %4794 = vset.pattern.permute.xlu1 %v4943_v19 }
 0x38d   : > { %1367 = vperm.xlu1 %4794, %v1059_v45   ;;  %v1784_v45 = vld [vmem:[#allocation2 + $0x490] sm:$0xff] }
 0x395   : > { %1375 = vperm.xlu1 %4794, %v5375_v40   ;;  %v1799_v40 = vld [vmem:[#allocation2 + $0x508] sm:$0xff] }
 0x39d   : > { %1387 = vperm.xlu1 %4794, %v1064_v2   ;;  %v1751_v2 = vld [vmem:[#allocation2 + $0x388] sm:$0xff] }
 0x3a5   : > { %1399 = vperm.xlu1 %4794, %v1067_v58   ;;  %v1702_v58 = vld [vmem:[#allocation2 + $0x200] sm:$0xff] }
 0x403   : > { %v897_v1 = vpop.f32.mrf.mxu2 }
 0x404   : > { %v898_v4 = vadd.f32 %v897_v1, %v867_v59  ;;  %v1279_v59 = vld [vmem:[%s7608_s9 + $0x18] sm:$0xff]  ;;  %v1043_v1 = vld [vmem:[%s7660_s2 + $0x10] sm:$0xff] }
 0x406   : > { %v911_v6 = vmul.f32 %v905_v0, %v898_v4  ;;  %v1070_v0 = vld [vmem:[%s7614_s15 + $0x68] sm:$0xff]  ;;  %v5496_v4 = vld [vmem:[%s7660_s2 + $0xb0] sm:$0xff] }
 0x407   : > { %1140 = vperm.xlu2 %4789, %v1070_v0   ;;  %1411 = vperm.xlu1 %4794, %v1070_v0   ;;  %v1686_v0 = vld [vmem:[#allocation2 + $0x180] sm:$0xff] }
 0x408   : > { %v921_v7 = vadd.f32 %v915_v5, %v911_v6  ;;  %v1044_v5 = vld [vmem:[%s7660_s2 + $0x18] sm:$0xff] }
 0x409   : > { %v5511_v6 = vld [vmem:[%s7660_s2 + $0xb8] sm:$0xff] }
 0x40a   : > { %v923_v8 = vmax.f32 %v921_v7, 0.0  ;;  %v5525_v7 = vld [vmem:[%s7660_s2 + $0xc0] sm:$0xff] }
 0x40b   : > { %v900_v10 = vpop.f32.mrf.mxu2 }
 0x40c   : > { %v901_v11 = vadd.f32 %v900_v10, %v871_v9  ;;  %4624 = vmatmul.msk.f32.vlgmr.msrb.gmra.mxu3 %vm734_vm0, %v923_v8  ;;  %4626 = vmatmul.msk.f32.vlgmr.msra.gmra.mxu1 %vm734_vm0, %v923_v8  ;;  %v5539_v9 = vld [vmem:[%s7660_s2 + $0xc8] sm:$0xff]  ;;  %v1047_v10 = vld [vmem:[%s7660_s2 + $0x30] sm:$0xff] }
 0x40e   : > { %v912_v14 = vmul.f32 %v909_v3, %v901_v11  ;;  %v1056_v3 = vld [vmem:[%s7660_s2 + $0x78] sm:$0xff]  ;;  %v5551_v11 = vld [vmem:[%s7660_s2 + $0xd0] sm:$0xff] }
 0x40f   : > { %4792 = vset.pattern.permute.xlu2 %v4943_v19  ;;  %v1045_v19 = vld [vmem:[%s7660_s2 + $0x20] sm:$0xff] }
 0x410   : > { %v922_v15 = vadd.f32 %v919_v12, %v912_v14  ;;  %1359 = vperm.xlu2 %4792, %v5385_v42   ;;  %v1048_v12 = vld [vmem:[%s7660_s2 + $0x38] sm:$0xff]  ;;  %v1782_v42 = vld [vmem:[#allocation2 + $0x480] sm:$0xff] }
 0x411   : > { %v5563_v14 = vld [vmem:[%s7660_s2 + $0xd8] sm:$0xff] }
 0x412   : > { %v924_v20 = vmax.f32 %v922_v15, 0.0  ;;  %v1049_v15 = vld [vmem:[%s7660_s2 + $0x40] sm:$0xff] }
 0x414   : > { %4625 = vmatmul.msk.f32.gmra.mxu3 %vm734_vm0, %v924_v20  ;;  %4627 = vmatmul.msk.f32.gmra.mxu1 %vm734_vm0, %v924_v20 }
 0x418   : > { %1371 = vperm.xlu2 %4792, %v5380_v41   ;;  %v1800_v41 = vld [vmem:[#allocation2 + $0x510] sm:$0xff] }
 0x41c   : > { %4648 = vmatmul.msk.f32.vlgmr.msrb.gmra.mxu1 %vm1284_vm4, %v5340_v22 }
 0x420   : > { %1379 = vperm.xlu2 %4792, %v5413_v35   ;;  %v1768_v35 = vld [vmem:[#allocation2 + $0x410] sm:$0xff] }
 0x424   : > { %4649 = vmatmul.msk.f32.gmra.mxu1 %vm1284_vm4, %v5346_v24 }
 0x428   : > { %1391 = vperm.xlu2 %4792, %v5396_v44   ;;  %v1051_v44 = vld [vmem:[%s7660_s2 + $0x50] sm:$0xff] }
 0x430   : > { %1403 = vperm.xlu2 %4792, %v5408_v47   ;;  %v1767_v47 = vld [vmem:[#allocation2 + $0x408] sm:$0xff] }
 0x438   : > { %1415 = vperm.xlu2 %4792, %v5423_v50   ;;  %v1750_v50 = vld [vmem:[#allocation2 + $0x380] sm:$0xff] }
 0x489   : > { %v974_v26 = vpop.f32.mrf.mxu1 }
 0x48f   : > { %v951_v27 = vpop.f32.mrf.mxu3 }
 0x491   : > { %v977_v17 = vpop.f32.mrf.mxu1 }
 0x492   : > { %996 = vmatpush.msrb.mxu2 %v977_v17  ;;  %v1846_v17 = vld [vmem:[#allocation2 + $0x680] sm:$0xff] }
 0x494   : > { %997 = vmatpush.msrb.mxu2 %v974_v26  ;;  %v1863_v26 = vld [vmem:[#allocation2 + $0x708] sm:$0xff] }
 0x496   : > { %998 = vmatpush.msrb.mxu2 %v924_v20  ;;  %v5575_v20 = vld [vmem:[%s7660_s2 + $0x80] sm:$0xff] }
 0x497   : > { %v954_v28 = vpop.f32.mrf.mxu3 }
 0x498   : > { %999 = vmatpush.msrb.mxu2 %v923_v8  ;;  %v1046_v8 = vld [vmem:[%s7660_s2 + $0x28] sm:$0xff] }
 0x499   : > { %v1308_v29 = vpop.f32.mrf.mxu1 }
 0x49a   : > { %1000 = vmatpush.msrb.mxu2 %v954_v28  ;;  %v1847_v28 = vld [vmem:[#allocation2 + $0x688] sm:$0xff] }
 0x49c   : > { %1001 = vmatpush.msrb.mxu2 %v951_v27  ;;  %v1864_v27 = vld [vmem:[#allocation2 + $0x710] sm:$0xff] }
 0x49d   : > { %4628 = vmatmul.msk.f32.vlgmr.msrb.gmra.mxu2 %vm873_vm3, %v4622_v18  ;;  %v1050_v18 = vld [vmem:[%s7660_s2 + $0x48] sm:$0xff] }
 0x4a1   : > { %v1311_v30 = vpop.f32.mrf.mxu1 }
 0x4a2   : > { %4797 = vtanh.f32 %v1311_v30  ;;  %v1830_v30 = vld [vmem:[#allocation2 + $0x600] sm:$0xff] }
 0x4a3   : > { %4799 = vtanh.f32 %v1308_v29  ;;  %v1848_v29 = vld [vmem:[#allocation2 + $0x690] sm:$0xff] }
 0x4a5   : > { %4629 = vmatmul.msk.f32.gmra.mxu2 %vm873_vm3, %v4623_v31  ;;  %v1831_v31 = vld [vmem:[#allocation2 + $0x608] sm:$0xff] }
 0x4a8   : > { %v5361_v32 = vpop.eup %4797 }
 0x4a9   : > { %4708 = vmatpush.msrb.mxu3 %v5361_v32  ;;  %v5364_v33 = vpop.eup %4799 }
 0x4ab   : > { %4709 = vmatpush.msrb.mxu3 %v5364_v33 }
 0x520   : > { %v1003_v34 = vpop.f32.mrf.mxu2 }
 0x521   : > { %v1004_v36 = vadd.f32 1.0, %v1003_v34  ;;  %v5597_v34 = vld [vmem:[%s7660_s2 + $0xe8] sm:$0xff] }
 0x523   : > { %4630 = vmatmul.msk.f32.vlgmr.msra.gmra.mxu3 %vm734_vm0, %v1004_v36  ;;  %v1814_v36 = vld [vmem:[#allocation2 + $0x580] sm:$0xff] }
 0x528   : > { %v1006_v37 = vpop.f32.mrf.mxu2 }
 0x529   : > { %v1007_v38 = vadd.f32 1.0, %v1006_v37  ;;  %v1815_v37 = vld [vmem:[#allocation2 + $0x588] sm:$0xff] }
 0x52b   : > { %4631 = vmatmul.msk.f32.gmra.mxu3 %vm734_vm0, %v1007_v38  ;;  %v1816_v38 = vld [vmem:[#allocation2 + $0x590] sm:$0xff] }
 0x5a6   : > { %v1033_v48 = vpop.f32.mrf.mxu3 }
 0x5a7   : > { %v1039_v53 = vmul.f32 %v1033_v48, %v5271_v13  ;;  %v1281_v13 = vld [vmem:[%s7608_s9 + $0x28] sm:$0xff]  ;;  %v5610_v48 = vld [vmem:[%s7660_s2 + $0x90] sm:$0xff] }
 0x5ae   : > { %v1036_v51 = vpop.f32.mrf.mxu3 }
 0x5af   : > { %v1040_v52 = vmul.f32 %v1036_v51, %v5274_v16  ;;  %v5448_v16 = vld [vmem:[%s7660_s2 + $0xa0] sm:$0xff]  ;;  %v1752_v51 = vld [vmem:[#allocation2 + $0x390] sm:$0xff] }
 0x5b0   : > { %4672 = vmatmul.msk.f32.vlgmr.msrb.gmra.mxu3 %vm752_vm2, %v5448_v16 }
 0x5b1   : > { %1215 = vmatpush.msrb.mxu0 %v1040_v52  ;;  %4706 = vmatpush.msra.mxu2 %v1040_v52  ;;  %v1734_v52 = vld [vmem:[#allocation2 + $0x300] sm:$0xff] }
 0x5b3   : > { %1216 = vmatpush.msrb.mxu0 %v1039_v53  ;;  %4707 = vmatpush.msra.mxu2 %v1039_v53  ;;  %v1735_v53 = vld [vmem:[#allocation2 + $0x308] sm:$0xff] }
 0x5b4   : > { %4632 = vmatmul.msk.f32.vlgmr.msrb.gmra.mxu0 %vm752_vm2, %v1041_v54  ;;  %4645 = vmatmul.msk.f32.vlgmr.msra.gmra.mxu2 %vm752_vm2, %v1054_v55  ;;  %v1736_v54 = vld [vmem:[#allocation2 + $0x310] sm:$0xff]  ;;  %v1718_v55 = vld [vmem:[#allocation2 + $0x280] sm:$0xff] }
 0x5b5   : > { %1326 = vmatpush.msrb.mxu2 %v1283_v56  ;;  %1959 = vmatpush.msra.mxu0 %v1879_v23  ;;  %v1052_v56 = vld [vmem:[%s7660_s2 + $0x58] sm:$0xff]  ;;  %v1638_v23 = vld [vmem:[#allocation2] sm:$0xff] }
 0x5b7   : > { %1327 = vmatpush.msrb.mxu2 %v1281_v13  ;;  %1960 = vmatpush.msra.mxu0 %v1863_v26  ;;  %v1720_v13 = vld [vmem:[#allocation2 + $0x290] sm:$0xff]  ;;  %v1076_v26 = vpop.permute.xlu2 %1075 }
 0x5b8   : > { %4673 = vmatmul.msk.f32.gmra.mxu3 %vm752_vm2, %v5476_v63 }
 0x5b9   : > { %1328 = vmatpush.msrb.mxu2 %v1279_v59  ;;  %1961 = vmatpush.msra.mxu0 %v1847_v28  ;;  %v1704_v59 = vld [vmem:[#allocation2 + $0x210] sm:$0xff] }
 0x5bb   : > { %1329 = vmatpush.msrb.mxu2 %v1277_v60  ;;  %1962 = vmatpush.msra.mxu0 %v1831_v31  ;;  %v5628_v60 = vld [vmem:[%s7660_s2 + $0x98] sm:$0xff] }
 0x5bc   : > { %4633 = vmatmul.msk.f32.gmra.mxu0 %vm752_vm2, %v1042_v61  ;;  %4646 = vmatmul.msk.f32.gmra.mxu2 %vm752_vm2, %v1055_v62  ;;  %v1703_v61 = vld [vmem:[#allocation2 + $0x208] sm:$0xff]  ;;  %v5634_v62 = vld [vmem:[%s7660_s2 + $0xf8] sm:$0xff] }
 0x5bd   : > { %1484 = vmatpush.msra.mxu2 %v5361_v32  ;;  %v1832_v32 = vld [vmem:[#allocation2 + $0x610] sm:$0xff]  ;;  %1963 = vmatpush.msra.mxu0 %v1815_v37 }
 0x5bf   : > { %1485 = vmatpush.msra.mxu2 %v5364_v33  ;;  %v5592_v33 = vld [vmem:[%s7660_s2 + $0x88] sm:$0xff]  ;;  %1964 = vmatpush.msra.mxu0 %v1799_v40  ;;  %v1091_v40 = vpop.permute.xlu0 %1090 }
 0x5c0   : > { %4674 = vmatmul.msk.f32.gmra.mxu3 %vm752_vm2, %v5496_v4 }
 0x5c1   : > { %1965 = vmatpush.msra.mxu0 %v1783_v43 }
 0x5c3   : > { %1966 = vmatpush.msra.mxu0 %v1767_v47 }
 0x5c4   : > { %4634 = vmatmul.msk.f32.gmra.mxu0 %vm752_vm2, %v1043_v1  ;;  %4647 = vmatmul.msk.f32.gmra.mxu2 %vm752_vm2, %v1056_v3  ;;  %v1688_v1 = vld [vmem:[#allocation2 + $0x190] sm:$0xff]  ;;  %v1687_v3 = vld [vmem:[#allocation2 + $0x188] sm:$0xff] }
 0x5c5   : > { %1967 = vmatpush.msra.mxu0 %v1751_v2 }
 0x5c7   : > { %1968 = vmatpush.msra.mxu0 %v1735_v53 }
 0x5c8   : > { %4675 = vmatmul.msk.f32.gmra.mxu3 %vm752_vm2, %v5511_v6 }
 0x5c9   : > { %1969 = vmatpush.msra.mxu0 %v1719_v57 }
 0x5cb   : > { %1970 = vmatpush.msra.mxu0 %v1703_v61  ;;  %v1849_v61 = vld [vmem:[#allocation2 + $0x698] sm:$0xff] }
 0x5cc   : > { %4635 = vmatmul.msk.f32.gmra.mxu0 %vm752_vm2, %v1044_v5  ;;  %4650 = vmatmul.msk.f32.vlgmr.msrb.gmra.mxu2 %vm1284_vm4, %v5340_v22  ;;  %v1878_v22 = vld [vmem:[#allocation2 + $0x780] sm:$0xff] }
 0x5cd   : > { %1894 = vmatpush.msrb.mxu2 %v1878_v22  ;;  %v1670_v5 = vld [vmem:[#allocation2 + $0x100] sm:$0xff]  ;;  %1971 = vmatpush.msra.mxu0 %v1687_v3  ;;  %v1656_v22 = vld [vmem:[#allocation2 + $0x90] sm:$0xff] }
 0x5cf   : > { %1895 = vmatpush.msrb.mxu2 %v1862_v25  ;;  %v1640_v25 = vld [vmem:[#allocation2 + $0x10] sm:$0xff] }
 0x5d0   : > { %4676 = vmatmul.msk.f32.gmra.mxu3 %vm752_vm2, %v5525_v7 }
 0x5d1   : > { %1896 = vmatpush.msrb.mxu2 %v1846_v17 }
 0x5d3   : > { %1897 = vmatpush.msrb.mxu2 %v1830_v30 }
 0x5d4   : > { %4636 = vmatmul.msk.f32.gmra.mxu0 %vm752_vm2, %v1045_v19  ;;  %4651 = vmatmul.msk.f32.gmra.mxu2 %vm1284_vm4, %v5346_v24  ;;  %v1880_v24 = vld [vmem:[#allocation2 + $0x790] sm:$0xff] }
 0x5d5   : > { %2024 = vmatpush.msra.mxu3 %v1880_v24  ;;  %1898 = vmatpush.msrb.mxu2 %v1814_v36  ;;  %v1672_v19 = vld [vmem:[#allocation2 + $0x110] sm:$0xff]  ;;  %v1639_v24 = vld [vmem:[#allocation2 + $0x8] sm:$0xff]  ;;  %v1086_v36 = vpop.permute.xlu2 %1085 }
 0x5d7   : > { %2025 = vmatpush.msra.mxu3 %v1864_v27  ;;  %1899 = vmatpush.msrb.mxu2 %v1798_v39 }
 0x5d8   : > { %4677 = vmatmul.msk.f32.gmra.mxu3 %vm752_vm2, %v5539_v9 }
 0x5d9   : > { %2026 = vmatpush.msra.mxu3 %v1848_v29  ;;  %1900 = vmatpush.msrb.mxu2 %v1782_v42  ;;  %v1081_v29 = vpop.permute.xlu1 %1080 }
 0x5db   : > { %2027 = vmatpush.msra.mxu3 %v1832_v32  ;;  %1901 = vmatpush.msrb.mxu2 %v1766_v46 }
 0x5dc   : > { %4637 = vmatmul.msk.f32.gmra.mxu0 %vm752_vm2, %v1046_v8  ;;  %4668 = vmatmul.msk.f32.vlgmr.msra.gmra.mxu2 %vm752_vm2, %v5575_v20  ;;  %v1671_v8 = vld [vmem:[#allocation2 + $0x108] sm:$0xff] }
 0x5dd   : > { %2028 = vmatpush.msra.mxu3 %v1816_v38  ;;  %1902 = vmatpush.msrb.mxu2 %v1750_v50  ;;  %v1101_v2 = vpop.permute.xlu2 %1100 }
 0x5de   : > { %1972 = vmatpush.msra.mxu0 %v1671_v8  ;;  %v1116_v8 = vpop.permute.xlu0 %1115 }
 0x5df   : > { %2029 = vmatpush.msra.mxu3 %v1800_v41  ;;  %1903 = vmatpush.msrb.mxu2 %v1734_v52 }
 0x5e0   : > { %4678 = vmatmul.msk.f32.gmra.mxu3 %vm752_vm2, %v5551_v11 }
 0x5e1   : > { %2030 = vmatpush.msra.mxu3 %v1784_v45  ;;  %1904 = vmatpush.msrb.mxu2 %v1718_v55  ;;  %v1096_v45 = vpop.permute.xlu1 %1095 }
 0x5e3   : > { %2031 = vmatpush.msra.mxu3 %v1768_v35  ;;  %1905 = vmatpush.msrb.mxu2 %v1702_v58  ;;  %v1881_v58 = vld [vmem:[#allocation2 + $0x798] sm:$0xff] }
 0x5e4   : > { %4638 = vmatmul.msk.f32.gmra.mxu0 %vm752_vm2, %v1047_v10  ;;  %4669 = vmatmul.msk.f32.gmra.mxu2 %vm752_vm2, %v5592_v33  ;;  %v1053_v10 = vld [vmem:[%s7660_s2 + $0x60] sm:$0xff] }
 0x5e5   : > { %2032 = vmatpush.msra.mxu3 %v1752_v51  ;;  %1906 = vmatpush.msrb.mxu2 %v1686_v0 }
 0x5e7   : > { %2033 = vmatpush.msra.mxu3 %v1736_v54  ;;  %1907 = vmatpush.msrb.mxu2 %v1670_v5 }
 0x5e8   : > { %4679 = vmatmul.msk.f32.gmra.mxu3 %vm752_vm2, %v5563_v14 }
 0x5e9   : > { %2034 = vmatpush.msra.mxu3 %v1720_v13 }
 0x5eb   : > { %2035 = vmatpush.msra.mxu3 %v1704_v59  ;;  %v1865_v59 = vld [vmem:[#allocation2 + $0x718] sm:$0xff] }
 0x5ec   : > { %4639 = vmatmul.msk.f32.gmra.mxu0 %vm752_vm2, %v1048_v12  ;;  %4670 = vmatmul.msk.f32.gmra.mxu2 %vm752_vm2, %v5610_v48  ;;  %v1654_v12 = vld [vmem:[#allocation2 + $0x80] sm:$0xff] }
 0x5ed   : > { %2036 = vmatpush.msra.mxu3 %v1688_v1  ;;  %1908 = vmatpush.msrb.mxu2 %v1654_v12  ;;  %v1111_v1 = vpop.permute.xlu2 %1110 }
 0x5ef   : > { %2037 = vmatpush.msra.mxu3 %v1672_v19  ;;  %1909 = vmatpush.msrb.mxu2 %v1638_v23  ;;  %v1833_v19 = vld [vmem:[#allocation2 + $0x618] sm:$0xff]  ;;  %v1884_v23 = vld [vmem:[#allocation2 + $0x7b0] sm:$0xff] }
 0x5f0   : > { %4680 = vmatmul.msk.f32.gmra.mxu3 %vm752_vm2, %v5580_v21 }
 0x5f1   : > { %2038 = vmatpush.msra.mxu3 %v1656_v22  ;;  %v1883_v22 = vld [vmem:[#allocation2 + $0x7a8] sm:$0xff] }
 0x5f3   : > { %2039 = vmatpush.msra.mxu3 %v1640_v25  ;;  %v1866_v25 = vld [vmem:[#allocation2 + $0x720] sm:$0xff] }
 0x5f4   : > { %4640 = vmatmul.msk.f32.gmra.mxu0 %vm752_vm2, %v1049_v15  ;;  %4671 = vmatmul.msk.f32.gmra.mxu2 %vm752_vm2, %v5628_v60  ;;  %v1655_v15 = vld [vmem:[#allocation2 + $0x88] sm:$0xff] }
 0x5f5   : > { %1973 = vmatpush.msra.mxu0 %v1655_v15  ;;  %2284 = vmatpush.msrb.mxu3 %v1884_v23  ;;  %v1769_v23 = vld [vmem:[#allocation2 + $0x418] sm:$0xff] }
 0x5f7   : > { %1974 = vmatpush.msra.mxu0 %v1639_v24  ;;  %v1801_v24 = vld [vmem:[#allocation2 + $0x518] sm:$0xff] }
 0x5f8   : > { %4681 = vmatmul.msk.f32.gmra.mxu3 %vm752_vm2, %v5597_v34 }
 0x5f9   : > { %2219 = vmatpush.msrb.mxu0 %v1883_v22  ;;  %v1755_v22 = vld [vmem:[#allocation2 + $0x3a8] sm:$0xff] }
 0x5fc   : > { %4641 = vmatmul.msk.f32.gmra.mxu0 %vm752_vm2, %v1050_v18 }
 0x600   : > { %4682 = vmatmul.msk.f32.gmra.mxu3 %vm752_vm2, %v5616_v49 }
 0x604   : > { %4642 = vmatmul.msk.f32.gmra.mxu0 %vm752_vm2, %v1051_v44 }
 0x608   : > { %4683 = vmatmul.msk.f32.gmra.mxu3 %vm752_vm2, %v5634_v62 }
 0x60c   : > { %4643 = vmatmul.msk.f32.gmra.mxu0 %vm752_vm2, %v1052_v56  ;;  %v1106_v56 = vpop.permute.xlu1 %1105 }
 0x614   : > { %4644 = vmatmul.msk.f32.gmra.mxu0 %vm752_vm2, %v1053_v10 }
 0x631   : > { %v1218_v27 = vpop.f32.mrf.mxu0 }
 0x632   : > { %v5644_v17 = vadd.f32 %v1218_v27, %v1076_v26  ;;  %v1867_v26 = vld [vmem:[#allocation2 + $0x728] sm:$0xff]  ;;  %v1868_v27 = vld [vmem:[#allocation2 + $0x730] sm:$0xff] }
 0x633   : > { %v5658_v32 = vpop.f32.mrf.mxu3  ;;  %2220 = vmatpush.msrb.mxu0 %v1867_v26  ;;  %2285 = vmatpush.msrb.mxu3 %v1868_v27  ;;  %v1131_v26 = vpop.permute.xlu0 %1130 }
 0x634   : > { %1910 = vmatmul.f32.vlgmr.msrb.gmra.mxu2 %v5644_v17  ;;  %1975 = vmatmul.f32.vlgmr.msra.gmra.mxu0 %v5644_v17 }
 0x635   : > { %2040 = vmatmul.f32.vlgmr.msra.gmra.mxu3 %v5644_v17 }
 0x637   : > { %v5649_v28 = vpop.f32.mrf.mxu2 }
 0x639   : > { %v1221_v18 = vpop.f32.mrf.mxu0 }
 0x63a   : > { %v5651_v30 = vadd.f32 %v1221_v18, %v1081_v29  ;;  %v1850_v29 = vld [vmem:[#allocation2 + $0x6a0] sm:$0xff]  ;;  %v1851_v18 = vld [vmem:[#allocation2 + $0x6a8] sm:$0xff] }
 0x63b   : > { %v5669_v43 = vpop.f32.mrf.mxu3  ;;  %2221 = vmatpush.msrb.mxu0 %v1851_v18  ;;  %v1722_v18 = vld [vmem:[#allocation2 + $0x2a0] sm:$0xff] }
 0x63c   : > { %1913 = vmatmul.f32.gmra.mxu2 %v5651_v30  ;;  %1978 = vmatmul.f32.gmra.mxu0 %v5651_v30 }
 0x63d   : > { %2043 = vmatmul.f32.gmra.mxu3 %v5651_v30 }
 0x63f   : > { %v5656_v31 = vpop.f32.mrf.mxu2 }
 0x641   : > { %v1224_v37 = vpop.f32.mrf.mxu0 }
 0x642   : > { %v5660_v38 = vadd.f32 %v1224_v37, %v1086_v36  ;;  %v1121_v36 = vpop.permute.xlu1 %1120 }
 0x643   : > { %v5678_v35 = vpop.f32.mrf.mxu3 }
 0x644   : > { %1916 = vmatmul.f32.gmra.mxu2 %v5660_v38  ;;  %1981 = vmatmul.f32.gmra.mxu0 %v5660_v38 }
 0x645   : > { %2046 = vmatmul.f32.gmra.mxu3 %v5660_v38 }
 0x647   : > { %v5665_v39 = vpop.f32.mrf.mxu2 }
 0x649   : > { %v1227_v41 = vpop.f32.mrf.mxu0 }
 0x64a   : > { %v5667_v42 = vadd.f32 %v1227_v41, %v1091_v40  ;;  %v1834_v41 = vld [vmem:[#allocation2 + $0x620] sm:$0xff] }
 0x64b   : > { %v5686_v53 = vpop.f32.mrf.mxu3 }
 0x64c   : > { %1919 = vmatmul.f32.gmra.mxu2 %v5667_v42  ;;  %1984 = vmatmul.f32.gmra.mxu0 %v5667_v42 }
 0x64d   : > { %2049 = vmatmul.f32.gmra.mxu3 %v5667_v42 }
 0x64f   : > { %v1331_v44 = vpop.f32.mrf.mxu2 }
 0x651   : > { %v1230_v46 = vpop.f32.mrf.mxu0 }
 0x652   : > { %v5674_v47 = vadd.f32 %v1230_v46, %v1096_v45  ;;  %v1836_v45 = vld [vmem:[#allocation2 + $0x630] sm:$0xff] }
 0x653   : > { %v5695_v0 = vpop.f32.mrf.mxu3 }
 0x654   : > { %1922 = vmatmul.f32.gmra.mxu2 %v5674_v47  ;;  %1987 = vmatmul.f32.gmra.mxu0 %v5674_v47  ;;  %7661 = vst [vmem:[#allocation17_spill] sm:$0xff] %v5695_v0 }
 0x655   : > { %2052 = vmatmul.f32.gmra.mxu3 %v5674_v47 }
 0x657   : > { %v1334_v50 = vpop.f32.mrf.mxu2 }
 0x658   : > { %4801 = vtanh.f32 %v1334_v50  ;;  %v1818_v50 = vld [vmem:[#allocation2 + $0x5a0] sm:$0xff] }
 0x659   : > { %v1233_v51 = vpop.f32.mrf.mxu0  ;;  %4803 = vtanh.f32 %v1331_v44  ;;  %v1835_v44 = vld [vmem:[#allocation2 + $0x628] sm:$0xff] }
 0x65a   : > { %v5681_v52 = vadd.f32 %v1233_v51, %v1101_v2  ;;  %v1819_v2 = vld [vmem:[#allocation2 + $0x5a8] sm:$0xff]  ;;  %v1820_v51 = vld [vmem:[#allocation2 + $0x5b0] sm:$0xff]  ;;  %2222 = vmatpush.msrb.mxu0 %v1835_v44 }
 0x65b   : > { %v5706_v15 = vpop.f32.mrf.mxu3  ;;  %v1707_v44 = vld [vmem:[#allocation2 + $0x228] sm:$0xff] }
 0x65c   : > { %1925 = vmatmul.f32.gmra.mxu2 %v5681_v52  ;;  %1990 = vmatmul.f32.gmra.mxu0 %v5681_v52  ;;  %7662 = vst [vmem:[#allocation18_spill] sm:$0xff] %v5706_v15  ;;  %v1855_v15 = vld [vmem:[#allocation2 + $0x6c8] sm:$0xff] }
 0x65d   : > { %2055 = vmatmul.f32.gmra.mxu3 %v5681_v52  ;;  %2223 = vmatpush.msrb.mxu0 %v1819_v2 }
 0x65e   : > { %v4802_v54 = vpop.eup %4801 }
 0x65f   : > { %1549 = vmatpush.msra.mxu1 %v4802_v54  ;;  %v4804_v55 = vpop.eup %4803  ;;  %v1785_v54 = vld [vmem:[#allocation2 + $0x498] sm:$0xff]  ;;  %v5738_v2 = vpop.f32.mrf.mxu2 }
 0x661   : > { %v1236_v13 = vpop.f32.mrf.mxu0  ;;  %1550 = vmatpush.msra.mxu1 %v4804_v55  ;;  %v1803_v55 = vld [vmem:[#allocation2 + $0x528] sm:$0xff] }
 0x662   : > { %v5688_v57 = vadd.f32 %v1236_v13, %v1106_v56  ;;  %4684 = vmatmul.msk.f32.vlgmr.msra.gmra.mxu1 %vm752_vm2, %v5575_v20  ;;  %v1817_v20 = vld [vmem:[#allocation2 + $0x598] sm:$0xff]  ;;  %v1804_v56 = vld [vmem:[#allocation2 + $0x530] sm:$0xff]  ;;  %v1786_v13 = vld [vmem:[#allocation2 + $0x4a0] sm:$0xff]  ;;  %2224 = vmatpush.msrb.mxu0 %v1803_v55  ;;  %v1136_v55 = vpop.permute.xlu1 %1135 }
 0x663   : > { %2089 = vmatpush.msrb.mxu1 %v1881_v58  ;;  %v5719_v46 = vpop.f32.mrf.mxu3  ;;  %v1126_v58 = vpop.permute.xlu2 %1125 }
 0x664   : > { %1928 = vmatmul.f32.gmra.mxu2 %v5688_v57  ;;  %1993 = vmatmul.f32.gmra.mxu0 %v5688_v57  ;;  %7663 = vst [vmem:[#allocation19_spill] sm:$0xff] %v5719_v46 }
 0x665   : > { %2058 = vmatmul.f32.gmra.mxu3 %v5688_v57  ;;  %2090 = vmatpush.msrb.mxu1 %v1865_v59 }
 0x667   : > { %2091 = vmatpush.msrb.mxu1 %v1849_v61 }
 0x669   : > { %v1239_v3 = vpop.f32.mrf.mxu0  ;;  %2092 = vmatpush.msrb.mxu1 %v1833_v19  ;;  %v1770_v19 = vld [vmem:[#allocation2 + $0x420] sm:$0xff] }
 0x66a   : > { %v5697_v5 = vadd.f32 %v1239_v3, %v1111_v1  ;;  %4685 = vmatmul.msk.f32.gmra.mxu1 %vm752_vm2, %v5592_v33  ;;  %v1882_v33 = vld [vmem:[#allocation2 + $0x7a0] sm:$0xff]  ;;  %v1787_v1 = vld [vmem:[#allocation2 + $0x4a8] sm:$0xff]  ;;  %v1788_v3 = vld [vmem:[#allocation2 + $0x4b0] sm:$0xff] }
 0x66b   : > { %2093 = vmatpush.msrb.mxu1 %v1817_v20  ;;  %2154 = vmatpush.msra.mxu2 %v1882_v33  ;;  %v1771_v20 = vld [vmem:[#allocation2 + $0x428] sm:$0xff]  ;;  %v5729_v33 = vpop.f32.mrf.mxu3 }
 0x66c   : > { %1931 = vmatmul.f32.gmra.mxu2 %v5697_v5  ;;  %1996 = vmatmul.f32.gmra.mxu0 %v5697_v5  ;;  %7664 = vst [vmem:[#allocation20_spill] sm:$0xff] %v5729_v33 }
 0x66d   : > { %2061 = vmatmul.f32.gmra.mxu3 %v5697_v5  ;;  %2094 = vmatpush.msrb.mxu1 %v1801_v24  ;;  %v1738_v24 = vld [vmem:[#allocation2 + $0x320] sm:$0xff] }
 0x66e   : > { %2155 = vmatpush.msra.mxu2 %v1866_v25  ;;  %2225 = vmatpush.msrb.mxu0 %v1787_v1  ;;  %v1739_v25 = vld [vmem:[#allocation2 + $0x328] sm:$0xff]  ;;  %v1658_v1 = vld [vmem:[#allocation2 + $0xa0] sm:$0xff] }
 0x66f   : > { %2095 = vmatpush.msrb.mxu1 %v1785_v54 }
 0x670   : > { %2156 = vmatpush.msra.mxu2 %v1850_v29  ;;  %2226 = vmatpush.msrb.mxu0 %v1771_v20  ;;  %v1642_v20 = vld [vmem:[#allocation2 + $0x20] sm:$0xff] }
 0x671   : > { %v1242_v10 = vpop.f32.mrf.mxu0  ;;  %2096 = vmatpush.msrb.mxu1 %v1769_v23  ;;  %v5749_v23 = vpop.f32.mrf.mxu2 }
 0x672   : > { %v5704_v12 = vadd.f32 %v1242_v10, %v1116_v8  ;;  %4686 = vmatmul.msk.f32.gmra.mxu1 %vm752_vm2, %v5610_v48  ;;  %v1852_v48 = vld [vmem:[#allocation2 + $0x6b0] sm:$0xff]  ;;  %2157 = vmatpush.msra.mxu2 %v1834_v41  ;;  %v1754_v10 = vld [vmem:[#allocation2 + $0x3a0] sm:$0xff] }
 0x673   : > { %2286 = vmatpush.msrb.mxu3 %v1852_v48  ;;  %v1772_v8 = vld [vmem:[#allocation2 + $0x430] sm:$0xff]  ;;  %2227 = vmatpush.msrb.mxu0 %v1755_v22  ;;  %v5740_v54 = vpop.f32.mrf.mxu3 }
 0x674   : > { %1934 = vmatmul.f32.gmra.mxu2 %v5704_v12  ;;  %1999 = vmatmul.f32.gmra.mxu0 %v5704_v12  ;;  %v1740_v48 = vld [vmem:[#allocation2 + $0x330] sm:$0xff]  ;;  %7665 = vst [vmem:[#allocation21_spill] sm:$0xff] %v5740_v54 }
 0x675   : > { %2064 = vmatmul.f32.gmra.mxu3 %v5704_v12  ;;  %2158 = vmatpush.msra.mxu2 %v1818_v50  ;;  %v1724_v41 = vld [vmem:[#allocation2 + $0x2b0] sm:$0xff]  ;;  %v1753_v50 = vld [vmem:[#allocation2 + $0x398] sm:$0xff] }
 0x676   : > { %2287 = vmatpush.msrb.mxu3 %v1836_v45  ;;  %2228 = vmatpush.msrb.mxu0 %v1739_v25  ;;  %v1690_v45 = vld [vmem:[#allocation2 + $0x1a0] sm:$0xff]  ;;  %v1660_v22 = vld [vmem:[#allocation2 + $0xb0] sm:$0xff] }
 0x677   : > { %2097 = vmatpush.msrb.mxu1 %v1753_v50  ;;  %v1644_v25 = vld [vmem:[#allocation2 + $0x30] sm:$0xff] }
 0x678   : > { %2288 = vmatpush.msrb.mxu3 %v1820_v51  ;;  %v1691_v51 = vld [vmem:[#allocation2 + $0x1a8] sm:$0xff]  ;;  %v1872_v54 = vld [vmem:[#allocation2 + $0x750] sm:$0xff] }
 0x679   : > { %v1245_v37 = vpop.f32.mrf.mxu0 }
 0x67a   : > { %v5713_v40 = vadd.f32 %v1245_v37, %v1121_v36  ;;  %4687 = vmatmul.msk.f32.gmra.mxu1 %vm752_vm2, %v5628_v60  ;;  %v1802_v60 = vld [vmem:[#allocation2 + $0x520] sm:$0xff]  ;;  %2289 = vmatpush.msrb.mxu3 %v1804_v56  ;;  %v1723_v36 = vld [vmem:[#allocation2 + $0x2a8] sm:$0xff] }
 0x67b   : > { %2159 = vmatpush.msra.mxu2 %v1802_v60  ;;  %v1706_v37 = vld [vmem:[#allocation2 + $0x220] sm:$0xff]  ;;  %2229 = vmatpush.msrb.mxu0 %v1723_v36  ;;  %v1705_v36 = vld [vmem:[#allocation2 + $0x218] sm:$0xff] }
 0x67c   : > { %1937 = vmatmul.f32.gmra.mxu2 %v5713_v40  ;;  %2002 = vmatmul.f32.gmra.mxu0 %v5713_v40  ;;  %v1674_v60 = vld [vmem:[#allocation2 + $0x120] sm:$0xff] }
 0x67d   : > { %2067 = vmatmul.f32.gmra.mxu3 %v5713_v40  ;;  %2160 = vmatpush.msra.mxu2 %v1786_v13 }
 0x67e   : > { %2290 = vmatpush.msrb.mxu3 %v1788_v3  ;;  %2230 = vmatpush.msrb.mxu0 %v1707_v44  ;;  %v1659_v3 = vld [vmem:[#allocation2 + $0xa8] sm:$0xff] }
 0x67f   : > { %2161 = vmatpush.msra.mxu2 %v1770_v19  ;;  %v1676_v19 = vld [vmem:[#allocation2 + $0x130] sm:$0xff] }
 0x680   : > { %2291 = vmatpush.msrb.mxu3 %v1772_v8  ;;  %2231 = vmatpush.msrb.mxu0 %v1691_v51  ;;  %v1643_v8 = vld [vmem:[#allocation2 + $0x28] sm:$0xff] }
 0x681   : > { %v1248_v59 = vpop.f32.mrf.mxu0  ;;  %2162 = vmatpush.msra.mxu2 %v1754_v10  ;;  %v1141_v10 = vpop.permute.xlu2 %1140 }
 0x682   : > { %v5722_v61 = vadd.f32 %v1248_v59, %v1126_v58  ;;  %4688 = vmatmul.msk.f32.gmra.mxu1 %vm752_vm2, %v5448_v16  ;;  %v1756_v16 = vld [vmem:[#allocation2 + $0x3b0] sm:$0xff]  ;;  %v1675_v58 = vld [vmem:[#allocation2 + $0x128] sm:$0xff] }
 0x683   : > { %2292 = vmatpush.msrb.mxu3 %v1756_v16  ;;  %2163 = vmatpush.msra.mxu2 %v1738_v24  ;;  %v1692_v59 = vld [vmem:[#allocation2 + $0x1b0] sm:$0xff]  ;;  %v5752_v16 = vadd.f32 %v5649_v28, %v1141_v10  ;;  %v5754_v24 = vpop.f32.mrf.mxu3 }
 0x684   : > { %1940 = vmatmul.f32.gmra.mxu2 %v5722_v61  ;;  %2005 = vmatmul.f32.gmra.mxu0 %v5722_v61  ;;  %7666 = vst [vmem:[#allocation22_spill] sm:$0xff] %v5754_v24  ;;  %v1871_v24 = vld [vmem:[#allocation2 + $0x748] sm:$0xff] }
 0x685   : > { %2070 = vmatmul.f32.gmra.mxu3 %v5722_v61  ;;  %2164 = vmatpush.msra.mxu2 %v1722_v18  ;;  %v5766_v18 = vpop.f32.mrf.mxu2 }
 0x686   : > { %2293 = vmatpush.msrb.mxu3 %v1740_v48  ;;  %2232 = vmatpush.msrb.mxu0 %v1675_v58  ;;  %v1151_v48 = vpop.permute.xlu1 %1150 }
 0x687   : > { %2165 = vmatpush.msra.mxu2 %v1706_v37  ;;  %v5774_v37 = vadd.f32 %v5665_v39, %v1151_v48  ;;  %v1837_v48 = vld [vmem:[#allocation2 + $0x638] sm:$0xff] }
 0x688   : > { %2294 = vmatpush.msrb.mxu3 %v1724_v41  ;;  %2233 = vmatpush.msrb.mxu0 %v1659_v3  ;;  %v1689_v41 = vld [vmem:[#allocation2 + $0x198] sm:$0xff] }
 0x689   : > { %v1251_v27 = vpop.f32.mrf.mxu0  ;;  %2166 = vmatpush.msra.mxu2 %v1690_v45  ;;  %v1673_v45 = vld [vmem:[#allocation2 + $0x118] sm:$0xff] }
 0x68a   : > { %v5731_v29 = vadd.f32 %v1251_v27, %v1131_v26  ;;  %4689 = vmatmul.msk.f32.gmra.mxu1 %vm752_vm2, %v5476_v63  ;;  %v1708_v63 = vld [vmem:[#allocation2 + $0x230] sm:$0xff]  ;;  %2234 = vmatpush.msrb.mxu0 %v1643_v8  ;;  %v1146_v26 = vpop.permute.xlu0 %1145  ;;  %v1721_v27 = vld [vmem:[#allocation2 + $0x298] sm:$0xff] }
 0x68b   : > { %2295 = vmatpush.msrb.mxu3 %v1708_v63  ;;  %2167 = vmatpush.msra.mxu2 %v1674_v60  ;;  %v5762_v28 = vadd.f32 %v5656_v31, %v1146_v26  ;;  %v1657_v63 = vld [vmem:[#allocation2 + $0x98] sm:$0xff] }
 0x68c   : > { %1943 = vmatmul.f32.gmra.mxu2 %v5731_v29  ;;  %2008 = vmatmul.f32.gmra.mxu0 %v5731_v29 }
 0x68d   : > { %2073 = vmatmul.f32.gmra.mxu3 %v5731_v29  ;;  %2168 = vmatpush.msra.mxu2 %v1658_v1  ;;  %v1885_v1 = vld [vmem:[#allocation2 + $0x7b8] sm:$0xff] }
 0x68e   : > { %2296 = vmatpush.msrb.mxu3 %v1692_v59 }
 0x68f   : > { %2169 = vmatpush.msra.mxu2 %v1642_v20  ;;  %v1869_v20 = vld [vmem:[#allocation2 + $0x738] sm:$0xff] }
 0x690   : > { %2297 = vmatpush.msrb.mxu3 %v1676_v19 }
 0x691   : > { %v1254_v56 = vpop.f32.mrf.mxu0 }
 0x692   : > { %v5742_v13 = vadd.f32 %v1254_v56, %v1136_v55  ;;  %4690 = vmatmul.msk.f32.gmra.mxu1 %vm752_vm2, %v5496_v4  ;;  %v1737_v4 = vld [vmem:[#allocation2 + $0x318] sm:$0xff]  ;;  %2298 = vmatpush.msrb.mxu3 %v1660_v22 }
 0x693   : > { %2098 = vmatpush.msrb.mxu1 %v1737_v4  ;;  %v1641_v55 = vld [vmem:[#allocation2 + $0x18] sm:$0xff] }
 0x694   : > { %1946 = vmatmul.f32.gmra.mxu2 %v5742_v13  ;;  %2011 = vmatmul.f32.gmra.mxu0 %v5742_v13  ;;  %v1853_v4 = vld [vmem:[#allocation2 + $0x6b8] sm:$0xff] }
 0x695   : > { %2076 = vmatmul.f32.gmra.mxu3 %v5742_v13  ;;  %2099 = vmatpush.msrb.mxu1 %v1721_v27 }
 0x696   : > { %2299 = vmatpush.msrb.mxu3 %v1644_v25 }
 0x697   : > { %2100 = vmatpush.msrb.mxu1 %v1705_v36 }
 0x699   : > { %2101 = vmatpush.msrb.mxu1 %v1689_v41 }
 0x69a   : > { %4691 = vmatmul.msk.f32.gmra.mxu1 %vm752_vm2, %v5511_v6  ;;  %v5770_v6 = vpop.f32.mrf.mxu3 }
 0x69b   : > { %7667 = vst [vmem:[#allocation23_spill] sm:$0xff] %v5770_v6  ;;  %2102 = vmatpush.msrb.mxu1 %v1673_v45  ;;  %v1870_v6 = vld [vmem:[#allocation2 + $0x740] sm:$0xff] }
 0x69c   : > { %1949 = vmatmul.f32.gmra.mxu2 %v5752_v16  ;;  %2014 = vmatmul.f32.gmra.mxu0 %v5752_v16 }
 0x69d   : > { %2079 = vmatmul.f32.gmra.mxu3 %v5752_v16  ;;  %2103 = vmatpush.msrb.mxu1 %v1657_v63 }
 0x69f   : > { %2104 = vmatpush.msrb.mxu1 %v1641_v55  ;;  %v1821_v55 = vld [vmem:[#allocation2 + $0x5b8] sm:$0xff] }
 0x6a1   : > { %2349 = vmatpush.msra.mxu1 %v1885_v1 }
 0x6a2   : > { %4692 = vmatmul.msk.f32.gmra.mxu1 %vm752_vm2, %v5525_v7  ;;  %v5781_v7 = vpop.f32.mrf.mxu2  ;;  %v5783_v31 = vpop.f32.mrf.mxu3 }
 0x6a3   : > { %7668 = vst [vmem:[#allocation24_spill] sm:$0xff] %v5783_v31  ;;  %2350 = vmatpush.msra.mxu1 %v1869_v20  ;;  %v1886_v20 = vld [vmem:[#allocation2 + $0x7c0] sm:$0xff] }
 0x6a4   : > { %1952 = vmatmul.f32.gmra.mxu2 %v5762_v28  ;;  %2017 = vmatmul.f32.gmra.mxu0 %v5762_v28 }
 0x6a5   : > { %2082 = vmatmul.f32.gmra.mxu3 %v5762_v28  ;;  %2351 = vmatpush.msra.mxu1 %v1853_v4  ;;  %v1887_v4 = vld [vmem:[#allocation2 + $0x7c8] sm:$0xff] }
 0x6a6   : > { %2414 = vmatpush.msrb.mxu2 %v1886_v20  ;;  %2479 = vmatpush.msra.mxu0 %v1887_v4  ;;  %v1805_v20 = vld [vmem:[#allocation2 + $0x538] sm:$0xff]  ;;  %v1838_v4 = vld [vmem:[#allocation2 + $0x640] sm:$0xff] }
 0x6a7   : > { %2352 = vmatpush.msra.mxu1 %v1837_v48  ;;  %v1888_v48 = vld [vmem:[#allocation2 + $0x7d0] sm:$0xff] }
 0x6a8   : > { %2544 = vmatpush.msra.mxu3 %v1888_v48  ;;  %2415 = vmatpush.msrb.mxu2 %v1870_v6  ;;  %v1839_v48 = vld [vmem:[#allocation2 + $0x648] sm:$0xff]  ;;  %v1840_v6 = vld [vmem:[#allocation2 + $0x650] sm:$0xff] }
 0x6a9   : > { %2353 = vmatpush.msra.mxu1 %v1821_v55  ;;  %2480 = vmatpush.msra.mxu0 %v1871_v24  ;;  %v1823_v24 = vld [vmem:[#allocation2 + $0x5c8] sm:$0xff] }
 0x6aa   : > { %4693 = vmatmul.msk.f32.gmra.mxu1 %vm752_vm2, %v5539_v9  ;;  %2545 = vmatpush.msra.mxu3 %v1872_v54  ;;  %v1822_v54 = vld [vmem:[#allocation2 + $0x5c0] sm:$0xff] }
 0x6ab   : > { %2481 = vmatpush.msra.mxu0 %v1855_v15  ;;  %2354 = vmatpush.msra.mxu1 %v1805_v20  ;;  %v1789_v20 = vld [vmem:[#allocation2 + $0x4b8] sm:$0xff] }
 0x6ac   : > { %1955 = vmatmul.f32.gmra.mxu2 %v5774_v37  ;;  %2020 = vmatmul.f32.gmra.mxu0 %v5774_v37 }
 0x6ad   : > { %2085 = vmatmul.f32.gmra.mxu3 %v5774_v37  ;;  %2482 = vmatpush.msra.mxu0 %v1839_v48  ;;  %v1791_v48 = vld [vmem:[#allocation2 + $0x4c8] sm:$0xff] }
 0x6ae   : > { %2355 = vmatpush.msra.mxu1 %v1789_v20  ;;  %v1773_v20 = vld [vmem:[#allocation2 + $0x438] sm:$0xff] }
 0x6af   : > { %2483 = vmatpush.msra.mxu0 %v1823_v24  ;;  %v1775_v24 = vld [vmem:[#allocation2 + $0x448] sm:$0xff] }
 0x6b0   : > { %2356 = vmatpush.msra.mxu1 %v1773_v20  ;;  %v1694_v20 = vld [vmem:[#allocation2 + $0x1c0] sm:$0xff] }
 0x6b1   : > { %v5785_v44 = vpop.f32.mrf.mxu0 }
 0x6b2   : > { %4694 = vmatmul.msk.f32.gmra.mxu1 %vm752_vm2, %v5551_v11 }
 0x6b4   : > { %2170 = vmatmul.f32.vlgmr.msra.gmra.mxu2 %v5644_v17  ;;  %2235 = vmatmul.f32.vlgmr.msrb.gmra.mxu0 %v5644_v17 }
 0x6b5   : > { %2300 = vmatmul.f32.vlgmr.msrb.gmra.mxu3 %v5644_v17 }
 0x6b7   : > { %v5792_v9 = vpop.f32.mrf.mxu2 }
 0x6b8   : > { %v5794_v39 = vpop.f32.mrf.mxu3 }
 0x6b9   : > { %v5796_v50 = vpop.f32.mrf.mxu0 }
 0x6ba   : > { %4695 = vmatmul.msk.f32.gmra.mxu1 %vm752_vm2, %v5563_v14 }
 0x6bc   : > { %2173 = vmatmul.f32.gmra.mxu2 %v5651_v30  ;;  %2238 = vmatmul.f32.gmra.mxu0 %v5651_v30 }
 0x6bd   : > { %2303 = vmatmul.f32.gmra.mxu3 %v5651_v30 }
 0x6bf   : > { %v5803_v11 = vpop.f32.mrf.mxu2 }
 0x6c0   : > { %v5805_v51 = vpop.f32.mrf.mxu3 }
 0x6c1   : > { %v5807_v60 = vpop.f32.mrf.mxu0 }
 0x6c2   : > { %4696 = vmatmul.msk.f32.gmra.mxu1 %vm752_vm2, %v5580_v21 }
 0x6c4   : > { %2176 = vmatmul.f32.gmra.mxu2 %v5660_v38  ;;  %2241 = vmatmul.f32.gmra.mxu0 %v5660_v38 }
 0x6c5   : > { %2306 = vmatmul.f32.gmra.mxu3 %v5660_v38 }
 0x6c7   : > { %v5814_v14 = vpop.f32.mrf.mxu2 }
 0x6c8   : > { %v5816_v56 = vpop.f32.mrf.mxu3 }
 0x6c9   : > { %v5818_v58 = vpop.f32.mrf.mxu0 }
 0x6ca   : > { %4697 = vmatmul.msk.f32.gmra.mxu1 %vm752_vm2, %v5597_v34 }
 0x6cc   : > { %2179 = vmatmul.f32.gmra.mxu2 %v5667_v42  ;;  %2244 = vmatmul.f32.gmra.mxu0 %v5667_v42 }
 0x6cd   : > { %2309 = vmatmul.f32.gmra.mxu3 %v5667_v42 }
 0x6cf   : > { %v5825_v21 = vpop.f32.mrf.mxu2 }
 0x6d0   : > { %v5827_v59 = vpop.f32.mrf.mxu3 }
 0x6d1   : > { %v5829_v3 = vpop.f32.mrf.mxu0 }
 0x6d2   : > { %4698 = vmatmul.msk.f32.gmra.mxu1 %vm752_vm2, %v5616_v49 }
 0x6d4   : > { %2182 = vmatmul.f32.gmra.mxu2 %v5674_v47  ;;  %2247 = vmatmul.f32.gmra.mxu0 %v5674_v47 }
 0x6d5   : > { %2312 = vmatmul.f32.gmra.mxu3 %v5674_v47 }
 0x6d7   : > { %v5836_v34 = vpop.f32.mrf.mxu2 }
 0x6d8   : > { %v5838_v19 = vpop.f32.mrf.mxu3 }
 0x6d9   : > { %v5840_v8 = vpop.f32.mrf.mxu0 }
 0x6da   : > { %4699 = vmatmul.msk.f32.gmra.mxu1 %vm752_vm2, %v5634_v62 }
 0x6dc   : > { %2185 = vmatmul.f32.gmra.mxu2 %v5681_v52  ;;  %2250 = vmatmul.f32.gmra.mxu0 %v5681_v52 }
 0x6dd   : > { %2315 = vmatmul.f32.gmra.mxu3 %v5681_v52 }
 0x6df   : > { %v5847_v49 = vpop.f32.mrf.mxu2  ;;  %v5849_v10 = vpop.f32.mrf.mxu1 }
 0x6e0   : > { %v5851_v22 = vpop.f32.mrf.mxu3 }
 0x6e1   : > { %v5853_v25 = vpop.f32.mrf.mxu0 }
 0x6e2   : > { %7669 = vst [vmem:[#allocation25_spill] sm:$0xff] %v5853_v25  ;;  %2105 = vmatmul.f32.vlgmr.msrb.gmra.mxu1 %v5644_v17  ;;  %v1646_v25 = vld [vmem:[#allocation2 + $0x40] sm:$0xff] }
 0x6e4   : > { %2188 = vmatmul.f32.gmra.mxu2 %v5688_v57  ;;  %2253 = vmatmul.f32.gmra.mxu0 %v5688_v57 }
 0x6e5   : > { %2318 = vmatmul.f32.gmra.mxu3 %v5688_v57 }
 0x6e7   : > { %v5859_v62 = vpop.f32.mrf.mxu2  ;;  %v5861_v26 = vpop.f32.mrf.mxu1 }
 0x6e8   : > { %7670 = vst [vmem:[#allocation26_spill] sm:$0xff] %v5859_v62  ;;  %v5863_v27 = vpop.f32.mrf.mxu3 }
 0x6e9   : > { %7671 = vst [vmem:[#allocation27_spill] sm:$0xff] %v5863_v27  ;;  %v5865_v36 = vpop.f32.mrf.mxu0 }
 0x6ea   : > { %7672 = vst [vmem:[#allocation28_spill] sm:$0xff] %v5865_v36  ;;  %2108 = vmatmul.f32.gmra.mxu1 %v5651_v30  ;;  %v1808_v36 = vld [vmem:[#allocation2 + $0x550] sm:$0xff] }
 0x6ec   : > { %2191 = vmatmul.f32.gmra.mxu2 %v5697_v5  ;;  %2256 = vmatmul.f32.gmra.mxu0 %v5697_v5 }
 0x6ed   : > { %2321 = vmatmul.f32.gmra.mxu3 %v5697_v5 }
 0x6ef   : > { %v5871_v41 = vpop.f32.mrf.mxu2  ;;  %v5873_v45 = vpop.f32.mrf.mxu1 }
 0x6f0   : > { %7673 = vst [vmem:[#allocation29_spill] sm:$0xff] %v5871_v41  ;;  %v5875_v63 = vpop.f32.mrf.mxu3 }
 0x6f1   : > { %7674 = vst [vmem:[#allocation30_spill] sm:$0xff] %v5875_v63  ;;  %v5877_v1 = vpop.f32.mrf.mxu0  ;;  %v1856_v63 = vld [vmem:[#allocation2 + $0x6d0] sm:$0xff] }
 0x6f2   : > { %7675 = vst [vmem:[#allocation31_spill] sm:$0xff] %v5877_v1  ;;  %2111 = vmatmul.f32.gmra.mxu1 %v5660_v38  ;;  %v1854_v1 = vld [vmem:[#allocation2 + $0x6c0] sm:$0xff]  ;;  %2546 = vmatpush.msra.mxu3 %v1856_v63  ;;  %v1807_v63 = vld [vmem:[#allocation2 + $0x548] sm:$0xff] }
 0x6f3   : > { %2416 = vmatpush.msrb.mxu2 %v1854_v1  ;;  %v1824_v1 = vld [vmem:[#allocation2 + $0x5d0] sm:$0xff]  ;;  %2484 = vmatpush.msra.mxu0 %v1807_v63  ;;  %v1758_v63 = vld [vmem:[#allocation2 + $0x3c0] sm:$0xff] }
 0x6f4   : > { %2194 = vmatmul.f32.gmra.mxu2 %v5704_v12  ;;  %2259 = vmatmul.f32.gmra.mxu0 %v5704_v12 }
 0x6f5   : > { %2324 = vmatmul.f32.gmra.mxu3 %v5704_v12  ;;  %2417 = vmatpush.msrb.mxu2 %v1838_v4  ;;  %v1790_v4 = vld [vmem:[#allocation2 + $0x4c0] sm:$0xff] }
 0x6f6   : > { %2547 = vmatpush.msra.mxu3 %v1840_v6  ;;  %v1792_v6 = vld [vmem:[#allocation2 + $0x4d0] sm:$0xff]  ;;  %2485 = vmatpush.msra.mxu0 %v1791_v48  ;;  %v1743_v48 = vld [vmem:[#allocation2 + $0x348] sm:$0xff] }
 0x6f7   : > { %v5883_v31 = vpop.f32.mrf.mxu2  ;;  %v5885_v55 = vpop.f32.mrf.mxu1  ;;  %2418 = vmatpush.msrb.mxu2 %v1822_v54  ;;  %v1774_v54 = vld [vmem:[#allocation2 + $0x440] sm:$0xff] }
 0x6f8   : > { %7676 = vst [vmem:[#allocation32_spill] sm:$0xff] %v5883_v31  ;;  %v5887_v33 = vpop.f32.mrf.mxu3  ;;  %2548 = vmatpush.msra.mxu3 %v1824_v1  ;;  %2486 = vmatpush.msra.mxu0 %v1775_v24  ;;  %v1727_v24 = vld [vmem:[#allocation2 + $0x2c8] sm:$0xff] }
 0x6f9   : > { %7677 = vst [vmem:[#allocation33_spill] sm:$0xff] %v5887_v33  ;;  %v5889_v46 = vpop.f32.mrf.mxu0 }
 0x6fa   : > { %7678 = vst [vmem:[#allocation34_spill] sm:$0xff] %v5889_v46  ;;  %2114 = vmatmul.f32.gmra.mxu1 %v5667_v42  ;;  %v1806_v46 = vld [vmem:[#allocation2 + $0x540] sm:$0xff]  ;;  %2549 = vmatpush.msra.mxu3 %v1808_v36  ;;  %v1759_v36 = vld [vmem:[#allocation2 + $0x3c8] sm:$0xff] }
 0x6fb   : > { %2419 = vmatpush.msrb.mxu2 %v1806_v46  ;;  %v1776_v46 = vld [vmem:[#allocation2 + $0x450] sm:$0xff]  ;;  %2487 = vmatpush.msra.mxu0 %v1759_v36  ;;  %v1711_v36 = vld [vmem:[#allocation2 + $0x248] sm:$0xff] }
 0x6fc   : > { %2197 = vmatmul.f32.gmra.mxu2 %v5713_v40  ;;  %2262 = vmatmul.f32.gmra.mxu0 %v5713_v40 }
 0x6fd   : > { %2327 = vmatmul.f32.gmra.mxu3 %v5713_v40  ;;  %2420 = vmatpush.msrb.mxu2 %v1790_v4  ;;  %v1742_v4 = vld [vmem:[#allocation2 + $0x340] sm:$0xff] }
 0x6fe   : > { %2550 = vmatpush.msra.mxu3 %v1792_v6  ;;  %v1744_v6 = vld [vmem:[#allocation2 + $0x350] sm:$0xff]  ;;  %2488 = vmatpush.msra.mxu0 %v1743_v48 }
 0x6ff   : > { %v5895_v15 = vpop.f32.mrf.mxu2  ;;  %v5897_v33 = vpop.f32.mrf.mxu1  ;;  %2421 = vmatpush.msrb.mxu2 %v1774_v54  ;;  %v1726_v54 = vld [vmem:[#allocation2 + $0x2c0] sm:$0xff]  ;;  %v1696_v48 = vld [vmem:[#allocation2 + $0x1d0] sm:$0xff] }
 0x700   : > { %7679 = vst [vmem:[#allocation35_spill] sm:$0xff] %v5895_v15  ;;  %v5899_v31 = vpop.f32.mrf.mxu3  ;;  %v1760_v15 = vld [vmem:[#allocation2 + $0x3d0] sm:$0xff]  ;;  %2551 = vmatpush.msra.mxu3 %v1776_v46  ;;  %2489 = vmatpush.msra.mxu0 %v1727_v24 }
 0x701   : > { %7680 = vst [vmem:[#allocation36_spill] sm:$0xff] %v5899_v31  ;;  %v5901_v41 = vpop.f32.mrf.mxu0  ;;  %2422 = vmatpush.msrb.mxu2 %v1758_v63  ;;  %v1728_v46 = vld [vmem:[#allocation2 + $0x2d0] sm:$0xff] }
 0x702   : > { %7681 = vst [vmem:[#allocation37_spill] sm:$0xff] %v5901_v41  ;;  %2117 = vmatmul.f32.gmra.mxu1 %v5674_v47  ;;  %2552 = vmatpush.msra.mxu3 %v1760_v15  ;;  %v1710_v15 = vld [vmem:[#allocation2 + $0x240] sm:$0xff]  ;;  %v1680_v24 = vld [vmem:[#allocation2 + $0x150] sm:$0xff] }
 0x703   : > { %2423 = vmatpush.msrb.mxu2 %v1742_v4  ;;  %2490 = vmatpush.msra.mxu0 %v1711_v36  ;;  %v1695_v4 = vld [vmem:[#allocation2 + $0x1c8] sm:$0xff]  ;;  %v1664_v36 = vld [vmem:[#allocation2 + $0xd0] sm:$0xff] }
 0x704   : > { %2200 = vmatmul.f32.gmra.mxu2 %v5722_v61  ;;  %2265 = vmatmul.f32.gmra.mxu0 %v5722_v61 }
 0x705   : > { %2330 = vmatmul.f32.gmra.mxu3 %v5722_v61  ;;  %2424 = vmatpush.msrb.mxu2 %v1726_v54  ;;  %v1679_v54 = vld [vmem:[#allocation2 + $0x148] sm:$0xff] }
 0x706   : > { %2553 = vmatpush.msra.mxu3 %v1744_v6  ;;  %v1757_v6 = vld [vmem:[#allocation2 + $0x3b8] sm:$0xff]  ;;  %2491 = vmatpush.msra.mxu0 %v1695_v4  ;;  %v1648_v4 = vld [vmem:[#allocation2 + $0x50] sm:$0xff] }
 0x707   : > { %v5907_v1 = vpop.f32.mrf.mxu2  ;;  %v5909_v41 = vpop.f32.mrf.mxu1  ;;  %2425 = vmatpush.msrb.mxu2 %v1710_v15  ;;  %2357 = vmatpush.msra.mxu1 %v1757_v6 }
 0x708   : > { %7682 = vst [vmem:[#allocation38_spill] sm:$0xff] %v5907_v1  ;;  %v5911_v31 = vpop.f32.mrf.mxu3  ;;  %v1712_v1 = vld [vmem:[#allocation2 + $0x250] sm:$0xff]  ;;  %2554 = vmatpush.msra.mxu3 %v1728_v46  ;;  %v1662_v46 = vld [vmem:[#allocation2 + $0xc0] sm:$0xff]  ;;  %2492 = vmatpush.msra.mxu0 %v1679_v54 }
 0x709   : > { %7683 = vst [vmem:[#allocation39_spill] sm:$0xff] %v5911_v31  ;;  %v5913_v0 = vpop.f32.mrf.mxu0  ;;  %2426 = vmatpush.msrb.mxu2 %v1694_v20  ;;  %v1647_v20 = vld [vmem:[#allocation2 + $0x48] sm:$0xff] }
 0x70a   : > { %7684 = vst [vmem:[#allocation40_spill] sm:$0xff] %v5913_v0  ;;  %2120 = vmatmul.f32.gmra.mxu1 %v5681_v52  ;;  %2555 = vmatpush.msra.mxu3 %v1712_v1  ;;  %v1663_v1 = vld [vmem:[#allocation2 + $0xc8] sm:$0xff] }
 0x70b   : > { %2493 = vmatpush.msra.mxu0 %v1663_v1 }
 0x70c   : > { %2203 = vmatmul.f32.gmra.mxu2 %v5731_v29  ;;  %2268 = vmatmul.f32.gmra.mxu0 %v5731_v29 }
 0x70d   : > { %2333 = vmatmul.f32.gmra.mxu3 %v5731_v29  ;;  %2494 = vmatpush.msra.mxu0 %v1647_v20 }
 0x70e   : > { %2556 = vmatpush.msra.mxu3 %v1696_v48 }
 0x70f   : > { %v5919_v63 = vpop.f32.mrf.mxu2  ;;  %v5921_v0 = vpop.f32.mrf.mxu1 }
 0x710   : > { %7685 = vst [vmem:[#allocation41_spill] sm:$0xff] %v5919_v63  ;;  %v5923_v31 = vpop.f32.mrf.mxu3  ;;  %2557 = vmatpush.msra.mxu3 %v1680_v24 }
 0x711   : > { %7686 = vst [vmem:[#allocation42_spill] sm:$0xff] %v5923_v31  ;;  %v5925_v27 = vpop.f32.mrf.mxu0  ;;  %v1678_v31 = vld [vmem:[#allocation2 + $0x140] sm:$0xff] }
 0x712   : > { %7687 = vst [vmem:[#allocation43_spill] sm:$0xff] %v5925_v27  ;;  %2123 = vmatmul.f32.gmra.mxu1 %v5688_v57  ;;  %2427 = vmatpush.msrb.mxu2 %v1678_v31  ;;  %v1741_v31 = vld [vmem:[#allocation2 + $0x338] sm:$0xff] }
 0x713   : > { %2558 = vmatpush.msra.mxu3 %v1664_v36  ;;  %2358 = vmatpush.msra.mxu1 %v1741_v31 }
 0x714   : > { %2206 = vmatmul.f32.gmra.mxu2 %v5742_v13  ;;  %2271 = vmatmul.f32.gmra.mxu0 %v5742_v13 }
 0x715   : > { %2336 = vmatmul.f32.gmra.mxu3 %v5742_v13  ;;  %2428 = vmatpush.msrb.mxu2 %v1662_v46 }
 0x716   : > { %2559 = vmatpush.msra.mxu3 %v1648_v4  ;;  %v1709_v4 = vld [vmem:[#allocation2 + $0x238] sm:$0xff] }
 0x717   : > { %v5931_v15 = vpop.f32.mrf.mxu2  ;;  %v5933_v27 = vpop.f32.mrf.mxu1  ;;  %2429 = vmatpush.msrb.mxu2 %v1646_v25  ;;  %v1725_v25 = vld [vmem:[#allocation2 + $0x2b8] sm:$0xff] }
 0x718   : > { %7688 = vst [vmem:[#allocation44_spill] sm:$0xff] %v5931_v15  ;;  %v5935_v63 = vpop.f32.mrf.mxu3  ;;  %2359 = vmatpush.msra.mxu1 %v1725_v25  ;;  %v1892_v15 = vld [vmem:[#allocation2 + $0x7f0] sm:$0xff] }
 0x719   : > { %7689 = vst [vmem:[#allocation45_spill] sm:$0xff] %v5935_v63  ;;  %v5937_v62 = vpop.f32.mrf.mxu0  ;;  %v1889_v63 = vld [vmem:[#allocation2 + $0x7d8] sm:$0xff]  ;;  %2804 = vmatpush.msrb.mxu3 %v1892_v15  ;;  %v1860_v15 = vld [vmem:[#allocation2 + $0x6f0] sm:$0xff] }
 0x71a   : > { %7690 = vst [vmem:[#allocation46_spill] sm:$0xff] %v5937_v62  ;;  %2126 = vmatmul.f32.gmra.mxu1 %v5697_v5 }
 0x71b   : > { %2360 = vmatpush.msra.mxu1 %v1709_v4 }
 0x71c   : > { %2209 = vmatmul.f32.gmra.mxu2 %v5752_v16  ;;  %2274 = vmatmul.f32.gmra.mxu0 %v5752_v16 }
 0x71d   : > { %2339 = vmatmul.f32.gmra.mxu3 %v5752_v16 }
 0x71f   : > { %v5943_v48 = vpop.f32.mrf.mxu2  ;;  %v5945_v6 = vpop.f32.mrf.mxu1 }
 0x720   : > { %7691 = vst [vmem:[#allocation47_spill] sm:$0xff] %v5943_v48  ;;  %v5947_v54 = vpop.f32.mrf.mxu3 }
 0x721   : > { %7692 = vst [vmem:[#allocation48_spill] sm:$0xff] %v5945_v6  ;;  %v5949_v24 = vpop.f32.mrf.mxu0 }
 0x722   : > { %7693 = vst [vmem:[#allocation49_spill] sm:$0xff] %v5947_v54  ;;  %2129 = vmatmul.f32.gmra.mxu1 %v5704_v12 }
 0x723   : > { %7694 = vst [vmem:[#allocation50_spill] sm:$0xff] %v5949_v24 }
 0x724   : > { %2212 = vmatmul.f32.gmra.mxu2 %v5762_v28  ;;  %2277 = vmatmul.f32.gmra.mxu0 %v5762_v28 }
 0x725   : > { %2342 = vmatmul.f32.gmra.mxu3 %v5762_v28 }
 0x727   : > { %v5955_v46 = vpop.f32.mrf.mxu2  ;;  %v5957_v1 = vpop.f32.mrf.mxu1 }
 0x728   : > { %7695 = vst [vmem:[#allocation51_spill] sm:$0xff] %v5955_v46  ;;  %v5959_v36 = vpop.f32.mrf.mxu3 }
 0x729   : > { %7696 = vst [vmem:[#allocation52_spill] sm:$0xff] %v5957_v1  ;;  %v5961_v20 = vpop.f32.mrf.mxu0  ;;  %v1859_v1 = vld [vmem:[#allocation2 + $0x6e8] sm:$0xff] }
 0x72a   : > { %7697 = vst [vmem:[#allocation53_spill] sm:$0xff] %v5959_v36  ;;  %2132 = vmatmul.f32.gmra.mxu1 %v5713_v40 }
 0x72b   : > { %7698 = vst [vmem:[#allocation54_spill] sm:$0xff] %v5961_v20  ;;  %v1693_v20 = vld [vmem:[#allocation2 + $0x1b8] sm:$0xff] }
 0x72c   : > { %2215 = vmatmul.f32.gmra.mxu2 %v5774_v37  ;;  %2280 = vmatmul.f32.gmra.mxu0 %v5774_v37 }
 0x72d   : > { %2345 = vmatmul.f32.gmra.mxu3 %v5774_v37  ;;  %2361 = vmatpush.msra.mxu1 %v1693_v20  ;;  %v1661_v20 = vld [vmem:[#allocation2 + $0xb8] sm:$0xff] }
 0x72f   : > { %v5967_v31 = vpop.f32.mrf.mxu2  ;;  %v5969_v25 = vpop.f32.mrf.mxu1 }
 0x730   : > { %7699 = vst [vmem:[#allocation55_spill] sm:$0xff] %v5967_v31  ;;  %v5971_v24 = vpop.f32.mrf.mxu3 }
 0x731   : > { %7700 = vst [vmem:[#allocation56_spill] sm:$0xff] %v5969_v25  ;;  %v5973_v46 = vpop.f32.mrf.mxu0  ;;  %v1858_v25 = vld [vmem:[#allocation2 + $0x6e0] sm:$0xff] }
 0x732   : > { %7701 = vst [vmem:[#allocation57_spill] sm:$0xff] %v5971_v24  ;;  %2135 = vmatmul.f32.gmra.mxu1 %v5722_v61 }
 0x733   : > { %7702 = vst [vmem:[#allocation58_spill] sm:$0xff] %v5973_v46  ;;  %v1677_v46 = vld [vmem:[#allocation2 + $0x138] sm:$0xff] }
 0x734   : > { %2430 = vmatmul.f32.vlgmr.msrb.gmra.mxu2 %v5644_v17  ;;  %2495 = vmatmul.f32.vlgmr.msra.gmra.mxu0 %v5644_v17 }
 0x735   : > { %2560 = vmatmul.f32.vlgmr.msra.gmra.mxu3 %v5644_v17  ;;  %2362 = vmatpush.msra.mxu1 %v1677_v46 }
 0x737   : > { %v5979_v36 = vpop.f32.mrf.mxu2  ;;  %v5981_v4 = vpop.f32.mrf.mxu1  ;;  %2363 = vmatpush.msra.mxu1 %v1661_v20 }
 0x738   : > { %7703 = vst [vmem:[#allocation59_spill] sm:$0xff] %v5979_v36  ;;  %v5983_v31 = vpop.f32.mrf.mxu3 }
 0x739   : > { %7704 = vst [vmem:[#allocation60_spill] sm:$0xff] %v5981_v4  ;;  %v5985_v54 = vpop.f32.mrf.mxu0  ;;  %v1809_v4 = vld [vmem:[#allocation2 + $0x558] sm:$0xff] }
 0x73a   : > { %7705 = vst [vmem:[#allocation61_spill] sm:$0xff] %v5983_v31  ;;  %2138 = vmatmul.f32.gmra.mxu1 %v5731_v29 }
 0x73b   : > { %7706 = vst [vmem:[#allocation62_spill] sm:$0xff] %v5985_v54  ;;  %v1645_v54 = vld [vmem:[#allocation2 + $0x38] sm:$0xff] }
 0x73c   : > { %2433 = vmatmul.f32.gmra.mxu2 %v5651_v30  ;;  %2498 = vmatmul.f32.gmra.mxu0 %v5651_v30 }
 0x73d   : > { %2563 = vmatmul.f32.gmra.mxu3 %v5651_v30  ;;  %2364 = vmatpush.msra.mxu1 %v1645_v54 }
 0x73f   : > { %v5991_v24 = vpop.f32.mrf.mxu2  ;;  %v5993_v36 = vpop.f32.mrf.mxu1  ;;  %2609 = vmatpush.msrb.mxu1 %v1889_v63 }
 0x740   : > { %7707 = vst [vmem:[#allocation63_spill] sm:$0xff] %v5991_v24  ;;  %v5995_v62 = vpop.f32.mrf.mxu3 }
 0x741   : > { %7708 = vst [vmem:[#allocation64_spill] sm:$0xff] %v5993_v36  ;;  %v5997_v31 = vpop.f32.mrf.mxu0 }
 0x742   : > { %7709 = vst [vmem:[#allocation65_spill] sm:$0xff] %v5995_v62  ;;  %2141 = vmatmul.f32.gmra.mxu1 %v5742_v13 }
 0x743   : > { %7710 = vst [vmem:[#allocation66_spill] sm:$0xff] %v5997_v31 }
 0x744   : > { %2436 = vmatmul.f32.gmra.mxu2 %v5660_v38  ;;  %2501 = vmatmul.f32.gmra.mxu0 %v5660_v38 }
 0x745   : > { %2566 = vmatmul.f32.gmra.mxu3 %v5660_v38 }
 0x747   : > { %v6003_v46 = vpop.f32.mrf.mxu2  ;;  %v6005_v24 = vpop.f32.mrf.mxu1 }
 0x748   : > { %7711 = vst [vmem:[#allocation67_spill] sm:$0xff] %v6003_v46  ;;  %v6007_v48 = vpop.f32.mrf.mxu3 }
 0x749   : > { %7712 = vst [vmem:[#allocation68_spill] sm:$0xff] %v6005_v24  ;;  %v6009_v62 = vpop.f32.mrf.mxu0 }
 0x74a   : > { %7713 = vst [vmem:[#allocation69_spill] sm:$0xff] %v6007_v48  ;;  %2144 = vmatmul.f32.gmra.mxu1 %v5752_v16 }
 0x74b   : > { %7714 = vst [vmem:[#allocation70_spill] sm:$0xff] %v6009_v62 }
 0x74c   : > { %2439 = vmatmul.f32.gmra.mxu2 %v5667_v42  ;;  %2504 = vmatmul.f32.gmra.mxu0 %v5667_v42 }
 0x74d   : > { %2569 = vmatmul.f32.gmra.mxu3 %v5667_v42 }
 0x74f   : > { %v6015_v54 = vpop.f32.mrf.mxu2  ;;  %v6017_v20 = vpop.f32.mrf.mxu1 }
 0x750   : > { %7715 = vst [vmem:[#allocation71_spill] sm:$0xff] %v6015_v54  ;;  %v6019_v31 = vpop.f32.mrf.mxu3 }
 0x751   : > { %7716 = vst [vmem:[#allocation72_spill] sm:$0xff] %v6017_v20  ;;  %v6021_v46 = vpop.f32.mrf.mxu0 }
 0x752   : > { %7717 = vst [vmem:[#allocation73_spill] sm:$0xff] %v6019_v31  ;;  %2147 = vmatmul.f32.gmra.mxu1 %v5762_v28  ;;  %v1873_v31 = vld [vmem:[#allocation2 + $0x758] sm:$0xff] }
 0x753   : > { %7718 = vst [vmem:[#allocation74_spill] sm:$0xff] %v6021_v46  ;;  %2610 = vmatpush.msrb.mxu1 %v1873_v31 }
 0x754   : > { %2442 = vmatmul.f32.gmra.mxu2 %v5674_v47  ;;  %2507 = vmatmul.f32.gmra.mxu0 %v5674_v47 }
 0x755   : > { %2572 = vmatmul.f32.gmra.mxu3 %v5674_v47 }
 0x757   : > { %v6027_v62 = vpop.f32.mrf.mxu2  ;;  %v6029_v48 = vpop.f32.mrf.mxu1 }
 0x758   : > { %7719 = vst [vmem:[#allocation75_spill] sm:$0xff] %v6027_v62  ;;  %v6031_v54 = vpop.f32.mrf.mxu3 }
 0x759   : > { %7720 = vst [vmem:[#allocation76_spill] sm:$0xff] %v6029_v48  ;;  %v6033_v20 = vpop.f32.mrf.mxu0 }
 0x75a   : > { %7721 = vst [vmem:[#allocation77_spill] sm:$0xff] %v6031_v54  ;;  %2150 = vmatmul.f32.gmra.mxu1 %v5774_v37  ;;  %v1857_v54 = vld [vmem:[#allocation2 + $0x6d8] sm:$0xff] }
 0x75b   : > { %7722 = vst [vmem:[#allocation78_spill] sm:$0xff] %v6033_v20  ;;  %2611 = vmatpush.msrb.mxu1 %v1857_v54 }
 0x75c   : > { %2445 = vmatmul.f32.gmra.mxu2 %v5681_v52  ;;  %2510 = vmatmul.f32.gmra.mxu0 %v5681_v52 }
 0x75d   : > { %2575 = vmatmul.f32.gmra.mxu3 %v5681_v52 }
 0x75f   : > { %v6039_v63 = vpop.f32.mrf.mxu2  ;;  %v6041_v46 = vpop.f32.mrf.mxu1 }
 0x760   : > { %7723 = vst [vmem:[#allocation79_spill] sm:$0xff] %v6039_v63  ;;  %v6043_v62 = vpop.f32.mrf.mxu3 }
 0x761   : > { %7724 = vst [vmem:[#allocation80_spill] sm:$0xff] %v6041_v46  ;;  %v6045_v48 = vpop.f32.mrf.mxu0 }
 0x762   : > { %7725 = vst [vmem:[#allocation81_spill] sm:$0xff] %v6043_v62  ;;  %2365 = vmatmul.f32.vlgmr.msra.gmra.mxu1 %v5644_v17  ;;  %v1841_v62 = vld [vmem:[#allocation2 + $0x658] sm:$0xff] }
 0x763   : > { %7726 = vst [vmem:[#allocation82_spill] sm:$0xff] %v6045_v48  ;;  %2612 = vmatpush.msrb.mxu1 %v1841_v62  ;;  %v1890_v62 = vld [vmem:[#allocation2 + $0x7e0] sm:$0xff] }
 0x764   : > { %2448 = vmatmul.f32.gmra.mxu2 %v5688_v57  ;;  %2513 = vmatmul.f32.gmra.mxu0 %v5688_v57 }
 0x765   : > { %2578 = vmatmul.f32.gmra.mxu3 %v5688_v57  ;;  %2674 = vmatpush.msra.mxu2 %v1890_v62  ;;  %v1843_v62 = vld [vmem:[#allocation2 + $0x668] sm:$0xff] }
 0x767   : > { %v6051_v31 = vpop.f32.mrf.mxu2  ;;  %v6053_v20 = vpop.f32.mrf.mxu1 }
 0x768   : > { %7727 = vst [vmem:[#allocation83_spill] sm:$0xff] %v6051_v31  ;;  %v6055_v63 = vpop.f32.mrf.mxu3 }
 0x769   : > { %7728 = vst [vmem:[#allocation84_spill] sm:$0xff] %v6053_v20  ;;  %v6057_v46 = vpop.f32.mrf.mxu0 }
 0x76a   : > { %7729 = vst [vmem:[#allocation85_spill] sm:$0xff] %v6055_v63  ;;  %2368 = vmatmul.f32.gmra.mxu1 %v5651_v30  ;;  %v1825_v63 = vld [vmem:[#allocation2 + $0x5d8] sm:$0xff] }
 0x76b   : > { %7730 = vst [vmem:[#allocation86_spill] sm:$0xff] %v6057_v46  ;;  %2613 = vmatpush.msrb.mxu1 %v1825_v63  ;;  %v1891_v46 = vld [vmem:[#allocation2 + $0x7e8] sm:$0xff] }
 0x76c   : > { %2451 = vmatmul.f32.gmra.mxu2 %v5697_v5  ;;  %2516 = vmatmul.f32.gmra.mxu0 %v5697_v5 }
 0x76d   : > { %2581 = vmatmul.f32.gmra.mxu3 %v5697_v5  ;;  %2739 = vmatpush.msrb.mxu0 %v1891_v46  ;;  %v1842_v46 = vld [vmem:[#allocation2 + $0x660] sm:$0xff] }
 0x76e   : > { %2614 = vmatpush.msrb.mxu1 %v1809_v4 }
 0x76f   : > { %v6063_v54 = vpop.f32.mrf.mxu2  ;;  %v6065_v48 = vpop.f32.mrf.mxu1 }
 0x770   : > { %7731 = vst [vmem:[#allocation87_spill] sm:$0xff] %v6063_v54  ;;  %v6067_v31 = vpop.f32.mrf.mxu3  ;;  %v1876_v54 = vld [vmem:[#allocation2 + $0x770] sm:$0xff] }
 0x771   : > { %7732 = vst [vmem:[#allocation88_spill] sm:$0xff] %v6065_v48  ;;  %v6069_v20 = vpop.f32.mrf.mxu0  ;;  %2805 = vmatpush.msrb.mxu3 %v1876_v54  ;;  %v1827_v54 = vld [vmem:[#allocation2 + $0x5e8] sm:$0xff] }
 0x772   : > { %7733 = vst [vmem:[#allocation89_spill] sm:$0xff] %v6067_v31  ;;  %2371 = vmatmul.f32.gmra.mxu1 %v5660_v38  ;;  %v1874_v31 = vld [vmem:[#allocation2 + $0x760] sm:$0xff] }
 0x773   : > { %7734 = vst [vmem:[#allocation90_spill] sm:$0xff] %v6069_v20  ;;  %v1875_v20 = vld [vmem:[#allocation2 + $0x768] sm:$0xff]  ;;  %2675 = vmatpush.msra.mxu2 %v1874_v31  ;;  %v1826_v31 = vld [vmem:[#allocation2 + $0x5e0] sm:$0xff]  ;;  %2806 = vmatpush.msrb.mxu3 %v1860_v15 }
 0x774   : > { %2454 = vmatmul.f32.gmra.mxu2 %v5704_v12  ;;  %2519 = vmatmul.f32.gmra.mxu0 %v5704_v12  ;;  %v1794_v15 = vld [vmem:[#allocation2 + $0x4e0] sm:$0xff] }
 0x775   : > { %2584 = vmatmul.f32.gmra.mxu3 %v5704_v12  ;;  %2740 = vmatpush.msrb.mxu0 %v1875_v20  ;;  %v1844_v20 = vld [vmem:[#allocation2 + $0x670] sm:$0xff] }
 0x776   : > { %2676 = vmatpush.msra.mxu2 %v1858_v25  ;;  %v1828_v25 = vld [vmem:[#allocation2 + $0x5f0] sm:$0xff]  ;;  %2807 = vmatpush.msrb.mxu3 %v1844_v20 }
 0x777   : > { %v6075_v48 = vpop.f32.mrf.mxu2  ;;  %v6077_v63 = vpop.f32.mrf.mxu1  ;;  %2741 = vmatpush.msrb.mxu0 %v1859_v1  ;;  %v1810_v1 = vld [vmem:[#allocation2 + $0x560] sm:$0xff]  ;;  %v1796_v20 = vld [vmem:[#allocation2 + $0x4f0] sm:$0xff] }
 0x778   : > { %7735 = vst [vmem:[#allocation91_spill] sm:$0xff] %v6075_v48  ;;  %v6079_v24 = vpop.f32.mrf.mxu3  ;;  %2677 = vmatpush.msra.mxu2 %v1842_v46  ;;  %v1793_v46 = vld [vmem:[#allocation2 + $0x4d8] sm:$0xff]  ;;  %2808 = vmatpush.msrb.mxu3 %v1828_v25  ;;  %v1762_v25 = vld [vmem:[#allocation2 + $0x3e0] sm:$0xff] }
 0x779   : > { %7736 = vst [vmem:[#allocation92_spill] sm:$0xff] %v6077_v63  ;;  %v6081_v36 = vpop.f32.mrf.mxu0  ;;  %2742 = vmatpush.msrb.mxu0 %v1843_v62  ;;  %2615 = vmatpush.msrb.mxu1 %v1793_v46  ;;  %v1812_v62 = vld [vmem:[#allocation2 + $0x570] sm:$0xff] }
 0x77a   : > { %7737 = vst [vmem:[#allocation93_spill] sm:$0xff] %v6079_v24  ;;  %2374 = vmatmul.f32.gmra.mxu1 %v5667_v42  ;;  %2678 = vmatpush.msra.mxu2 %v1826_v31  ;;  %v1811_v24 = vld [vmem:[#allocation2 + $0x568] sm:$0xff]  ;;  %v1780_v46 = vld [vmem:[#allocation2 + $0x470] sm:$0xff] }
 0x77b   : > { %7738 = vst [vmem:[#allocation94_spill] sm:$0xff] %v6081_v36  ;;  %2743 = vmatpush.msrb.mxu0 %v1827_v54  ;;  %v1795_v31 = vld [vmem:[#allocation2 + $0x4e8] sm:$0xff]  ;;  %2809 = vmatpush.msrb.mxu3 %v1812_v62  ;;  %v1764_v62 = vld [vmem:[#allocation2 + $0x3f0] sm:$0xff] }
 0x77c   : > { %2457 = vmatmul.f32.gmra.mxu2 %v5713_v40  ;;  %2522 = vmatmul.f32.gmra.mxu0 %v5713_v40  ;;  %v1779_v54 = vld [vmem:[#allocation2 + $0x468] sm:$0xff] }
 0x77d   : > { %2587 = vmatmul.f32.gmra.mxu3 %v5713_v40  ;;  %2679 = vmatpush.msra.mxu2 %v1810_v1 }
 0x77e   : > { %2744 = vmatpush.msrb.mxu0 %v1811_v24  ;;  %v1763_v24 = vld [vmem:[#allocation2 + $0x3e8] sm:$0xff]  ;;  %2810 = vmatpush.msrb.mxu3 %v1796_v20  ;;  %v1748_v20 = vld [vmem:[#allocation2 + $0x370] sm:$0xff] }
 0x77f   : > { %v6087_v4 = vpop.f32.mrf.mxu2  ;;  %v6089_v36 = vpop.f32.mrf.mxu1  ;;  %2680 = vmatpush.msra.mxu2 %v1794_v15  ;;  %v1777_v15 = vld [vmem:[#allocation2 + $0x458] sm:$0xff] }
 0x780   : > { %7739 = vst [vmem:[#allocation95_spill] sm:$0xff] %v6087_v4  ;;  %v6091_v63 = vpop.f32.mrf.mxu3  ;;  %2745 = vmatpush.msrb.mxu0 %v1795_v31  ;;  %v1746_v4 = vld [vmem:[#allocation2 + $0x360] sm:$0xff]  ;;  %2811 = vmatpush.msrb.mxu3 %v1780_v46 }
 0x781   : > { %7740 = vst [vmem:[#allocation96_spill] sm:$0xff] %v6089_v36  ;;  %v6093_v48 = vpop.f32.mrf.mxu0  ;;  %v1778_v36 = vld [vmem:[#allocation2 + $0x460] sm:$0xff]  ;;  %2616 = vmatpush.msrb.mxu1 %v1777_v15  ;;  %v1699_v15 = vld [vmem:[#allocation2 + $0x1e8] sm:$0xff] }
 0x782   : > { %7741 = vst [vmem:[#allocation97_spill] sm:$0xff] %v6091_v63  ;;  %2377 = vmatmul.f32.gmra.mxu1 %v5674_v47  ;;  %2681 = vmatpush.msra.mxu2 %v1778_v36  ;;  %v1747_v36 = vld [vmem:[#allocation2 + $0x368] sm:$0xff]  ;;  %v1730_v31 = vld [vmem:[#allocation2 + $0x2e0] sm:$0xff] }
 0x783   : > { %7742 = vst [vmem:[#allocation98_spill] sm:$0xff] %v6093_v48  ;;  %2746 = vmatpush.msrb.mxu0 %v1779_v54  ;;  %v1731_v54 = vld [vmem:[#allocation2 + $0x2e8] sm:$0xff]  ;;  %2812 = vmatpush.msrb.mxu3 %v1764_v62  ;;  %v1716_v62 = vld [vmem:[#allocation2 + $0x270] sm:$0xff] }
 0x784   : > { %2460 = vmatmul.f32.gmra.mxu2 %v5722_v61  ;;  %2525 = vmatmul.f32.gmra.mxu0 %v5722_v61 }
 0x785   : > { %2590 = vmatmul.f32.gmra.mxu3 %v5722_v61  ;;  %2682 = vmatpush.msra.mxu2 %v1762_v25  ;;  %v1714_v25 = vld [vmem:[#allocation2 + $0x260] sm:$0xff] }
 0x786   : > { %2747 = vmatpush.msrb.mxu0 %v1763_v24  ;;  %v1732_v24 = vld [vmem:[#allocation2 + $0x2f0] sm:$0xff]  ;;  %2813 = vmatpush.msrb.mxu3 %v1748_v20 }
 0x787   : > { %v6099_v1 = vpop.f32.mrf.mxu2  ;;  %v6101_v48 = vpop.f32.mrf.mxu1  ;;  %2683 = vmatpush.msra.mxu2 %v1746_v4  ;;  %v1700_v20 = vld [vmem:[#allocation2 + $0x1f0] sm:$0xff] }
 0x788   : > { %7743 = vst [vmem:[#allocation99_spill] sm:$0xff] %v6099_v1  ;;  %v6103_v63 = vpop.f32.mrf.mxu3  ;;  %2748 = vmatpush.msrb.mxu0 %v1747_v36  ;;  %2814 = vmatpush.msrb.mxu3 %v1732_v24  ;;  %v1761_v36 = vld [vmem:[#allocation2 + $0x3d8] sm:$0xff] }
 0x789   : > { %7744 = vst [vmem:[#allocation100_spill] sm:$0xff] %v6101_v48  ;;  %v6105_v6 = vpop.f32.mrf.mxu0  ;;  %2684 = vmatpush.msra.mxu2 %v1730_v31  ;;  %v1682_v31 = vld [vmem:[#allocation2 + $0x160] sm:$0xff]  ;;  %2617 = vmatpush.msrb.mxu1 %v1761_v36  ;;  %v1668_v36 = vld [vmem:[#allocation2 + $0xf0] sm:$0xff] }
 0x78a   : > { %7745 = vst [vmem:[#allocation101_spill] sm:$0xff] %v6103_v63  ;;  %2380 = vmatmul.f32.gmra.mxu1 %v5681_v52  ;;  %2749 = vmatpush.msrb.mxu0 %v1731_v54  ;;  %v1698_v63 = vld [vmem:[#allocation2 + $0x1e0] sm:$0xff] }
 0x78b   : > { %7746 = vst [vmem:[#allocation102_spill] sm:$0xff] %v6105_v6  ;;  %v1715_v6 = vld [vmem:[#allocation2 + $0x268] sm:$0xff]  ;;  %2685 = vmatpush.msra.mxu2 %v1714_v25  ;;  %2815 = vmatpush.msrb.mxu3 %v1716_v62  ;;  %v1666_v54 = vld [vmem:[#allocation2 + $0xe0] sm:$0xff] }
 0x78c   : > { %2463 = vmatmul.f32.gmra.mxu2 %v5731_v29  ;;  %2528 = vmatmul.f32.gmra.mxu0 %v5731_v29  ;;  %v1651_v62 = vld [vmem:[#allocation2 + $0x68] sm:$0xff] }
 0x78d   : > { %2593 = vmatmul.f32.gmra.mxu3 %v5731_v29  ;;  %2750 = vmatpush.msrb.mxu0 %v1715_v6  ;;  %v1667_v6 = vld [vmem:[#allocation2 + $0xe8] sm:$0xff] }
 0x78e   : > { %2686 = vmatpush.msra.mxu2 %v1698_v63  ;;  %v1684_v63 = vld [vmem:[#allocation2 + $0x170] sm:$0xff]  ;;  %2816 = vmatpush.msrb.mxu3 %v1700_v20 }
 0x78f   : > { %v6111_v46 = vpop.f32.mrf.mxu2  ;;  %v6113_v4 = vpop.f32.mrf.mxu1  ;;  %2751 = vmatpush.msrb.mxu0 %v1699_v15  ;;  %v1745_v15 = vld [vmem:[#allocation2 + $0x358] sm:$0xff] }
 0x790   : > { %7747 = vst [vmem:[#allocation103_spill] sm:$0xff] %v6111_v46  ;;  %v6115_v48 = vpop.f32.mrf.mxu3  ;;  %2687 = vmatpush.msra.mxu2 %v1682_v31  ;;  %2817 = vmatpush.msrb.mxu3 %v1684_v63  ;;  %v1729_v63 = vld [vmem:[#allocation2 + $0x2d8] sm:$0xff] }
 0x791   : > { %7748 = vst [vmem:[#allocation104_spill] sm:$0xff] %v6113_v4  ;;  %v6117_v1 = vpop.f32.mrf.mxu0  ;;  %v1683_v4 = vld [vmem:[#allocation2 + $0x168] sm:$0xff]  ;;  %2618 = vmatpush.msrb.mxu1 %v1745_v15 }
 0x792   : > { %7749 = vst [vmem:[#allocation105_spill] sm:$0xff] %v6115_v48  ;;  %2383 = vmatmul.f32.gmra.mxu1 %v5688_v57  ;;  %2752 = vmatpush.msrb.mxu0 %v1683_v4  ;;  %v1650_v48 = vld [vmem:[#allocation2 + $0x60] sm:$0xff]  ;;  %v1652_v4 = vld [vmem:[#allocation2 + $0x70] sm:$0xff] }
 0x793   : > { %7750 = vst [vmem:[#allocation106_spill] sm:$0xff] %v6117_v1  ;;  %2688 = vmatpush.msra.mxu2 %v1666_v54  ;;  %2818 = vmatpush.msrb.mxu3 %v1668_v36 }
 0x794   : > { %2466 = vmatmul.f32.gmra.mxu2 %v5742_v13  ;;  %2531 = vmatmul.f32.gmra.mxu0 %v5742_v13 }
 0x795   : > { %2596 = vmatmul.f32.gmra.mxu3 %v5742_v13  ;;  %2753 = vmatpush.msrb.mxu0 %v1667_v6 }
 0x796   : > { %2689 = vmatpush.msra.mxu2 %v1650_v48  ;;  %2819 = vmatpush.msrb.mxu3 %v1652_v4  ;;  %v1713_v4 = vld [vmem:[#allocation2 + $0x258] sm:$0xff] }
 0x797   : > { %v6123_v25 = vpop.f32.mrf.mxu2  ;;  %v6125_v24 = vpop.f32.mrf.mxu1  ;;  %2754 = vmatpush.msrb.mxu0 %v1651_v62  ;;  %2619 = vmatpush.msrb.mxu1 %v1729_v63 }
 0x798   : > { %7751 = vst [vmem:[#allocation107_spill] sm:$0xff] %v6123_v25  ;;  %v6127_v1 = vpop.f32.mrf.mxu3 }
 0x799   : > { %7752 = vst [vmem:[#allocation108_spill] sm:$0xff] %v6125_v24  ;;  %v6129_v46 = vpop.f32.mrf.mxu0  ;;  %2620 = vmatpush.msrb.mxu1 %v1713_v4  ;;  %v3203_v24 = vld [vmem:[#allocation5 + $0x68] sm:$0xff] }
 0x79a   : > { %7753 = vst [vmem:[#allocation109_spill] sm:$0xff] %v6127_v1  ;;  %2386 = vmatmul.f32.gmra.mxu1 %v5697_v5  ;;  %v3219_v1 = vld [vmem:[#allocation5 + $0xe8] sm:$0xff] }
 0x79b   : > { %7754 = vst [vmem:[#allocation110_spill] sm:$0xff] %v6129_v46  ;;  %v1813_v46 = vld [vmem:[#allocation2 + $0x578] sm:$0xff] }
 0x79c   : > { %2469 = vmatmul.f32.gmra.mxu2 %v5752_v16  ;;  %2534 = vmatmul.f32.gmra.mxu0 %v5752_v16 }
 0x79d   : > { %2599 = vmatmul.f32.gmra.mxu3 %v5752_v16 }
 0x79f   : > { %v6135_v31 = vpop.f32.mrf.mxu2  ;;  %v6137_v20 = vpop.f32.mrf.mxu1 }
 0x7a0   : > { %7755 = vst [vmem:[#allocation111_spill] sm:$0xff] %v6135_v31  ;;  %v6139_v54 = vpop.f32.mrf.mxu3 }
 0x7a1   : > { %7756 = vst [vmem:[#allocation112_spill] sm:$0xff] %v6137_v20  ;;  %v6141_v6 = vpop.f32.mrf.mxu0  ;;  %v3237_v20 = vld [vmem:[#allocation5 + $0x178] sm:$0xff] }
 0x7a2   : > { %7757 = vst [vmem:[#allocation113_spill] sm:$0xff] %v6139_v54  ;;  %2389 = vmatmul.f32.gmra.mxu1 %v5704_v12  ;;  %3576 = vmatpush.msra.mxu3 %v3237_v20  ;;  %v3235_v20 = vld [vmem:[#allocation5 + $0x168] sm:$0xff] }
 0x7a3   : > { %7758 = vst [vmem:[#allocation114_spill] sm:$0xff] %v6141_v6 }
 0x7a4   : > { %2472 = vmatmul.f32.gmra.mxu2 %v5762_v28  ;;  %2537 = vmatmul.f32.gmra.mxu0 %v5762_v28 }
 0x7a5   : > { %2602 = vmatmul.f32.gmra.mxu3 %v5762_v28 }
 0x7a7   : > { %v6147_v48 = vpop.f32.mrf.mxu2  ;;  %v6149_v15 = vpop.f32.mrf.mxu1 }
 0x7a8   : > { %7759 = vst [vmem:[#allocation115_spill] sm:$0xff] %v6147_v48  ;;  %v6151_v62 = vpop.f32.mrf.mxu3 }
 0x7a9   : > { %7760 = vst [vmem:[#allocation116_spill] sm:$0xff] %v6149_v15  ;;  %v6153_v36 = vpop.f32.mrf.mxu0 }
 0x7aa   : > { %7761 = vst [vmem:[#allocation117_spill] sm:$0xff] %v6151_v62  ;;  %2392 = vmatmul.f32.gmra.mxu1 %v5713_v40  ;;  %v1697_v62 = vld [vmem:[#allocation2 + $0x1d8] sm:$0xff] }
 0x7ab   : > { %7762 = vst [vmem:[#allocation118_spill] sm:$0xff] %v6153_v36  ;;  %2621 = vmatpush.msrb.mxu1 %v1697_v62 }
 0x7ac   : > { %2475 = vmatmul.f32.gmra.mxu2 %v5774_v37  ;;  %2540 = vmatmul.f32.gmra.mxu0 %v5774_v37 }
 0x7ad   : > { %2605 = vmatmul.f32.gmra.mxu3 %v5774_v37 }
 0x7af   : > { %v6159_v63 = vpop.f32.mrf.mxu2  ;;  %v6161_v6 = vpop.f32.mrf.mxu1 }
 0x7b0   : > { %7763 = vst [vmem:[#allocation119_spill] sm:$0xff] %v6159_v63  ;;  %v6163_v48 = vpop.f32.mrf.mxu3 }
 0x7b1   : > { %7764 = vst [vmem:[#allocation120_spill] sm:$0xff] %v6161_v6  ;;  %v6165_v15 = vpop.f32.mrf.mxu0 }
 0x7b2   : > { %7765 = vst [vmem:[#allocation121_spill] sm:$0xff] %v6163_v48  ;;  %2395 = vmatmul.f32.gmra.mxu1 %v5722_v61  ;;  %v1681_v48 = vld [vmem:[#allocation2 + $0x158] sm:$0xff] }
 0x7b3   : > { %7766 = vst [vmem:[#allocation122_spill] sm:$0xff] %v6165_v15  ;;  %2622 = vmatpush.msrb.mxu1 %v1681_v48  ;;  %v1665_v15 = vld [vmem:[#allocation2 + $0xd8] sm:$0xff] }
 0x7b4   : > { %2690 = vmatmul.f32.vlgmr.msra.gmra.mxu2 %v5644_v17  ;;  %2755 = vmatmul.f32.vlgmr.msrb.gmra.mxu0 %v5644_v17 }
 0x7b5   : > { %2820 = vmatmul.f32.vlgmr.msrb.gmra.mxu3 %v5644_v17  ;;  %2623 = vmatpush.msrb.mxu1 %v1665_v15 }
 0x7b7   : > { %v6171_v4 = vpop.f32.mrf.mxu2  ;;  %v6173_v36 = vpop.f32.mrf.mxu1 }
 0x7b8   : > { %7767 = vst [vmem:[#allocation123_spill] sm:$0xff] %v6171_v4  ;;  %v6175_v63 = vpop.f32.mrf.mxu3 }
 0x7b9   : > { %7768 = vst [vmem:[#allocation124_spill] sm:$0xff] %v6173_v36  ;;  %v6177_v6 = vpop.f32.mrf.mxu0 }
 0x7ba   : > { %7769 = vst [vmem:[#allocation125_spill] sm:$0xff] %v6175_v63  ;;  %2398 = vmatmul.f32.gmra.mxu1 %v5731_v29 }
 0x7bb   : > { %7770 = vst [vmem:[#allocation126_spill] sm:$0xff] %v6177_v6  ;;  %v1649_v6 = vld [vmem:[#allocation2 + $0x58] sm:$0xff] }
 0x7bc   : > { %2693 = vmatmul.f32.gmra.mxu2 %v5651_v30  ;;  %2758 = vmatmul.f32.gmra.mxu0 %v5651_v30 }
 0x7bd   : > { %2823 = vmatmul.f32.gmra.mxu3 %v5651_v30  ;;  %2624 = vmatpush.msrb.mxu1 %v1649_v6 }
 0x7bf   : > { %v6183_v62 = vpop.f32.mrf.mxu2  ;;  %v6185_v4 = vpop.f32.mrf.mxu1 }
 0x7c0   : > { %7771 = vst [vmem:[#allocation127_spill] sm:$0xff] %v6183_v62  ;;  %v6187_v36 = vpop.f32.mrf.mxu3 }
 0x7c1   : > { %7772 = vst [vmem:[#allocation128_spill] sm:$0xff] %v6185_v4  ;;  %v6189_v63 = vpop.f32.mrf.mxu0 }
 0x7c2   : > { %7773 = vst [vmem:[#allocation129_spill] sm:$0xff] %v6187_v36  ;;  %2401 = vmatmul.f32.gmra.mxu1 %v5742_v13 }
 0x7c3   : > { %7774 = vst [vmem:[#allocation130_spill] sm:$0xff] %v6189_v63 }
 0x7c4   : > { %2696 = vmatmul.f32.gmra.mxu2 %v5660_v38  ;;  %2761 = vmatmul.f32.gmra.mxu0 %v5660_v38 }
 0x7c5   : > { %2826 = vmatmul.f32.gmra.mxu3 %v5660_v38 }
 0x7c7   : > { %v6195_v48 = vpop.f32.mrf.mxu2  ;;  %v6197_v62 = vpop.f32.mrf.mxu1 }
 0x7c8   : > { %7775 = vst [vmem:[#allocation131_spill] sm:$0xff] %v6195_v48  ;;  %v6199_v4 = vpop.f32.mrf.mxu3 }
 0x7c9   : > { %7776 = vst [vmem:[#allocation132_spill] sm:$0xff] %v6197_v62  ;;  %v6201_v36 = vpop.f32.mrf.mxu0  ;;  %v1893_v62 = vld [vmem:[#allocation2 + $0x7f8] sm:$0xff] }
 0x7ca   : > { %7777 = vst [vmem:[#allocation133_spill] sm:$0xff] %v6199_v4  ;;  %2404 = vmatmul.f32.gmra.mxu1 %v5752_v16 }
 0x7cb   : > { %7778 = vst [vmem:[#allocation134_spill] sm:$0xff] %v6201_v36  ;;  %2869 = vmatpush.msra.mxu1 %v1893_v62 }
 0x7cc   : > { %2699 = vmatmul.f32.gmra.mxu2 %v5667_v42  ;;  %2764 = vmatmul.f32.gmra.mxu0 %v5667_v42 }
 0x7cd   : > { %2829 = vmatmul.f32.gmra.mxu3 %v5667_v42 }
 0x7cf   : > { %v6207_v6 = vpop.f32.mrf.mxu2  ;;  %v6209_v15 = vpop.f32.mrf.mxu1 }
 0x7d0   : > { %7779 = vst [vmem:[#allocation135_spill] sm:$0xff] %v6207_v6  ;;  %v6211_v63 = vpop.f32.mrf.mxu3 }
 0x7d1   : > { %7780 = vst [vmem:[#allocation136_spill] sm:$0xff] %v6209_v15  ;;  %v6213_v48 = vpop.f32.mrf.mxu0 }
 0x7d2   : > { %7781 = vst [vmem:[#allocation137_spill] sm:$0xff] %v6211_v63  ;;  %2407 = vmatmul.f32.gmra.mxu1 %v5762_v28  ;;  %v1877_v63 = vld [vmem:[#allocation2 + $0x778] sm:$0xff] }
 0x7d3   : > { %7782 = vst [vmem:[#allocation138_spill] sm:$0xff] %v6213_v48  ;;  %2870 = vmatpush.msra.mxu1 %v1877_v63 }
 0x7d4   : > { %2702 = vmatmul.f32.gmra.mxu2 %v5674_v47  ;;  %2767 = vmatmul.f32.gmra.mxu0 %v5674_v47 }
 0x7d5   : > { %2832 = vmatmul.f32.gmra.mxu3 %v5674_v47 }
 0x7d7   : > { %v6219_v36 = vpop.f32.mrf.mxu2  ;;  %v6221_v4 = vpop.f32.mrf.mxu1 }
 0x7d8   : > { %7783 = vst [vmem:[#allocation139_spill] sm:$0xff] %v6219_v36  ;;  %v6223_v6 = vpop.f32.mrf.mxu3 }
 0x7d9   : > { %7784 = vst [vmem:[#allocation140_spill] sm:$0xff] %v6221_v4  ;;  %v6225_v15 = vpop.f32.mrf.mxu0 }
 0x7da   : > { %7785 = vst [vmem:[#allocation141_spill] sm:$0xff] %v6223_v6  ;;  %2410 = vmatmul.f32.gmra.mxu1 %v5774_v37  ;;  %v1861_v6 = vld [vmem:[#allocation2 + $0x6f8] sm:$0xff] }
 0x7db   : > { %7786 = vst [vmem:[#allocation142_spill] sm:$0xff] %v6225_v15  ;;  %2871 = vmatpush.msra.mxu1 %v1861_v6 }
 0x7dc   : > { %2705 = vmatmul.f32.gmra.mxu2 %v5681_v52  ;;  %2770 = vmatmul.f32.gmra.mxu0 %v5681_v52 }
 0x7dd   : > { %2835 = vmatmul.f32.gmra.mxu3 %v5681_v52 }
 0x7df   : > { %v6231_v62 = vpop.f32.mrf.mxu2  ;;  %v6233_v48 = vpop.f32.mrf.mxu1 }
 0x7e0   : > { %7787 = vst [vmem:[#allocation143_spill] sm:$0xff] %v6231_v62  ;;  %v6235_v36 = vpop.f32.mrf.mxu3 }
 0x7e1   : > { %7788 = vst [vmem:[#allocation144_spill] sm:$0xff] %v6233_v48  ;;  %v6237_v4 = vpop.f32.mrf.mxu0 }
 0x7e2   : > { %7789 = vst [vmem:[#allocation145_spill] sm:$0xff] %v6235_v36  ;;  %2625 = vmatmul.f32.vlgmr.msrb.gmra.mxu1 %v5644_v17  ;;  %v1845_v36 = vld [vmem:[#allocation2 + $0x678] sm:$0xff] }
 0x7e3   : > { %7790 = vst [vmem:[#allocation146_spill] sm:$0xff] %v6237_v4  ;;  %2872 = vmatpush.msra.mxu1 %v1845_v36  ;;  %v3205_v36 = vld [vmem:[#allocation5 + $0x78] sm:$0xff] }
 0x7e4   : > { %2708 = vmatmul.f32.gmra.mxu2 %v5688_v57  ;;  %2773 = vmatmul.f32.gmra.mxu0 %v5688_v57 }
 0x7e5   : > { %2838 = vmatmul.f32.gmra.mxu3 %v5688_v57  ;;  %3446 = vmatpush.msrb.mxu2 %v3205_v36  ;;  %v3218_v36 = vld [vmem:[#allocation5 + $0xe0] sm:$0xff] }
 0x7e7   : > { %v6243_v63 = vpop.f32.mrf.mxu2  ;;  %v6245_v15 = vpop.f32.mrf.mxu1 }
 0x7e8   : > { %7791 = vst [vmem:[#allocation147_spill] sm:$0xff] %v6243_v63  ;;  %v6247_v62 = vpop.f32.mrf.mxu3 }
 0x7e9   : > { %7792 = vst [vmem:[#allocation148_spill] sm:$0xff] %v6245_v15  ;;  %v6249_v48 = vpop.f32.mrf.mxu0 }
 0x7ea   : > { %7793 = vst [vmem:[#allocation149_spill] sm:$0xff] %v6247_v62  ;;  %2628 = vmatmul.f32.gmra.mxu1 %v5651_v30  ;;  %v1829_v62 = vld [vmem:[#allocation2 + $0x5f8] sm:$0xff] }
 0x7eb   : > { %7794 = vst [vmem:[#allocation150_spill] sm:$0xff] %v6249_v48  ;;  %2873 = vmatpush.msra.mxu1 %v1829_v62  ;;  %v3221_v48 = vld [vmem:[#allocation5 + $0xf8] sm:$0xff] }
 0x7ec   : > { %2711 = vmatmul.f32.gmra.mxu2 %v5697_v5  ;;  %2776 = vmatmul.f32.gmra.mxu0 %v5697_v5 }
 0x7ed   : > { %2841 = vmatmul.f32.gmra.mxu3 %v5697_v5  ;;  %3511 = vmatpush.msra.mxu0 %v3221_v48  ;;  %v3202_v48 = vld [vmem:[#allocation5 + $0x60] sm:$0xff] }
 0x7ee   : > { %2874 = vmatpush.msra.mxu1 %v1813_v46 }
 0x7ef   : > { %v6255_v6 = vpop.f32.mrf.mxu2  ;;  %v6257_v4 = vpop.f32.mrf.mxu1 }
 0x7f0   : > { %7795 = vst [vmem:[#allocation151_spill] sm:$0xff] %v6255_v6  ;;  %v6259_v63 = vpop.f32.mrf.mxu3  ;;  %v3236_v6 = vld [vmem:[#allocation5 + $0x170] sm:$0xff] }
 0x7f1   : > { %7796 = vst [vmem:[#allocation152_spill] sm:$0xff] %v6257_v4  ;;  %v6261_v15 = vpop.f32.mrf.mxu0  ;;  %3577 = vmatpush.msra.mxu3 %v3236_v6  ;;  %v3217_v6 = vld [vmem:[#allocation5 + $0xd8] sm:$0xff] }
 0x7f2   : > { %7797 = vst [vmem:[#allocation153_spill] sm:$0xff] %v6259_v63  ;;  %2631 = vmatmul.f32.gmra.mxu1 %v5660_v38  ;;  %v3204_v63 = vld [vmem:[#allocation5 + $0x70] sm:$0xff] }
 0x7f3   : > { %7798 = vst [vmem:[#allocation154_spill] sm:$0xff] %v6261_v15  ;;  %v3220_v15 = vld [vmem:[#allocation5 + $0xf0] sm:$0xff]  ;;  %3447 = vmatpush.msrb.mxu2 %v3204_v63  ;;  %v3201_v63 = vld [vmem:[#allocation5 + $0x58] sm:$0xff]  ;;  %3578 = vmatpush.msra.mxu3 %v3235_v20  ;;  %v3199_v20 = vld [vmem:[#allocation5 + $0x48] sm:$0xff] }
 0x7f4   : > { %2714 = vmatmul.f32.gmra.mxu2 %v5704_v12  ;;  %2779 = vmatmul.f32.gmra.mxu0 %v5704_v12 }
 0x7f5   : > { %2844 = vmatmul.f32.gmra.mxu3 %v5704_v12  ;;  %3512 = vmatpush.msra.mxu0 %v3220_v15  ;;  %v3234_v15 = vld [vmem:[#allocation5 + $0x160] sm:$0xff] }
 0x7f6   : > { %3448 = vmatpush.msrb.mxu2 %v3203_v24  ;;  %v3233_v24 = vld [vmem:[#allocation5 + $0x158] sm:$0xff]  ;;  %3579 = vmatpush.msra.mxu3 %v3234_v15  ;;  %v3231_v15 = vld [vmem:[#allocation5 + $0x148] sm:$0xff] }
 0x7f7   : > { %v6267_v4 = vpop.f32.mrf.mxu2  ;;  %v6269_v62 = vpop.f32.mrf.mxu1  ;;  %3513 = vmatpush.msra.mxu0 %v3219_v1  ;;  %v3200_v1 = vld [vmem:[#allocation5 + $0x50] sm:$0xff] }
 0x7f8   : > { %7799 = vst [vmem:[#allocation155_spill] sm:$0xff] %v6267_v4  ;;  %v6271_v54 = vpop.f32.mrf.mxu3  ;;  %3449 = vmatpush.msrb.mxu2 %v3202_v48  ;;  %v1797_v48 = vld [vmem:[#allocation2 + $0x4f8] sm:$0xff]  ;;  %3580 = vmatpush.msra.mxu3 %v3233_v24 }
 0x7f9   : > { %7800 = vst [vmem:[#allocation156_spill] sm:$0xff] %v6269_v62  ;;  %v6273_v31 = vpop.f32.mrf.mxu0  ;;  %3514 = vmatpush.msra.mxu0 %v3218_v36  ;;  %2875 = vmatpush.msra.mxu1 %v1797_v48  ;;  %v3232_v36 = vld [vmem:[#allocation5 + $0x150] sm:$0xff]  ;;  %v3197_v24 = vld [vmem:[#allocation5 + $0x38] sm:$0xff]  ;;  %v3230_v48 = vld [vmem:[#allocation5 + $0x140] sm:$0xff] }
 0x7fa   : > { %7801 = vst [vmem:[#allocation157_spill] sm:$0xff] %v6271_v54  ;;  %2634 = vmatmul.f32.gmra.mxu1 %v5667_v42  ;;  %3450 = vmatpush.msrb.mxu2 %v3201_v63  ;;  %v3216_v54 = vld [vmem:[#allocation5 + $0xd0] sm:$0xff]  ;;  %v3215_v63 = vld [vmem:[#allocation5 + $0xc8] sm:$0xff] }
 0x7fb   : > { %7802 = vst [vmem:[#allocation158_spill] sm:$0xff] %v6273_v31  ;;  %3515 = vmatpush.msra.mxu0 %v3217_v6  ;;  %v3214_v6 = vld [vmem:[#allocation5 + $0xc0] sm:$0xff]  ;;  %3581 = vmatpush.msra.mxu3 %v3232_v36  ;;  %v3229_v36 = vld [vmem:[#allocation5 + $0x138] sm:$0xff] }
 0x7fc   : > { %2717 = vmatmul.f32.gmra.mxu2 %v5713_v40  ;;  %2782 = vmatmul.f32.gmra.mxu0 %v5713_v40 }
 0x7fd   : > { %2847 = vmatmul.f32.gmra.mxu3 %v5713_v40  ;;  %3451 = vmatpush.msrb.mxu2 %v3200_v1 }
 0x7fe   : > { %3516 = vmatpush.msra.mxu0 %v3216_v54  ;;  %v3213_v54 = vld [vmem:[#allocation5 + $0xb8] sm:$0xff]  ;;  %3582 = vmatpush.msra.mxu3 %v3231_v15  ;;  %v3228_v15 = vld [vmem:[#allocation5 + $0x130] sm:$0xff] }
 0x7ff   : > { %v6279_v46 = vpop.f32.mrf.mxu2  ;;  %v6281_v31 = vpop.f32.mrf.mxu1  ;;  %3452 = vmatpush.msrb.mxu2 %v3199_v20  ;;  %v1781_v20 = vld [vmem:[#allocation2 + $0x478] sm:$0xff] }
 0x800   : > { %7803 = vst [vmem:[#allocation159_spill] sm:$0xff] %v6279_v46  ;;  %v6283_v62 = vpop.f32.mrf.mxu3  ;;  %3517 = vmatpush.msra.mxu0 %v3215_v63  ;;  %v3196_v46 = vld [vmem:[#allocation5 + $0x30] sm:$0xff]  ;;  %3583 = vmatpush.msra.mxu3 %v3230_v48  ;;  %v3195_v63 = vld [vmem:[#allocation5 + $0x28] sm:$0xff] }
 0x801   : > { %7804 = vst [vmem:[#allocation160_spill] sm:$0xff] %v6281_v31  ;;  %v6285_v4 = vpop.f32.mrf.mxu0  ;;  %v3198_v31 = vld [vmem:[#allocation5 + $0x40] sm:$0xff]  ;;  %2876 = vmatpush.msra.mxu1 %v1781_v20  ;;  %v3209_v20 = vld [vmem:[#allocation5 + $0x98] sm:$0xff] }
 0x802   : > { %7805 = vst [vmem:[#allocation161_spill] sm:$0xff] %v6283_v62  ;;  %2637 = vmatmul.f32.gmra.mxu1 %v5674_v47  ;;  %3453 = vmatpush.msrb.mxu2 %v3198_v31  ;;  %v3212_v31 = vld [vmem:[#allocation5 + $0xb0] sm:$0xff] }
 0x803   : > { %7806 = vst [vmem:[#allocation162_spill] sm:$0xff] %v6285_v4  ;;  %3518 = vmatpush.msra.mxu0 %v3214_v6  ;;  %v3211_v6 = vld [vmem:[#allocation5 + $0xa8] sm:$0xff]  ;;  %3584 = vmatpush.msra.mxu3 %v3229_v36  ;;  %v3226_v36 = vld [vmem:[#allocation5 + $0x120] sm:$0xff] }
 0x804   : > { %2720 = vmatmul.f32.gmra.mxu2 %v5722_v61  ;;  %2785 = vmatmul.f32.gmra.mxu0 %v5722_v61 }
 0x805   : > { %2850 = vmatmul.f32.gmra.mxu3 %v5722_v61  ;;  %3454 = vmatpush.msrb.mxu2 %v3197_v24  ;;  %v3194_v24 = vld [vmem:[#allocation5 + $0x20] sm:$0xff] }
 0x806   : > { %3519 = vmatpush.msra.mxu0 %v3213_v54  ;;  %v3227_v54 = vld [vmem:[#allocation5 + $0x128] sm:$0xff]  ;;  %3585 = vmatpush.msra.mxu3 %v3228_v15  ;;  %v3225_v15 = vld [vmem:[#allocation5 + $0x118] sm:$0xff] }
 0x807   : > { %v6291_v1 = vpop.f32.mrf.mxu2  ;;  %v6293_v4 = vpop.f32.mrf.mxu1  ;;  %3455 = vmatpush.msrb.mxu2 %v3196_v46 }
 0x808   : > { %7807 = vst [vmem:[#allocation163_spill] sm:$0xff] %v6291_v1  ;;  %v6295_v62 = vpop.f32.mrf.mxu3  ;;  %3520 = vmatpush.msra.mxu0 %v3212_v31  ;;  %3586 = vmatpush.msra.mxu3 %v3227_v54  ;;  %v1765_v31 = vld [vmem:[#allocation2 + $0x3f8] sm:$0xff] }
 0x809   : > { %7808 = vst [vmem:[#allocation164_spill] sm:$0xff] %v6293_v4  ;;  %v6297_v25 = vpop.f32.mrf.mxu0  ;;  %3456 = vmatpush.msrb.mxu2 %v3195_v63  ;;  %v3192_v63 = vld [vmem:[#allocation5 + $0x10] sm:$0xff]  ;;  %2877 = vmatpush.msra.mxu1 %v1765_v31  ;;  %v3223_v31 = vld [vmem:[#allocation5 + $0x108] sm:$0xff] }
 0x80a   : > { %7809 = vst [vmem:[#allocation165_spill] sm:$0xff] %v6295_v62  ;;  %2640 = vmatmul.f32.gmra.mxu1 %v5681_v52  ;;  %3521 = vmatpush.msra.mxu0 %v3211_v6  ;;  %v3193_v62 = vld [vmem:[#allocation5 + $0x18] sm:$0xff]  ;;  %v3191_v6 = vld [vmem:[#allocation5 + $0x8] sm:$0xff] }
 0x80b   : > { %7810 = vst [vmem:[#allocation166_spill] sm:$0xff] %v6297_v25  ;;  %v3210_v25 = vld [vmem:[#allocation5 + $0xa0] sm:$0xff]  ;;  %3457 = vmatpush.msrb.mxu2 %v3194_v24  ;;  %3587 = vmatpush.msra.mxu3 %v3226_v36 }
 0x80c   : > { %2723 = vmatmul.f32.gmra.mxu2 %v5731_v29  ;;  %2788 = vmatmul.f32.gmra.mxu0 %v5731_v29  ;;  %v3206_v36 = vld [vmem:[#allocation5 + $0x80] sm:$0xff] }
 0x80d   : > { %2853 = vmatmul.f32.gmra.mxu3 %v5731_v29  ;;  %3522 = vmatpush.msra.mxu0 %v3210_v25  ;;  %v3207_v25 = vld [vmem:[#allocation5 + $0x88] sm:$0xff] }
 0x80e   : > { %3458 = vmatpush.msrb.mxu2 %v3193_v62  ;;  %v3224_v62 = vld [vmem:[#allocation5 + $0x110] sm:$0xff]  ;;  %3588 = vmatpush.msra.mxu3 %v3225_v15 }
 0x80f   : > { %v6303_v48 = vpop.f32.mrf.mxu2  ;;  %v6305_v46 = vpop.f32.mrf.mxu1  ;;  %3523 = vmatpush.msra.mxu0 %v3209_v20  ;;  %v1749_v20 = vld [vmem:[#allocation2 + $0x378] sm:$0xff] }
 0x810   : > { %7811 = vst [vmem:[#allocation167_spill] sm:$0xff] %v6303_v48  ;;  %v6307_v4 = vpop.f32.mrf.mxu3  ;;  %3459 = vmatpush.msrb.mxu2 %v3192_v63  ;;  %3589 = vmatpush.msra.mxu3 %v3224_v62  ;;  %v1733_v62 = vld [vmem:[#allocation2 + $0x2f8] sm:$0xff] }
 0x811   : > { %7812 = vst [vmem:[#allocation168_spill] sm:$0xff] %v6305_v46  ;;  %v6309_v1 = vpop.f32.mrf.mxu0  ;;  %v3208_v46 = vld [vmem:[#allocation5 + $0x90] sm:$0xff]  ;;  %2878 = vmatpush.msra.mxu1 %v1749_v20  ;;  %v1360_v20 = vpop.permute.xlu2 %1359 }
 0x812   : > { %7813 = vst [vmem:[#allocation169_spill] sm:$0xff] %v6307_v4  ;;  %2643 = vmatmul.f32.gmra.mxu1 %v5688_v57  ;;  %3524 = vmatpush.msra.mxu0 %v3208_v46  ;;  %v3190_v4 = vld [vmem:[#allocation5] sm:$0xff] }
 0x813   : > { %7814 = vst [vmem:[#allocation170_spill] sm:$0xff] %v6309_v1  ;;  %3460 = vmatpush.msrb.mxu2 %v3191_v6  ;;  %v3222_v46 = vld [vmem:[#allocation5 + $0x100] sm:$0xff]  ;;  %3590 = vmatpush.msra.mxu3 %v3223_v31 }
 0x814   : > { %2726 = vmatmul.f32.gmra.mxu2 %v5742_v13  ;;  %2791 = vmatmul.f32.gmra.mxu0 %v5742_v13 }
 0x815   : > { %2856 = vmatmul.f32.gmra.mxu3 %v5742_v13  ;;  %3525 = vmatpush.msra.mxu0 %v3207_v25 }
 0x816   : > { %3461 = vmatpush.msrb.mxu2 %v3190_v4  ;;  %3591 = vmatpush.msra.mxu3 %v3222_v46  ;;  %v1600_v4 = vld [vmem:[%s7611_s12] sm:$0x3] }
 0x817   : > { %v6315_v24 = vpop.f32.mrf.mxu2  ;;  %v6317_v54 = vpop.f32.mrf.mxu1  ;;  %3526 = vmatpush.msra.mxu0 %v3206_v36  ;;  %2879 = vmatpush.msra.mxu1 %v1733_v62 }
 0x818   : > { %7815 = vst [vmem:[#allocation171_spill] sm:$0xff] %v6317_v54  ;;  %v6319_v1 = vpop.f32.mrf.mxu3 }
 0x819   : > { %v6321_v48 = vpop.f32.mrf.mxu0 }
 0x81a   : > { %7816 = vst [vmem:[#allocation172_spill] sm:$0xff] %v6321_v48  ;;  %2646 = vmatmul.f32.gmra.mxu1 %v5697_v5  ;;  %v6355_v48 = vperm.slane %v1600_v4, 0 }
 0x81c   : > { %2729 = vmatmul.f32.gmra.mxu2 %v5752_v16  ;;  %2794 = vmatmul.f32.gmra.mxu0 %v5752_v16 }
 0x81d   : > { %2859 = vmatmul.f32.gmra.mxu3 %v5752_v16 }
 0x81f   : > { %v6327_v63 = vpop.f32.mrf.mxu2  ;;  %v6329_v15 = vpop.f32.mrf.mxu1 }
 0x820   : > { %7817 = vst [vmem:[#allocation173_spill] sm:$0xff] %v6327_v63  ;;  %v6331_v6 = vpop.f32.mrf.mxu3  ;;  %v1553_v63 = vadd.f32 %v5849_v10, %v1360_v20 }
 0x821   : > { %7818 = vst [vmem:[#allocation174_spill] sm:$0xff] %v6329_v15  ;;  %v6333_v25 = vpop.f32.mrf.mxu0  ;;  %v6350_v15 = vperm.slane %v1600_v4, 1 }
 0x822   : > { %7819 = vst [vmem:[#allocation175_spill] sm:$0xff] %v6331_v6  ;;  %2649 = vmatmul.f32.gmra.mxu1 %v5704_v12  ;;  %v1488_v6 = vadd.f32 %v5738_v2, %v1360_v20  ;;  %v1364_v2 = vpop.permute.xlu0 %1363  ;;  %v1701_v20 = vld [vmem:[#allocation2 + $0x1f8] sm:$0xff] }
 0x823   : > { %7820 = vst [vmem:[#allocation176_spill] sm:$0xff] %v6333_v25  ;;  %v1717_v25 = vld [vmem:[#allocation2 + $0x278] sm:$0xff]  ;;  %v1556_v54 = vadd.f32 %v5861_v26, %v1364_v2  ;;  %v1368_v26 = vpop.permute.xlu1 %1367 }
 0x824   : > { %2732 = vmatmul.f32.gmra.mxu2 %v5762_v28  ;;  %2797 = vmatmul.f32.gmra.mxu0 %v5762_v28 }
 0x825   : > { %2862 = vmatmul.f32.gmra.mxu3 %v5762_v28  ;;  %2880 = vmatpush.msra.mxu1 %v1717_v25 }
 0x827   : > { %v6342_v36 = vpop.f32.mrf.mxu2  ;;  %v6344_v31 = vpop.f32.mrf.mxu1  ;;  %2881 = vmatpush.msra.mxu1 %v1701_v20 }
 0x828   : > { %7821 = vst [vmem:[#allocation177_spill] sm:$0xff] %v6342_v36  ;;  %v6346_v46 = vpop.f32.mrf.mxu3  ;;  %v1491_v36 = vadd.f32 %v5749_v23, %v1364_v2  ;;  %v6387_v23 = vadd.f32 %v6350_v15, %v1556_v54 }
 0x829   : > { %7822 = vst [vmem:[#allocation178_spill] sm:$0xff] %v6344_v31  ;;  %v6348_v62 = vpop.f32.mrf.mxu0  ;;  %v6364_v31 = vadd.f32 %v6350_v15, %v1553_v63 }
 0x82a   : > { %7823 = vst [vmem:[#allocation179_spill] sm:$0xff] %v6346_v46  ;;  %2652 = vmatmul.f32.gmra.mxu1 %v5713_v40  ;;  %v2951_v54 = vmul.f32 %v5796_v50, %v6387_v23 }
 0x82b   : > { %7824 = vst [vmem:[#allocation180_spill] sm:$0xff] %v6348_v62  ;;  %v6361_v62 = vadd.f32 %v6355_v48, %v1488_v6  ;;  %v2935_v63 = vmul.f32 %v5785_v44, %v6364_v31 }
 0x82c   : > { %2735 = vmatmul.f32.gmra.mxu2 %v5774_v37  ;;  %2800 = vmatmul.f32.gmra.mxu0 %v5774_v37 }
 0x82d   : > { %2865 = vmatmul.f32.gmra.mxu3 %v5774_v37  ;;  %7825 = vst [vmem:[#allocation181_spill] sm:$0xff] %v6361_v62  ;;  %v2934_v6 = vmul.f32 %v5792_v9, %v6361_v62 }
 0x82f   : > { %v6366_v46 = vpop.f32.mrf.mxu2  ;;  %v6368_v10 = vpop.f32.mrf.mxu1 }
 0x830   : > { %7826 = vst [vmem:[#allocation182_spill] sm:$0xff] %v6366_v46  ;;  %v6370_v25 = vpop.f32.mrf.mxu3 }
 0x831   : > { %7827 = vst [vmem:[#allocation183_spill] sm:$0xff] %v6368_v10  ;;  %v6372_v4 = vpop.f32.mrf.mxu0  ;;  %v2936_v10 = vmul.f32 %v5794_v39, %v6361_v62  ;;  %v1494_v39 = vadd.f32 %v5766_v18, %v1368_v26 }
 0x832   : > { %7828 = vst [vmem:[#allocation184_spill] sm:$0xff] %v6370_v25  ;;  %2655 = vmatmul.f32.gmra.mxu1 %v5722_v61  ;;  %v1685_v25 = vld [vmem:[#allocation2 + $0x178] sm:$0xff] }
 0x833   : > { %7829 = vst [vmem:[#allocation185_spill] sm:$0xff] %v6372_v4  ;;  %v6384_v4 = vadd.f32 %v6355_v48, %v1491_v36  ;;  %2882 = vmatpush.msra.mxu1 %v1685_v25 }
 0x834   : > { %3462 = vmatmul.f32.vlgmr.msrb.gmra.mxu2 %v2934_v6  ;;  %3527 = vmatmul.f32.vlgmr.msra.gmra.mxu0 %v2935_v63  ;;  %v6407_v63 = vadd.f32 %v6355_v48, %v1494_v39 }
 0x835   : > { %3592 = vmatmul.f32.vlgmr.msra.gmra.mxu3 %v2936_v10  ;;  %7830 = vst [vmem:[#allocation186_spill] sm:$0xff] %v6384_v4  ;;  %v1559_v10 = vadd.f32 %v5873_v45, %v1368_v26  ;;  %v2950_v36 = vmul.f32 %v5803_v11, %v6384_v4  ;;  %v2952_v6 = vmul.f32 %v5805_v51, %v6384_v4  ;;  %v1372_v45 = vpop.permute.xlu2 %1371  ;;  %v1669_v26 = vld [vmem:[#allocation2 + $0xf8] sm:$0xff] }
 0x836   : > { %7835 = vst [vmem:[#allocation191_spill] sm:$0xff] %v6407_v63  ;;  %2883 = vmatpush.msra.mxu1 %v1669_v26  ;;  %v1653_v51 = vld [vmem:[#allocation2 + $0x78] sm:$0xff]  ;;  %v1562_v39 = vadd.f32 %v5885_v55, %v1372_v45  ;;  %v1376_v55 = vpop.permute.xlu1 %1375 }
 0x837   : > { %v6389_v9 = vpop.f32.mrf.mxu2  ;;  %v6391_v2 = vpop.f32.mrf.mxu1  ;;  %v6410_v18 = vadd.f32 %v6350_v15, %v1559_v10  ;;  %v2966_v10 = vmul.f32 %v5814_v14, %v6407_v63 }
 0x838   : > { %7831 = vst [vmem:[#allocation187_spill] sm:$0xff] %v6389_v9  ;;  %v6393_v44 = vpop.f32.mrf.mxu3  ;;  %2884 = vmatpush.msra.mxu1 %v1653_v51  ;;  %v3311_v9 = vld [vmem:[#allocation5 + $0x3c8] sm:$0xff] }
 0x839   : > { %7832 = vst [vmem:[#allocation188_spill] sm:$0xff] %v6391_v2  ;;  %v6395_v20 = vpop.f32.mrf.mxu0 }
 0x83a   : > { %7833 = vst [vmem:[#allocation189_spill] sm:$0xff] %v6393_v44  ;;  %2658 = vmatmul.f32.gmra.mxu1 %v5731_v29 }
 0x83b   : > { %7834 = vst [vmem:[#allocation190_spill] sm:$0xff] %v6395_v20 }
 0x83c   : > { %3465 = vmatmul.f32.gmra.mxu2 %v2950_v36  ;;  %3530 = vmatmul.f32.gmra.mxu0 %v2951_v54  ;;  %v1497_v36 = vadd.f32 %v5781_v7, %v1372_v45  ;;  %v2967_v54 = vmul.f32 %v5807_v60, %v6410_v18  ;;  %v6433_v7 = vadd.f32 %v6350_v15, %v1562_v39 }
 0x83d   : > { %3595 = vmatmul.f32.gmra.mxu3 %v2952_v6  ;;  %v2968_v6 = vmul.f32 %v5816_v56, %v6407_v63  ;;  %v1500_v56 = vadd.f32 %v5658_v32, %v1376_v55 }
 0x83e   : > { %v6430_v26 = vadd.f32 %v6355_v48, %v1497_v36  ;;  %v2983_v39 = vmul.f32 %v5818_v58, %v6433_v7 }
 0x83f   : > { %v6412_v11 = vpop.f32.mrf.mxu2  ;;  %v6414_v50 = vpop.f32.mrf.mxu1 }
 0x840   : > { %7836 = vst [vmem:[#allocation192_spill] sm:$0xff] %v6412_v11  ;;  %v6416_v25 = vpop.f32.mrf.mxu3  ;;  %v2982_v36 = vmul.f32 %v5825_v21, %v6430_v26 }
 0x841   : > { %7837 = vst [vmem:[#allocation193_spill] sm:$0xff] %v6414_v50  ;;  %v6418_v20 = vpop.f32.mrf.mxu0 }
 0x842   : > { %7838 = vst [vmem:[#allocation194_spill] sm:$0xff] %v6416_v25  ;;  %2661 = vmatmul.f32.gmra.mxu1 %v5742_v13 }
 0x843   : > { %7839 = vst [vmem:[#allocation195_spill] sm:$0xff] %v6418_v20 }
 0x844   : > { %3468 = vmatmul.f32.gmra.mxu2 %v2966_v10  ;;  %3533 = vmatmul.f32.gmra.mxu0 %v2967_v54  ;;  %7840 = vst [vmem:[#allocation196_spill] sm:$0xff] %v6430_v26  ;;  %v1565_v10 = vadd.f32 %v5897_v33, %v1376_v55  ;;  %v2984_v54 = vmul.f32 %v5827_v59, %v6430_v26  ;;  %v1380_v33 = vpop.permute.xlu2 %1379 }
 0x845   : > { %3598 = vmatmul.f32.gmra.mxu3 %v2968_v6  ;;  %v6453_v6 = vadd.f32 %v6355_v48, %v1500_v56  ;;  %v1503_v59 = vadd.f32 %v5669_v43, %v1380_v33 }
 0x846   : > { %v6456_v32 = vadd.f32 %v6350_v15, %v1565_v10 }
 0x847   : > { %v6435_v14 = vpop.f32.mrf.mxu2  ;;  %v6437_v45 = vpop.f32.mrf.mxu1  ;;  %7845 = vst [vmem:[#allocation201_spill] sm:$0xff] %v6453_v6  ;;  %v2998_v56 = vmul.f32 %v5836_v34, %v6453_v6 }
 0x848   : > { %7841 = vst [vmem:[#allocation197_spill] sm:$0xff] %v6435_v14  ;;  %v6439_v60 = vpop.f32.mrf.mxu3  ;;  %v2999_v10 = vmul.f32 %v5829_v3, %v6456_v32 }
 0x849   : > { %7842 = vst [vmem:[#allocation198_spill] sm:$0xff] %v6437_v45  ;;  %v6441_v51 = vpop.f32.mrf.mxu0  ;;  %v3253_v45 = vld [vmem:[#allocation5 + $0x1f8] sm:$0xff] }
 0x84a   : > { %7843 = vst [vmem:[#allocation199_spill] sm:$0xff] %v6439_v60  ;;  %2664 = vmatmul.f32.gmra.mxu1 %v5752_v16  ;;  %v7898_v60 = vld [vmem:[#allocation37_spill] sm:$0xff] }
 0x84b   : > { %7844 = vst [vmem:[#allocation200_spill] sm:$0xff] %v6441_v51  ;;  %3641 = vmatpush.msrb.mxu1 %v3253_v45 }
 0x84c   : > { %3471 = vmatmul.f32.gmra.mxu2 %v2982_v36  ;;  %3536 = vmatmul.f32.gmra.mxu0 %v2983_v39  ;;  %v1568_v36 = vadd.f32 %v5909_v41, %v1380_v33  ;;  %v3000_v39 = vmul.f32 %v5838_v19, %v6453_v6  ;;  %v1384_v41 = vpop.permute.xlu0 %1383 }
 0x84d   : > { %3601 = vmatmul.f32.gmra.mxu3 %v2984_v54  ;;  %v6476_v54 = vadd.f32 %v6355_v48, %v1503_v59  ;;  %v1506_v19 = vadd.f32 %v5678_v35, %v1384_v41 }
 0x84e   : > { %v6479_v43 = vadd.f32 %v6350_v15, %v1568_v36 }
 0x84f   : > { %v6458_v55 = vpop.f32.mrf.mxu2  ;;  %v6460_v21 = vpop.f32.mrf.mxu1  ;;  %7850 = vst [vmem:[#allocation206_spill] sm:$0xff] %v6476_v54  ;;  %v3014_v59 = vmul.f32 %v5847_v49, %v6476_v54 }
 0x850   : > { %7846 = vst [vmem:[#allocation202_spill] sm:$0xff] %v6458_v55  ;;  %v6462_v58 = vpop.f32.mrf.mxu3  ;;  %v3015_v36 = vmul.f32 %v5840_v8, %v6479_v43  ;;  %v7889_v55 = vld [vmem:[#allocation34_spill] sm:$0xff] }
 0x851   : > { %7847 = vst [vmem:[#allocation203_spill] sm:$0xff] %v6460_v21  ;;  %v6464_v51 = vpop.f32.mrf.mxu0  ;;  %v7887_v21 = vld [vmem:[#allocation56_spill] sm:$0xff] }
 0x852   : > { %7848 = vst [vmem:[#allocation204_spill] sm:$0xff] %v6462_v58  ;;  %2667 = vmatmul.f32.gmra.mxu1 %v5762_v28 }
 0x853   : > { %7849 = vst [vmem:[#allocation205_spill] sm:$0xff] %v6464_v51  ;;  %v3252_v51 = vld [vmem:[#allocation5 + $0x1f0] sm:$0xff] }
 0x854   : > { %3474 = vmatmul.f32.gmra.mxu2 %v2998_v56  ;;  %3539 = vmatmul.f32.gmra.mxu0 %v2999_v10  ;;  %v1571_v56 = vadd.f32 %v5921_v0, %v1384_v41  ;;  %v3016_v10 = vmul.f32 %v5851_v22, %v6476_v54 }
 0x855   : > { %3604 = vmatmul.f32.gmra.mxu3 %v3000_v39  ;;  %3642 = vmatpush.msrb.mxu1 %v3252_v51  ;;  %v6499_v39 = vadd.f32 %v6355_v48, %v1506_v19  ;;  %v1388_v51 = vpop.permute.xlu1 %1387  ;;  %v7860_v19 = vld [vmem:[#allocation26_spill] sm:$0xff] }
 0x856   : > { %v6502_v35 = vadd.f32 %v6350_v15, %v1571_v56  ;;  %v1509_v22 = vadd.f32 %v5686_v53, %v1388_v51  ;;  %v7861_v56 = vld [vmem:[#allocation25_spill] sm:$0xff] }
 0x857   : > { %v6481_v34 = vpop.f32.mrf.mxu2  ;;  %v6483_v33 = vpop.f32.mrf.mxu1  ;;  %7855 = vst [vmem:[#allocation211_spill] sm:$0xff] %v6499_v39 }
 0x858   : > { %7851 = vst [vmem:[#allocation207_spill] sm:$0xff] %v6481_v34  ;;  %v6485_v3 = vpop.f32.mrf.mxu3 }
 0x859   : > { %7852 = vst [vmem:[#allocation208_spill] sm:$0xff] %v6483_v33  ;;  %v6487_v45 = vpop.f32.mrf.mxu0 }
 0x85a   : > { %7853 = vst [vmem:[#allocation209_spill] sm:$0xff] %v6485_v3  ;;  %2670 = vmatmul.f32.gmra.mxu1 %v5774_v37 }
 0x85b   : > { %7854 = vst [vmem:[#allocation210_spill] sm:$0xff] %v6487_v45  ;;  %v3251_v45 = vld [vmem:[#allocation5 + $0x1e8] sm:$0xff] }
 0x85c   : > { %3477 = vmatmul.f32.gmra.mxu2 %v3014_v59  ;;  %3542 = vmatmul.f32.gmra.mxu0 %v3015_v36  ;;  %v1574_v59 = vadd.f32 %v5933_v27, %v1388_v51  ;;  %v3030_v36 = vmul.f32 %v7860_v19, %v6499_v39 }
 0x85d   : > { %3607 = vmatmul.f32.gmra.mxu3 %v3016_v10  ;;  %v3031_v10 = vmul.f32 %v7861_v56, %v6502_v35  ;;  %3643 = vmatpush.msrb.mxu1 %v3251_v45  ;;  %v1392_v45 = vpop.permute.xlu2 %1391  ;;  %v3250_v56 = vld [vmem:[#allocation5 + $0x1e0] sm:$0xff] }
 0x85e   : > { %v6525_v53 = vadd.f32 %v6350_v15, %v1574_v59  ;;  %v7870_v59 = vld [vmem:[#allocation28_spill] sm:$0xff] }
 0x85f   : > { %v6504_v0 = vpop.f32.mrf.mxu2  ;;  %v6506_v49 = vpop.f32.mrf.mxu1  ;;  %3644 = vmatpush.msrb.mxu1 %v3250_v56 }
 0x860   : > { %7856 = vst [vmem:[#allocation212_spill] sm:$0xff] %v6504_v0  ;;  %v6508_v8 = vpop.f32.mrf.mxu3  ;;  %v3047_v33 = vmul.f32 %v7870_v59, %v6525_v53  ;;  %v1396_v56 = vpop.permute.xlu0 %1395  ;;  %v3249_v59 = vld [vmem:[#allocation5 + $0x1d8] sm:$0xff] }
 0x861   : > { %7857 = vst [vmem:[#allocation213_spill] sm:$0xff] %v6506_v49  ;;  %v6510_v41 = vpop.f32.mrf.mxu0  ;;  %v7862_v49 = vld [vmem:[#allocation27_spill] sm:$0xff]  ;;  %3645 = vmatpush.msrb.mxu1 %v3249_v59  ;;  %v1400_v59 = vpop.permute.xlu1 %1399 }
 0x862   : > { %7858 = vst [vmem:[#allocation214_spill] sm:$0xff] %v6508_v8  ;;  %2885 = vmatmul.f32.vlgmr.msra.gmra.mxu1 %v5644_v17  ;;  %v3032_v8 = vmul.f32 %v7862_v49, %v6499_v39  ;;  %v7867_v49 = vld [vmem:[#allocation17_spill] sm:$0xff] }
 0x863   : > { %7859 = vst [vmem:[#allocation215_spill] sm:$0xff] %v6510_v41  ;;  %v6522_v41 = vadd.f32 %v6355_v48, %v1509_v22  ;;  %v7869_v22 = vld [vmem:[#allocation29_spill] sm:$0xff] }
 0x864   : > { %3480 = vmatmul.f32.gmra.mxu2 %v3030_v36  ;;  %3545 = vmatmul.f32.gmra.mxu0 %v3031_v10  ;;  %v1512_v36 = vadd.f32 %v7867_v49, %v1392_v45  ;;  %v7868_v10 = vld [vmem:[#allocation48_spill] sm:$0xff] }
 0x865   : > { %3610 = vmatmul.f32.gmra.mxu3 %v3032_v8  ;;  %v1577_v8 = vadd.f32 %v7868_v10, %v1392_v45  ;;  %v3046_v0 = vmul.f32 %v7869_v22, %v6522_v41 }
 0x867   : > { %v6527_v27 = vpop.f32.mrf.mxu2  ;;  %v6529_v51 = vpop.f32.mrf.mxu1  ;;  %v6548_v45 = vadd.f32 %v6350_v15, %v1577_v8  ;;  %v7880_v8 = vld [vmem:[#allocation31_spill] sm:$0xff] }
 0x868   : > { %7863 = vst [vmem:[#allocation26_spill] sm:$0xff] %v6527_v27  ;;  %v6531_v19 = vpop.f32.mrf.mxu3 }
 0x869   : > { %7864 = vst [vmem:[#allocation25_spill] sm:$0xff] %v6529_v51  ;;  %v6533_v17 = vpop.f32.mrf.mxu0  ;;  %v7871_v51 = vld [vmem:[#allocation30_spill] sm:$0xff]  ;;  %v3063_v3 = vmul.f32 %v7880_v8, %v6548_v45 }
 0x86a   : > { %7865 = vst [vmem:[#allocation27_spill] sm:$0xff] %v6531_v19  ;;  %2888 = vmatmul.f32.gmra.mxu1 %v5651_v30  ;;  %v3048_v19 = vmul.f32 %v7871_v51, %v6522_v41  ;;  %v7877_v51 = vld [vmem:[#allocation18_spill] sm:$0xff] }
 0x86b   : > { %7866 = vst [vmem:[#allocation216_spill] sm:$0xff] %v6533_v17  ;;  %v6545_v17 = vadd.f32 %v6355_v48, %v1512_v36  ;;  %v7879_v36 = vld [vmem:[#allocation32_spill] sm:$0xff] }
 0x86c   : > { %3483 = vmatmul.f32.gmra.mxu2 %v3046_v0  ;;  %3548 = vmatmul.f32.gmra.mxu0 %v3047_v33  ;;  %v1515_v0 = vadd.f32 %v7877_v51, %v1396_v56  ;;  %v7878_v33 = vld [vmem:[#allocation52_spill] sm:$0xff] }
 0x86d   : > { %3613 = vmatmul.f32.gmra.mxu3 %v3048_v19  ;;  %7872 = vst [vmem:[#allocation17_spill] sm:$0xff] %v6545_v17  ;;  %v1580_v19 = vadd.f32 %v7878_v33, %v1396_v56  ;;  %v3062_v27 = vmul.f32 %v7879_v36, %v6545_v17  ;;  %v3301_v51 = vld [vmem:[#allocation5 + $0x378] sm:$0xff] }
 0x86e   : > { %v6568_v56 = vadd.f32 %v6355_v48, %v1515_v0  ;;  %3836 = vmatpush.msrb.mxu3 %v3301_v51  ;;  %v7885_v0 = vld [vmem:[#allocation19_spill] sm:$0xff] }
 0x86f   : > { %v6550_v49 = vpop.f32.mrf.mxu2  ;;  %v6552_v10 = vpop.f32.mrf.mxu1  ;;  %v6571_v33 = vadd.f32 %v6350_v15, %v1580_v19  ;;  %v1518_v8 = vadd.f32 %v7885_v0, %v1400_v59  ;;  %v3248_v19 = vld [vmem:[#allocation5 + $0x1d0] sm:$0xff]  ;;  %v3299_v0 = vld [vmem:[#allocation5 + $0x368] sm:$0xff] }
 0x870   : > { %7873 = vst [vmem:[#allocation48_spill] sm:$0xff] %v6550_v49  ;;  %v6554_v22 = vpop.f32.mrf.mxu3  ;;  %v3285_v49 = vld [vmem:[#allocation5 + $0x2f8] sm:$0xff]  ;;  %v7888_v51 = vld [vmem:[#allocation35_spill] sm:$0xff]  ;;  %3646 = vmatpush.msrb.mxu1 %v3248_v19 }
 0x871   : > { %7874 = vst [vmem:[#allocation29_spill] sm:$0xff] %v6552_v10  ;;  %v6556_v30 = vpop.f32.mrf.mxu0  ;;  %v7881_v10 = vld [vmem:[#allocation33_spill] sm:$0xff]  ;;  %3771 = vmatpush.msrb.mxu0 %v3285_v49  ;;  %v3267_v49 = vld [vmem:[#allocation5 + $0x268] sm:$0xff]  ;;  %v3078_v58 = vmul.f32 %v7888_v51, %v6568_v56  ;;  %v3281_v51 = vld [vmem:[#allocation5 + $0x2d8] sm:$0xff] }
 0x872   : > { %7875 = vst [vmem:[#allocation28_spill] sm:$0xff] %v6554_v22  ;;  %2891 = vmatmul.f32.gmra.mxu1 %v5660_v38  ;;  %v3064_v22 = vmul.f32 %v7881_v10, %v6545_v17  ;;  %v3268_v38 = vld [vmem:[#allocation5 + $0x270] sm:$0xff] }
 0x873   : > { %7876 = vst [vmem:[#allocation30_spill] sm:$0xff] %v6556_v30  ;;  %v3269_v30 = vld [vmem:[#allocation5 + $0x278] sm:$0xff]  ;;  %v3284_v10 = vld [vmem:[#allocation5 + $0x2f0] sm:$0xff] }
 0x874   : > { %3486 = vmatmul.f32.gmra.mxu2 %v3062_v27  ;;  %3551 = vmatmul.f32.gmra.mxu0 %v3063_v3  ;;  %v3300_v27 = vld [vmem:[#allocation5 + $0x370] sm:$0xff] }
 0x875   : > { %3616 = vmatmul.f32.gmra.mxu3 %v3064_v22  ;;  %3706 = vmatpush.msra.mxu2 %v3269_v30  ;;  %v3283_v30 = vld [vmem:[#allocation5 + $0x2e8] sm:$0xff] }
 0x876   : > { %3772 = vmatpush.msrb.mxu0 %v3284_v10  ;;  %3837 = vmatpush.msrb.mxu3 %v3300_v27  ;;  %v3266_v27 = vld [vmem:[#allocation5 + $0x260] sm:$0xff] }
 0x877   : > { %v6573_v36 = vpop.f32.mrf.mxu2  ;;  %v6575_v3 = vpop.f32.mrf.mxu1  ;;  %3707 = vmatpush.msra.mxu2 %v3268_v38  ;;  %v7890_v38 = vld [vmem:[#allocation36_spill] sm:$0xff] }
 0x878   : > { %7882 = vst [vmem:[#allocation18_spill] sm:$0xff] %v6573_v36  ;;  %v6577_v22 = vpop.f32.mrf.mxu3  ;;  %v1583_v36 = vadd.f32 %v7887_v21, %v1400_v59  ;;  %v3080_v10 = vmul.f32 %v7890_v38, %v6568_v56  ;;  %3773 = vmatpush.msrb.mxu0 %v3283_v30  ;;  %v3298_v21 = vld [vmem:[#allocation5 + $0x360] sm:$0xff]  ;;  %v3265_v59 = vld [vmem:[#allocation5 + $0x258] sm:$0xff]  ;;  %3838 = vmatpush.msrb.mxu3 %v3299_v0 }
 0x879   : > { %7883 = vst [vmem:[#allocation52_spill] sm:$0xff] %v6575_v3  ;;  %v6580_v34 = vpop.f32.mrf.mxu0  ;;  %v3079_v3 = vmul.f32 %v7889_v55, %v6571_v33  ;;  %3708 = vmatpush.msra.mxu2 %v3267_v49  ;;  %v6591_v55 = vadd.f32 %v6355_v48, %v1518_v8  ;;  %v3297_v30 = vld [vmem:[#allocation5 + $0x358] sm:$0xff] }
 0x87a   : > { %7884 = vst [vmem:[#allocation32_spill] sm:$0xff] %v6577_v22  ;;  %2894 = vmatmul.f32.gmra.mxu1 %v5667_v42  ;;  %v6594_v19 = vadd.f32 %v6350_v15, %v1583_v36  ;;  %v1404_v42 = vpop.permute.xlu2 %1403  ;;  %3839 = vmatpush.msrb.mxu3 %v3298_v21  ;;  %v7894_v8 = vld [vmem:[#allocation20_spill] sm:$0xff]  ;;  %v3247_v36 = vld [vmem:[#allocation5 + $0x1c8] sm:$0xff]  ;;  %v7899_v21 = vld [vmem:[#allocation39_spill] sm:$0xff] }
 0x87b   : > { %7886 = vst [vmem:[#allocation31_spill] sm:$0xff] %v6580_v34  ;;  %v3282_v34 = vld [vmem:[#allocation5 + $0x2e0] sm:$0xff]  ;;  %3709 = vmatpush.msra.mxu2 %v3266_v27  ;;  %v1521_v27 = vadd.f32 %v7894_v8, %v1404_v42  ;;  %3647 = vmatpush.msrb.mxu1 %v3247_v36  ;;  %v3296_v8 = vld [vmem:[#allocation5 + $0x350] sm:$0xff]  ;;  %v1408_v36 = vpop.permute.xlu0 %1407 }
 0x87c   : > { %3489 = vmatmul.f32.gmra.mxu2 %v3078_v58  ;;  %3554 = vmatmul.f32.gmra.mxu0 %v3079_v3  ;;  %v3264_v58 = vld [vmem:[#allocation5 + $0x250] sm:$0xff]  ;;  %v3095_v14 = vmul.f32 %v7898_v60, %v6594_v19 }
 0x87d   : > { %3619 = vmatmul.f32.gmra.mxu3 %v3080_v10  ;;  %3774 = vmatpush.msrb.mxu0 %v3282_v34  ;;  %v3280_v10 = vld [vmem:[#allocation5 + $0x2d0] sm:$0xff]  ;;  %v7896_v34 = vld [vmem:[#allocation60_spill] sm:$0xff]  ;;  %v6614_v60 = vadd.f32 %v6355_v48, %v1521_v27 }
 0x87e   : > { %3710 = vmatpush.msra.mxu2 %v3265_v59  ;;  %v1586_v0 = vadd.f32 %v7896_v34, %v1404_v42  ;;  %3840 = vmatpush.msrb.mxu3 %v3297_v30  ;;  %v3262_v42 = vld [vmem:[#allocation5 + $0x240] sm:$0xff]  ;;  %v3260_v27 = vld [vmem:[#allocation5 + $0x230] sm:$0xff] }
 0x87f   : > { %v6596_v49 = vpop.f32.mrf.mxu2  ;;  %v6598_v3 = vpop.f32.mrf.mxu1  ;;  %3775 = vmatpush.msrb.mxu0 %v3281_v51  ;;  %v3096_v51 = vmul.f32 %v7899_v21, %v6591_v55  ;;  %v3294_v34 = vld [vmem:[#allocation5 + $0x340] sm:$0xff] }
 0x880   : > { %7891 = vst [vmem:[#allocation33_spill] sm:$0xff] %v6596_v49  ;;  %v6600_v38 = vpop.f32.mrf.mxu3  ;;  %3711 = vmatpush.msra.mxu2 %v3264_v58  ;;  %v7897_v49 = vld [vmem:[#allocation38_spill] sm:$0xff]  ;;  %v3278_v58 = vld [vmem:[#allocation5 + $0x2c0] sm:$0xff]  ;;  %v6617_v30 = vadd.f32 %v6350_v15, %v1586_v0  ;;  %3841 = vmatpush.msrb.mxu3 %v3296_v8 }
 0x881   : > { %7892 = vst [vmem:[#allocation19_spill] sm:$0xff] %v6598_v3  ;;  %v6603_v22 = vpop.f32.mrf.mxu0  ;;  %v3094_v59 = vmul.f32 %v7897_v49, %v6591_v55  ;;  %v3263_v3 = vld [vmem:[#allocation5 + $0x248] sm:$0xff]  ;;  %3776 = vmatpush.msrb.mxu0 %v3280_v10  ;;  %v7903_v21 = vld [vmem:[#allocation21_spill] sm:$0xff] }
 0x882   : > { %7893 = vst [vmem:[#allocation56_spill] sm:$0xff] %v6600_v38  ;;  %2897 = vmatmul.f32.gmra.mxu1 %v5674_v47  ;;  %3712 = vmatpush.msra.mxu2 %v3263_v3  ;;  %v3295_v49 = vld [vmem:[#allocation5 + $0x348] sm:$0xff]  ;;  %v3261_v47 = vld [vmem:[#allocation5 + $0x238] sm:$0xff]  ;;  %v7906_v38 = vld [vmem:[#allocation41_spill] sm:$0xff] }
 0x883   : > { %7895 = vst [vmem:[#allocation35_spill] sm:$0xff] %v6603_v22  ;;  %v3279_v22 = vld [vmem:[#allocation5 + $0x2c8] sm:$0xff]  ;;  %3842 = vmatpush.msrb.mxu3 %v3295_v49 }
 0x884   : > { %3492 = vmatmul.f32.gmra.mxu2 %v3094_v59  ;;  %3557 = vmatmul.f32.gmra.mxu0 %v3095_v14  ;;  %v3277_v14 = vld [vmem:[#allocation5 + $0x2b8] sm:$0xff]  ;;  %v7908_v49 = vld [vmem:[#allocation42_spill] sm:$0xff] }
 0x885   : > { %3622 = vmatmul.f32.gmra.mxu3 %v3096_v51  ;;  %3777 = vmatpush.msrb.mxu0 %v3279_v22  ;;  %v1524_v51 = vadd.f32 %v7903_v21, %v1408_v36  ;;  %v7905_v22 = vld [vmem:[#allocation64_spill] sm:$0xff] }
 0x886   : > { %3713 = vmatpush.msra.mxu2 %v3262_v42  ;;  %v1589_v8 = vadd.f32 %v7905_v22, %v1408_v36  ;;  %v7907_v42 = vld [vmem:[#allocation40_spill] sm:$0xff]  ;;  %3843 = vmatpush.msrb.mxu3 %v3294_v34  ;;  %v3275_v36 = vld [vmem:[#allocation5 + $0x2a8] sm:$0xff]  ;;  %v1412_v22 = vpop.permute.xlu1 %1411 }
 0x887   : > { %v6619_v10 = vpop.f32.mrf.mxu2  ;;  %v6621_v59 = vpop.f32.mrf.mxu1  ;;  %3778 = vmatpush.msrb.mxu0 %v3278_v58  ;;  %v3111_v20 = vmul.f32 %v7907_v42, %v6617_v30  ;;  %v3112_v58 = vmul.f32 %v7908_v49, %v6614_v60  ;;  %v3293_v21 = vld [vmem:[#allocation5 + $0x338] sm:$0xff]  ;;  %v6637_v34 = vadd.f32 %v6355_v48, %v1524_v51  ;;  %v7912_v51 = vld [vmem:[#allocation22_spill] sm:$0xff] }
 0x888   : > { %7900 = vst [vmem:[#allocation34_spill] sm:$0xff] %v6619_v10  ;;  %v6623_v3 = vpop.f32.mrf.mxu3  ;;  %3714 = vmatpush.msra.mxu2 %v3261_v47  ;;  %v3110_v10 = vmul.f32 %v7906_v38, %v6614_v60  ;;  %v3259_v47 = vld [vmem:[#allocation5 + $0x228] sm:$0xff]  ;;  %v3292_v38 = vld [vmem:[#allocation5 + $0x330] sm:$0xff]  ;;  %3844 = vmatpush.msrb.mxu3 %v3293_v21  ;;  %v3257_v49 = vld [vmem:[#allocation5 + $0x218] sm:$0xff] }
 0x889   : > { %7901 = vst [vmem:[#allocation36_spill] sm:$0xff] %v6621_v59  ;;  %v6626_v0 = vpop.f32.mrf.mxu0  ;;  %3779 = vmatpush.msrb.mxu0 %v3277_v14  ;;  %v3246_v59 = vld [vmem:[#allocation5 + $0x1c0] sm:$0xff]  ;;  %v6640_v14 = vadd.f32 %v6350_v15, %v1589_v8  ;;  %v7914_v8 = vld [vmem:[#allocation68_spill] sm:$0xff] }
 0x88a   : > { %7902 = vst [vmem:[#allocation20_spill] sm:$0xff] %v6623_v3  ;;  %2900 = vmatmul.f32.gmra.mxu1 %v5681_v52  ;;  %3715 = vmatpush.msra.mxu2 %v3260_v27  ;;  %v3258_v52 = vld [vmem:[#allocation5 + $0x220] sm:$0xff]  ;;  %v7915_v21 = vld [vmem:[#allocation44_spill] sm:$0xff] }
 0x88b   : > { %7904 = vst [vmem:[#allocation60_spill] sm:$0xff] %v6626_v0  ;;  %v3276_v0 = vld [vmem:[#allocation5 + $0x2b0] sm:$0xff]  ;;  %3648 = vmatpush.msrb.mxu1 %v3246_v59  ;;  %3845 = vmatpush.msrb.mxu3 %v3292_v38  ;;  %v7917_v38 = vld [vmem:[#allocation45_spill] sm:$0xff] }
 0x88c   : > { %3495 = vmatmul.f32.gmra.mxu2 %v3110_v10  ;;  %3560 = vmatmul.f32.gmra.mxu0 %v3111_v20  ;;  %v3291_v10 = vld [vmem:[#allocation5 + $0x328] sm:$0xff]  ;;  %v3274_v20 = vld [vmem:[#allocation5 + $0x2a0] sm:$0xff] }
 0x88d   : > { %3625 = vmatmul.f32.gmra.mxu3 %v3112_v58  ;;  %3780 = vmatpush.msrb.mxu0 %v3276_v0  ;;  %v1527_v58 = vadd.f32 %v7912_v51, %v1412_v22  ;;  %v1592_v0 = vadd.f32 %v7914_v8, %v1412_v22  ;;  %v3290_v51 = vld [vmem:[#allocation5 + $0x320] sm:$0xff]  ;;  %v3256_v22 = vld [vmem:[#allocation5 + $0x210] sm:$0xff]  ;;  %v3289_v8 = vld [vmem:[#allocation5 + $0x318] sm:$0xff] }
 0x88e   : > { %3716 = vmatpush.msra.mxu2 %v3259_v47  ;;  %v7916_v47 = vld [vmem:[#allocation43_spill] sm:$0xff]  ;;  %3846 = vmatpush.msrb.mxu3 %v3291_v10 }
 0x88f   : > { %v6642_v42 = vpop.f32.mrf.mxu2  ;;  %v6644_v27 = vpop.f32.mrf.mxu1  ;;  %3781 = vmatpush.msrb.mxu0 %v3275_v36  ;;  %v3127_v50 = vmul.f32 %v7916_v47, %v6640_v14  ;;  %v3128_v36 = vmul.f32 %v7917_v38, %v6637_v34  ;;  %v6663_v10 = vadd.f32 %v6350_v15, %v1592_v0 }
 0x890   : > { %7909 = vst [vmem:[#allocation38_spill] sm:$0xff] %v6642_v42  ;;  %v6646_v59 = vpop.f32.mrf.mxu3  ;;  %3717 = vmatpush.msra.mxu2 %v3258_v52  ;;  %v3126_v42 = vmul.f32 %v7915_v21, %v6637_v34  ;;  %v3272_v52 = vld [vmem:[#allocation5 + $0x290] sm:$0xff]  ;;  %v6660_v21 = vadd.f32 %v6355_v48, %v1527_v58  ;;  %3847 = vmatpush.msrb.mxu3 %v3290_v51  ;;  %v1416_v47 = vpop.permute.xlu2 %1415  ;;  %v3254_v58 = vld [vmem:[#allocation5 + $0x200] sm:$0xff] }
 0x891   : > { %7910 = vst [vmem:[#allocation37_spill] sm:$0xff] %v6644_v27  ;;  %v6649_v3 = vpop.f32.mrf.mxu0  ;;  %3782 = vmatpush.msrb.mxu0 %v3274_v20  ;;  %v3273_v27 = vld [vmem:[#allocation5 + $0x298] sm:$0xff]  ;;  %v3271_v20 = vld [vmem:[#allocation5 + $0x288] sm:$0xff] }
 0x892   : > { %7911 = vst [vmem:[#allocation39_spill] sm:$0xff] %v6646_v59  ;;  %2903 = vmatmul.f32.gmra.mxu1 %v5688_v57  ;;  %3718 = vmatpush.msra.mxu2 %v3257_v49  ;;  %v3255_v57 = vld [vmem:[#allocation5 + $0x208] sm:$0xff]  ;;  %v7924_v59 = vld [vmem:[#allocation72_spill] sm:$0xff] }
 0x893   : > { %7913 = vst [vmem:[#allocation21_spill] sm:$0xff] %v6649_v3  ;;  %v3245_v3 = vld [vmem:[#allocation5 + $0x1b8] sm:$0xff]  ;;  %3783 = vmatpush.msrb.mxu0 %v3273_v27  ;;  %3848 = vmatpush.msrb.mxu3 %v3289_v8 }
 0x894   : > { %3498 = vmatmul.f32.gmra.mxu2 %v3126_v42  ;;  %3563 = vmatmul.f32.gmra.mxu0 %v3127_v50  ;;  %v3288_v50 = vld [vmem:[#allocation5 + $0x310] sm:$0xff] }
 0x895   : > { %3628 = vmatmul.f32.gmra.mxu3 %v3128_v36  ;;  %3649 = vmatpush.msrb.mxu1 %v3245_v3  ;;  %v7922_v3 = vld [vmem:[#allocation47_spill] sm:$0xff] }
 0x896   : > { %3719 = vmatpush.msra.mxu2 %v3256_v22  ;;  %3784 = vmatpush.msrb.mxu0 %v3272_v52  ;;  %v3142_v0 = vmul.f32 %v7922_v3, %v6660_v21  ;;  %v7923_v36 = vld [vmem:[#allocation23_spill] sm:$0xff]  ;;  %v7925_v22 = vld [vmem:[#allocation46_spill] sm:$0xff] }
 0x897   : > { %v6665_v49 = vpop.f32.mrf.mxu2  ;;  %v6667_v42 = vpop.f32.mrf.mxu1  ;;  %v1530_v51 = vadd.f32 %v7923_v36, %v1416_v47  ;;  %v3143_v52 = vmul.f32 %v7925_v22, %v6663_v10  ;;  %3849 = vmatpush.msrb.mxu3 %v3288_v50  ;;  %v7934_v36 = vld [vmem:[#allocation24_spill] sm:$0xff] }
 0x898   : > { %7918 = vst [vmem:[#allocation64_spill] sm:$0xff] %v6665_v49  ;;  %v6669_v27 = vpop.f32.mrf.mxu3  ;;  %3720 = vmatpush.msra.mxu2 %v3255_v57  ;;  %3785 = vmatpush.msrb.mxu0 %v3271_v20  ;;  %v1595_v49 = vadd.f32 %v7924_v59, %v1416_v47  ;;  %v3244_v57 = vld [vmem:[#allocation5 + $0x1b0] sm:$0xff]  ;;  %v3286_v20 = vld [vmem:[#allocation5 + $0x300] sm:$0xff]  ;;  %v1420_v50 = vpop.permute.xlu0 %1419  ;;  %v7935_v22 = vld [vmem:[#allocation76_spill] sm:$0xff] }
 0x899   : > { %7919 = vst [vmem:[#allocation41_spill] sm:$0xff] %v6667_v42  ;;  %v6671_v38 = vpop.f32.mrf.mxu0  ;;  %v3270_v42 = vld [vmem:[#allocation5 + $0x280] sm:$0xff]  ;;  %v6683_v59 = vadd.f32 %v6355_v48, %v1530_v51  ;;  %3650 = vmatpush.msrb.mxu1 %v3244_v57  ;;  %v1533_v51 = vadd.f32 %v7934_v36, %v1420_v50 }
 0x89a   : > { %7920 = vst [vmem:[#allocation40_spill] sm:$0xff] %v6669_v27  ;;  %v7926_v27 = vld [vmem:[#allocation49_spill] sm:$0xff]  ;;  %2906 = vmatmul.f32.gmra.mxu1 %v5697_v5  ;;  %3721 = vmatpush.msra.mxu2 %v3254_v58  ;;  %v6686_v47 = vadd.f32 %v6350_v15, %v1595_v49  ;;  %v1598_v49 = vadd.f32 %v7935_v22, %v1420_v50 }
 0x89b   : > { %7921 = vst [vmem:[#allocation42_spill] sm:$0xff] %v6671_v38  ;;  %v3144_v8 = vmul.f32 %v7926_v27, %v6660_v21  ;;  %v3287_v38 = vld [vmem:[#allocation5 + $0x308] sm:$0xff]  ;;  %3786 = vmatpush.msrb.mxu0 %v3270_v42  ;;  %v7933_v42 = vld [vmem:[#allocation51_spill] sm:$0xff]  ;;  %v7937_v57 = vld [vmem:[#allocation53_spill] sm:$0xff] }
 0x89c   : > { %3501 = vmatmul.f32.gmra.mxu2 %v3142_v0  ;;  %3566 = vmatmul.f32.gmra.mxu0 %v3143_v52  ;;  %7927 = vst [vmem:[#allocation22_spill] sm:$0xff] %v6683_v59  ;;  %v3158_v0 = vmul.f32 %v7933_v42, %v6683_v59  ;;  %v6709_v42 = vadd.f32 %v6350_v15, %v1598_v49 }
 0x89d   : > { %3631 = vmatmul.f32.gmra.mxu3 %v3144_v8  ;;  %7928 = vst [vmem:[#allocation68_spill] sm:$0xff] %v6686_v47  ;;  %v3243_v8 = vld [vmem:[#allocation5 + $0x1a8] sm:$0xff] }
 0x89e   : > { %3850 = vmatpush.msrb.mxu3 %v3287_v38  ;;  %v7936_v38 = vld [vmem:[#allocation50_spill] sm:$0xff]  ;;  %3651 = vmatpush.msrb.mxu1 %v3243_v8  ;;  %7939 = vst [vmem:[#allocation72_spill] sm:$0xff] %v6709_v42  ;;  %v3242_v8 = vld [vmem:[#allocation5 + $0x1a0] sm:$0xff] }
 0x89f   : > { %v6688_v27 = vpop.f32.mrf.mxu2  ;;  %v6690_v5 = vpop.f32.mrf.mxu1  ;;  %v3159_v52 = vmul.f32 %v7936_v38, %v6686_v47 }
 0x8a0   : > { %7929 = vst [vmem:[#allocation44_spill] sm:$0xff] %v6688_v27  ;;  %v6692_v58 = vpop.f32.mrf.mxu3  ;;  %3851 = vmatpush.msrb.mxu3 %v3286_v20  ;;  %v3160_v27 = vmul.f32 %v7937_v57, %v6683_v59  ;;  %v6706_v20 = vadd.f32 %v6355_v48, %v1533_v51  ;;  %v7946_v48 = vld [vmem:[#allocation57_spill] sm:$0xff]  ;;  %3652 = vmatpush.msrb.mxu1 %v3242_v8 }
 0x8a1   : > { %7930 = vst [vmem:[#allocation43_spill] sm:$0xff] %v6690_v5  ;;  %v6694_v3 = vpop.f32.mrf.mxu0  ;;  %v7981_v5 = vld [vmem:[#allocation87_spill] sm:$0xff] }
 0x8a2   : > { %7931 = vst [vmem:[#allocation45_spill] sm:$0xff] %v6692_v58  ;;  %2909 = vmatmul.f32.gmra.mxu1 %v5704_v12  ;;  %v7944_v12 = vld [vmem:[#allocation55_spill] sm:$0xff]  ;;  %v3176_v51 = vmul.f32 %v7946_v48, %v6706_v20  ;;  %v3241_v48 = vld [vmem:[#allocation5 + $0x198] sm:$0xff] }
 0x8a3   : > { %7932 = vst [vmem:[#allocation47_spill] sm:$0xff] %v6694_v3  ;;  %3653 = vmatpush.msrb.mxu1 %v3241_v48  ;;  %v7986_v58 = vld [vmem:[#allocation91_spill] sm:$0xff] }
 0x8a4   : > { %3504 = vmatmul.f32.gmra.mxu2 %v3158_v0  ;;  %3569 = vmatmul.f32.gmra.mxu0 %v3159_v52  ;;  %7938 = vst [vmem:[#allocation23_spill] sm:$0xff] %v6706_v20  ;;  %v3174_v0 = vmul.f32 %v7944_v12, %v6706_v20 }
 0x8a5   : > { %3634 = vmatmul.f32.gmra.mxu3 %v3160_v27  ;;  %v7945_v27 = vld [vmem:[#allocation54_spill] sm:$0xff] }
 0x8a6   : > { %v3175_v52 = vmul.f32 %v7945_v27, %v6709_v42 }
 0x8a7   : > { %v6711_v50 = vpop.f32.mrf.mxu2  ;;  %v6713_v36 = vpop.f32.mrf.mxu1 }
 0x8a8   : > { %7940 = vst [vmem:[#allocation46_spill] sm:$0xff] %v6711_v50  ;;  %v6715_v22 = vpop.f32.mrf.mxu3 }
 0x8a9   : > { %7941 = vst [vmem:[#allocation49_spill] sm:$0xff] %v6713_v36  ;;  %v6717_v38 = vpop.f32.mrf.mxu0  ;;  %v7951_v36 = vld [vmem:[#allocation59_spill] sm:$0xff] }
 0x8aa   : > { %7942 = vst [vmem:[#allocation51_spill] sm:$0xff] %v6715_v22  ;;  %2912 = vmatmul.f32.gmra.mxu1 %v5713_v40  ;;  %v2938_v22 = vmul.f32 %v7951_v36, %v6361_v62  ;;  %v7952_v40 = vld [vmem:[#allocation61_spill] sm:$0xff]  ;;  %v7955_v36 = vld [vmem:[#allocation63_spill] sm:$0xff] }
 0x8ab   : > { %7943 = vst [vmem:[#allocation24_spill] sm:$0xff] %v6717_v38  ;;  %v7950_v38 = vld [vmem:[#allocation58_spill] sm:$0xff]  ;;  %v2954_v50 = vmul.f32 %v7955_v36, %v6384_v4 }
 0x8ac   : > { %3507 = vmatmul.f32.gmra.mxu2 %v3174_v0  ;;  %3572 = vmatmul.f32.gmra.mxu0 %v3175_v52  ;;  %v2939_v27 = vmul.f32 %v7950_v38, %v6364_v31  ;;  %v2940_v0 = vmul.f32 %v7952_v40, %v6361_v62  ;;  %v7954_v38 = vld [vmem:[#allocation62_spill] sm:$0xff]  ;;  %v3240_v40 = vld [vmem:[#allocation5 + $0x190] sm:$0xff] }
 0x8ad   : > { %3637 = vmatmul.f32.gmra.mxu3 %v3176_v51  ;;  %3654 = vmatpush.msrb.mxu1 %v3240_v40 }
 0x8af   : > { %v6726_v15 = vpop.f32.mrf.mxu2  ;;  %v6728_v49 = vpop.f32.mrf.mxu1 }
 0x8b0   : > { %7947 = vst [vmem:[#allocation76_spill] sm:$0xff] %v6726_v15  ;;  %v6730_v57 = vpop.f32.mrf.mxu3  ;;  %v2955_v15 = vmul.f32 %v7954_v38, %v6387_v23 }
 0x8b1   : > { %7948 = vst [vmem:[#allocation50_spill] sm:$0xff] %v6728_v49  ;;  %v3528_v12 = vpop.f32.mrf.mxu0 }
 0x8b2   : > { %7949 = vst [vmem:[#allocation53_spill] sm:$0xff] %v6730_v57  ;;  %2915 = vmatmul.f32.gmra.mxu1 %v5722_v61  ;;  %v7956_v61 = vld [vmem:[#allocation65_spill] sm:$0xff] }
 0x8b4   : > { %3722 = vmatmul.f32.vlgmr.msra.gmra.mxu2 %v2938_v22  ;;  %3787 = vmatmul.f32.vlgmr.msrb.gmra.mxu0 %v2939_v27  ;;  %v2956_v22 = vmul.f32 %v7956_v61, %v6384_v4  ;;  %v3239_v27 = vld [vmem:[#allocation5 + $0x188] sm:$0xff]  ;;  %v7959_v61 = vld [vmem:[#allocation67_spill] sm:$0xff] }
 0x8b5   : > { %3852 = vmatmul.f32.vlgmr.msrb.gmra.mxu3 %v2940_v0  ;;  %3655 = vmatpush.msrb.mxu1 %v3239_v27 }
 0x8b7   : > { %v3463_v52 = vpop.f32.mrf.mxu2  ;;  %v6739_v8 = vpop.f32.mrf.mxu1 }
 0x8b8   : > { %7953 = vst [vmem:[#allocation55_spill] sm:$0xff] %v6739_v8  ;;  %v3529_v51 = vadd.f32 %v3528_v12, %v3463_v52  ;;  %v3593_v49 = vpop.f32.mrf.mxu3  ;;  %v2970_v8 = vmul.f32 %v7959_v61, %v6407_v63 }
 0x8b9   : > { %v3531_v57 = vpop.f32.mrf.mxu0 }
 0x8ba   : > { %v6745_v3 = vadd.f32 %v3593_v49, %v3529_v51  ;;  %2918 = vmatmul.f32.gmra.mxu1 %v5731_v29  ;;  %v3238_v49 = vld [vmem:[#allocation5 + $0x180] sm:$0xff]  ;;  %v7958_v51 = vld [vmem:[#allocation66_spill] sm:$0xff] }
 0x8bb   : > { %v2971_v36 = vmul.f32 %v7958_v51, %v6410_v18  ;;  %3656 = vmatpush.msrb.mxu1 %v3238_v49  ;;  %v7962_v51 = vld [vmem:[#allocation70_spill] sm:$0xff] }
 0x8bc   : > { %3725 = vmatmul.f32.gmra.mxu2 %v2954_v50  ;;  %3790 = vmatmul.f32.gmra.mxu0 %v2955_v15  ;;  %v7960_v50 = vld [vmem:[#allocation69_spill] sm:$0xff]  ;;  %v2987_v61 = vmul.f32 %v7962_v51, %v6433_v7  ;;  %v7966_v51 = vld [vmem:[#allocation74_spill] sm:$0xff] }
 0x8bd   : > { %3855 = vmatmul.f32.gmra.mxu3 %v2956_v22  ;;  %v2972_v15 = vmul.f32 %v7960_v50, %v6407_v63  ;;  %v7964_v50 = vld [vmem:[#allocation73_spill] sm:$0xff] }
 0x8bf   : > { %v3466_v12 = vpop.f32.mrf.mxu2  ;;  %v6750_v48 = vpop.f32.mrf.mxu1 }
 0x8c0   : > { %7957 = vst [vmem:[#allocation54_spill] sm:$0xff] %v6750_v48  ;;  %v3532_v0 = vadd.f32 %v3531_v57, %v3466_v12  ;;  %v3596_v52 = vpop.f32.mrf.mxu3 }
 0x8c1   : > { %v3534_v38 = vpop.f32.mrf.mxu0 }
 0x8c2   : > { %v6756_v29 = vadd.f32 %v3596_v52, %v3532_v0  ;;  %2921 = vmatmul.f32.gmra.mxu1 %v5742_v13  ;;  %v7963_v0 = vld [vmem:[#allocation71_spill] sm:$0xff]  ;;  %v2988_v13 = vmul.f32 %v7964_v50, %v6430_v26  ;;  %v3317_v50 = vld [vmem:[#allocation5 + $0x3f8] sm:$0xff] }
 0x8c3   : > { %v2986_v52 = vmul.f32 %v7963_v0, %v6430_v26  ;;  %3901 = vmatpush.msra.mxu1 %v3317_v50 }
 0x8c4   : > { %3728 = vmatmul.f32.gmra.mxu2 %v2970_v8  ;;  %3793 = vmatmul.f32.gmra.mxu0 %v2971_v36 }
 0x8c5   : > { %3858 = vmatmul.f32.gmra.mxu3 %v2972_v15 }
 0x8c7   : > { %v3469_v57 = vpop.f32.mrf.mxu2  ;;  %v6761_v40 = vpop.f32.mrf.mxu1 }
 0x8c8   : > { %7961 = vst [vmem:[#allocation57_spill] sm:$0xff] %v6761_v40  ;;  %v3535_v22 = vadd.f32 %v3534_v38, %v3469_v57  ;;  %v3599_v12 = vpop.f32.mrf.mxu3  ;;  %v3003_v40 = vmul.f32 %v7966_v51, %v6456_v32 }
 0x8c9   : > { %v3537_v27 = vpop.f32.mrf.mxu0 }
 0x8ca   : > { %v6767_v49 = vadd.f32 %v3599_v12, %v3535_v22  ;;  %2924 = vmatmul.f32.gmra.mxu1 %v5752_v16  ;;  %v7967_v22 = vld [vmem:[#allocation75_spill] sm:$0xff]  ;;  %v7968_v16 = vld [vmem:[#allocation77_spill] sm:$0xff] }
 0x8cb   : > { %v3002_v12 = vmul.f32 %v7967_v22, %v6453_v6  ;;  %v7970_v22 = vld [vmem:[#allocation78_spill] sm:$0xff] }
 0x8cc   : > { %3731 = vmatmul.f32.gmra.mxu2 %v2986_v52  ;;  %3796 = vmatmul.f32.gmra.mxu0 %v2987_v61  ;;  %v3004_v52 = vmul.f32 %v7968_v16, %v6453_v6  ;;  %v3316_v16 = vld [vmem:[#allocation5 + $0x3f0] sm:$0xff] }
 0x8cd   : > { %3861 = vmatmul.f32.gmra.mxu3 %v2988_v13  ;;  %3902 = vmatpush.msra.mxu1 %v3316_v16 }
 0x8cf   : > { %v3472_v8 = vpop.f32.mrf.mxu2  ;;  %v6772_v38 = vpop.f32.mrf.mxu1 }
 0x8d0   : > { %7965 = vst [vmem:[#allocation58_spill] sm:$0xff] %v6772_v38  ;;  %v3538_v36 = vadd.f32 %v3537_v27, %v3472_v8  ;;  %v3602_v15 = vpop.f32.mrf.mxu3 }
 0x8d1   : > { %v3540_v57 = vpop.f32.mrf.mxu0 }
 0x8d2   : > { %v6778_v0 = vadd.f32 %v3602_v15, %v3538_v36  ;;  %2927 = vmatmul.f32.gmra.mxu1 %v5762_v28  ;;  %v3019_v36 = vmul.f32 %v7970_v22, %v6479_v43  ;;  %v7971_v15 = vld [vmem:[#allocation79_spill] sm:$0xff]  ;;  %v7972_v28 = vld [vmem:[#allocation81_spill] sm:$0xff] }
 0x8d3   : > { %v3018_v38 = vmul.f32 %v7971_v15, %v6476_v54 }
 0x8d4   : > { %3734 = vmatmul.f32.gmra.mxu2 %v3002_v12  ;;  %3799 = vmatmul.f32.gmra.mxu0 %v3003_v40  ;;  %v3020_v40 = vmul.f32 %v7972_v28, %v6476_v54  ;;  %v7976_v28 = vld [vmem:[#allocation83_spill] sm:$0xff] }
 0x8d5   : > { %3864 = vmatmul.f32.gmra.mxu3 %v3004_v52 }
 0x8d7   : > { %v3475_v27 = vpop.f32.mrf.mxu2  ;;  %v6783_v61 = vpop.f32.mrf.mxu1 }
 0x8d8   : > { %7969 = vst [vmem:[#allocation59_spill] sm:$0xff] %v6783_v61  ;;  %v3541_v13 = vadd.f32 %v3540_v57, %v3475_v27  ;;  %v3605_v8 = vpop.f32.mrf.mxu3  ;;  %v7974_v27 = vld [vmem:[#allocation80_spill] sm:$0xff]  ;;  %v3034_v61 = vmul.f32 %v7976_v28, %v6499_v39 }
 0x8d9   : > { %v3543_v51 = vpop.f32.mrf.mxu0  ;;  %v2937_v22 = vmul.f32 %v7974_v27, %v6364_v31 }
 0x8da   : > { %v6789_v48 = vadd.f32 %v3605_v8, %v3541_v13  ;;  %2930 = vmatmul.f32.gmra.mxu1 %v5774_v37  ;;  %v7975_v8 = vld [vmem:[#allocation82_spill] sm:$0xff] }
 0x8db   : > { %v3035_v15 = vmul.f32 %v7975_v8, %v6502_v35  ;;  %v7979_v8 = vld [vmem:[#allocation84_spill] sm:$0xff] }
 0x8dc   : > { %3737 = vmatmul.f32.gmra.mxu2 %v3018_v38  ;;  %3802 = vmatmul.f32.gmra.mxu0 %v3019_v36  ;;  %v3315_v38 = vld [vmem:[#allocation5 + $0x3e8] sm:$0xff]  ;;  %v7977_v36 = vld [vmem:[#allocation85_spill] sm:$0xff] }
 0x8dd   : > { %3867 = vmatmul.f32.gmra.mxu3 %v3020_v40  ;;  %v3036_v16 = vmul.f32 %v7977_v36, %v6499_v39  ;;  %3903 = vmatpush.msra.mxu1 %v3315_v38  ;;  %v3050_v36 = vmul.f32 %v7981_v5, %v6522_v41 }
 0x8df   : > { %v3478_v57 = vpop.f32.mrf.mxu2  ;;  %v6794_v12 = vpop.f32.mrf.mxu1 }
 0x8e0   : > { %7973 = vst [vmem:[#allocation61_spill] sm:$0xff] %v6794_v12  ;;  %v3544_v50 = vadd.f32 %v3543_v51, %v3478_v57  ;;  %v3608_v52 = vpop.f32.mrf.mxu3  ;;  %v2953_v12 = vmul.f32 %v7979_v8, %v6387_v23 }
 0x8e1   : > { %v3546_v13 = vpop.f32.mrf.mxu0 }
 0x8e2   : > { %v6802_v37 = vadd.f32 %v3608_v52, %v3544_v50  ;;  %3657 = vmatmul.f32.vlgmr.msrb.gmra.mxu1 %v2937_v22  ;;  %v7980_v50 = vld [vmem:[#allocation86_spill] sm:$0xff] }
 0x8e3   : > { %v3051_v52 = vmul.f32 %v7980_v50, %v6525_v53  ;;  %v7984_v50 = vld [vmem:[#allocation88_spill] sm:$0xff] }
 0x8e4   : > { %3740 = vmatmul.f32.gmra.mxu2 %v3034_v61  ;;  %3805 = vmatmul.f32.gmra.mxu0 %v3035_v15  ;;  %v3314_v61 = vld [vmem:[#allocation5 + $0x3e0] sm:$0xff] }
 0x8e5   : > { %3870 = vmatmul.f32.gmra.mxu3 %v3036_v16  ;;  %v7982_v15 = vld [vmem:[#allocation89_spill] sm:$0xff]  ;;  %3904 = vmatpush.msra.mxu1 %v3314_v61 }
 0x8e6   : > { %v3052_v38 = vmul.f32 %v7982_v15, %v6522_v41  ;;  %v3066_v15 = vmul.f32 %v7986_v58, %v6545_v17  ;;  %v3348_v58 = vld [vmem:[#allocation5 + $0x4f0] sm:$0xff] }
 0x8e7   : > { %v3481_v51 = vpop.f32.mrf.mxu2  ;;  %v6806_v40 = vpop.f32.mrf.mxu1 }
 0x8e8   : > { %7978 = vst [vmem:[#allocation62_spill] sm:$0xff] %v6806_v40  ;;  %v3547_v57 = vadd.f32 %v3546_v13, %v3481_v51  ;;  %v3611_v27 = vpop.f32.mrf.mxu3  ;;  %v2969_v40 = vmul.f32 %v7984_v50, %v6410_v18 }
 0x8e9   : > { %v3549_v28 = vpop.f32.mrf.mxu0 }
 0x8ea   : > { %v6814_v22 = vadd.f32 %v3611_v27, %v3547_v57  ;;  %3660 = vmatmul.f32.gmra.mxu1 %v2953_v12  ;;  %v7985_v57 = vld [vmem:[#allocation90_spill] sm:$0xff] }
 0x8eb   : > { %v3067_v27 = vmul.f32 %v7985_v57, %v6548_v45  ;;  %v3332_v57 = vld [vmem:[#allocation5 + $0x470] sm:$0xff] }
 0x8ec   : > { %3743 = vmatmul.f32.gmra.mxu2 %v3050_v36  ;;  %3808 = vmatmul.f32.gmra.mxu0 %v3051_v52  ;;  %v3313_v52 = vld [vmem:[#allocation5 + $0x3d8] sm:$0xff]  ;;  %v7987_v36 = vld [vmem:[#allocation93_spill] sm:$0xff] }
 0x8ed   : > { %3873 = vmatmul.f32.gmra.mxu3 %v3052_v38  ;;  %v3068_v61 = vmul.f32 %v7987_v36, %v6545_v17  ;;  %3905 = vmatpush.msra.mxu1 %v3313_v52  ;;  %v3349_v38 = vld [vmem:[#allocation5 + $0x4f8] sm:$0xff]  ;;  %v3331_v52 = vld [vmem:[#allocation5 + $0x468] sm:$0xff] }
 0x8ee   : > { %4031 = vmatpush.msra.mxu0 %v3349_v38  ;;  %v3347_v36 = vld [vmem:[#allocation5 + $0x4e8] sm:$0xff] }
 0x8ef   : > { %v3484_v13 = vpop.f32.mrf.mxu2  ;;  %v6818_v16 = vpop.f32.mrf.mxu1 }
 0x8f0   : > { %7983 = vst [vmem:[#allocation63_spill] sm:$0xff] %v6818_v16  ;;  %v3550_v51 = vadd.f32 %v3549_v28, %v3484_v13  ;;  %v3614_v8 = vpop.f32.mrf.mxu3  ;;  %v3333_v28 = vld [vmem:[#allocation5 + $0x478] sm:$0xff]  ;;  %4032 = vmatpush.msra.mxu0 %v3348_v58  ;;  %v3330_v58 = vld [vmem:[#allocation5 + $0x460] sm:$0xff] }
 0x8f1   : > { %v3552_v5 = vpop.f32.mrf.mxu0  ;;  %v3365_v13 = vld [vmem:[#allocation5 + $0x578] sm:$0xff]  ;;  %3966 = vmatpush.msrb.mxu2 %v3333_v28  ;;  %v7990_v28 = vld [vmem:[#allocation94_spill] sm:$0xff] }
 0x8f2   : > { %v6826_v12 = vadd.f32 %v3614_v8, %v3550_v51  ;;  %3663 = vmatmul.f32.gmra.mxu1 %v2969_v40  ;;  %4096 = vmatpush.msra.mxu3 %v3365_v13  ;;  %v3364_v51 = vld [vmem:[#allocation5 + $0x570] sm:$0xff]  ;;  %v7989_v40 = vld [vmem:[#allocation92_spill] sm:$0xff]  ;;  %v3083_v38 = vmul.f32 %v7990_v28, %v6571_v33 }
 0x8f3   : > { %3967 = vmatpush.msrb.mxu2 %v3332_v57  ;;  %v7991_v13 = vld [vmem:[#allocation95_spill] sm:$0xff]  ;;  %4033 = vmatpush.msra.mxu0 %v3347_v36  ;;  %v3329_v28 = vld [vmem:[#allocation5 + $0x458] sm:$0xff] }
 0x8f4   : > { %3746 = vmatmul.f32.gmra.mxu2 %v3066_v15  ;;  %3811 = vmatmul.f32.gmra.mxu0 %v3067_v27  ;;  %v2985_v27 = vmul.f32 %v7989_v40, %v6433_v7  ;;  %v3082_v11 = vmul.f32 %v7991_v13, %v6568_v56  ;;  %v3362_v40 = vld [vmem:[#allocation5 + $0x560] sm:$0xff]  ;;  %v3344_v36 = vld [vmem:[#allocation5 + $0x4d0] sm:$0xff] }
 0x8f5   : > { %3876 = vmatmul.f32.gmra.mxu3 %v3068_v61  ;;  %v3363_v61 = vld [vmem:[#allocation5 + $0x568] sm:$0xff]  ;;  %3968 = vmatpush.msrb.mxu2 %v3331_v52  ;;  %v3328_v52 = vld [vmem:[#allocation5 + $0x450] sm:$0xff] }
 0x8f6   : > { %4097 = vmatpush.msra.mxu3 %v3364_v51  ;;  %v3346_v51 = vld [vmem:[#allocation5 + $0x4e0] sm:$0xff] }
 0x8f7   : > { %v3487_v50 = vpop.f32.mrf.mxu2  ;;  %v6830_v8 = vpop.f32.mrf.mxu1  ;;  %3969 = vmatpush.msrb.mxu2 %v3330_v58  ;;  %4034 = vmatpush.msra.mxu0 %v3346_v51  ;;  %v7996_v51 = vld [vmem:[#allocation99_spill] sm:$0xff] }
 0x8f8   : > { %7988 = vst [vmem:[#allocation65_spill] sm:$0xff] %v6830_v8  ;;  %v3553_v16 = vadd.f32 %v3552_v5, %v3487_v50  ;;  %v3617_v25 = vpop.f32.mrf.mxu3  ;;  %v3312_v5 = vld [vmem:[#allocation5 + $0x3d0] sm:$0xff]  ;;  %v7992_v50 = vld [vmem:[#allocation97_spill] sm:$0xff]  ;;  %4098 = vmatpush.msra.mxu3 %v3363_v61  ;;  %v3345_v8 = vld [vmem:[#allocation5 + $0x4d8] sm:$0xff] }
 0x8f9   : > { %v3555_v15 = vpop.f32.mrf.mxu0  ;;  %v3084_v57 = vmul.f32 %v7992_v50, %v6568_v56  ;;  %3906 = vmatpush.msra.mxu1 %v3312_v5  ;;  %3970 = vmatpush.msrb.mxu2 %v3329_v28  ;;  %v3327_v28 = vld [vmem:[#allocation5 + $0x448] sm:$0xff] }
 0x8fa   : > { %v6838_v2 = vadd.f32 %v3617_v25, %v3553_v16  ;;  %3666 = vmatmul.f32.gmra.mxu1 %v2985_v27  ;;  %v3361_v25 = vld [vmem:[#allocation5 + $0x558] sm:$0xff]  ;;  %4099 = vmatpush.msra.mxu3 %v3362_v40  ;;  %v3098_v40 = vmul.f32 %v7996_v51, %v6591_v55 }
 0x8fb   : > { %4035 = vmatpush.msra.mxu0 %v3345_v8  ;;  %3971 = vmatpush.msrb.mxu2 %v3328_v52  ;;  %v3325_v52 = vld [vmem:[#allocation5 + $0x438] sm:$0xff] }
 0x8fc   : > { %3749 = vmatmul.f32.gmra.mxu2 %v3082_v11  ;;  %3814 = vmatmul.f32.gmra.mxu0 %v3083_v38  ;;  %v3360_v11 = vld [vmem:[#allocation5 + $0x550] sm:$0xff]  ;;  %v7994_v38 = vld [vmem:[#allocation96_spill] sm:$0xff] }
 0x8fd   : > { %3879 = vmatmul.f32.gmra.mxu3 %v3084_v57  ;;  %v3001_v50 = vmul.f32 %v7994_v38, %v6456_v32  ;;  %v7995_v57 = vld [vmem:[#allocation98_spill] sm:$0xff]  ;;  %4036 = vmatpush.msra.mxu0 %v3344_v36  ;;  %v3326_v38 = vld [vmem:[#allocation5 + $0x440] sm:$0xff]  ;;  %v3341_v36 = vld [vmem:[#allocation5 + $0x4b8] sm:$0xff] }
 0x8fe   : > { %4100 = vmatpush.msra.mxu3 %v3361_v25  ;;  %v3099_v58 = vmul.f32 %v7995_v57, %v6594_v19  ;;  %v3359_v25 = vld [vmem:[#allocation5 + $0x548] sm:$0xff]  ;;  %3907 = vmatpush.msra.mxu1 %v3311_v9  ;;  %v3342_v57 = vld [vmem:[#allocation5 + $0x4c0] sm:$0xff] }
 0x8ff   : > { %v3490_v16 = vpop.f32.mrf.mxu2  ;;  %v6842_v13 = vpop.f32.mrf.mxu1  ;;  %3972 = vmatpush.msrb.mxu2 %v3327_v28 }
 0x900   : > { %7993 = vst [vmem:[#allocation66_spill] sm:$0xff] %v6842_v13  ;;  %v3556_v27 = vadd.f32 %v3555_v15, %v3490_v16  ;;  %v3620_v61 = vpop.f32.mrf.mxu3  ;;  %v7998_v15 = vld [vmem:[#allocation101_spill] sm:$0xff]  ;;  %4101 = vmatpush.msra.mxu3 %v3360_v11  ;;  %v3343_v16 = vld [vmem:[#allocation5 + $0x4c8] sm:$0xff] }
 0x901   : > { %v3558_v5 = vpop.f32.mrf.mxu0  ;;  %v3100_v8 = vmul.f32 %v7998_v15, %v6591_v55  ;;  %4037 = vmatpush.msra.mxu0 %v3343_v16  ;;  %3973 = vmatpush.msrb.mxu2 %v3326_v38  ;;  %v8002_v16 = vld [vmem:[#allocation103_spill] sm:$0xff]  ;;  %v8004_v38 = vld [vmem:[#allocation105_spill] sm:$0xff] }
 0x902   : > { %v6850_v44 = vadd.f32 %v3620_v61, %v3556_v27  ;;  %3669 = vmatmul.f32.gmra.mxu1 %v3001_v50  ;;  %v3358_v27 = vld [vmem:[#allocation5 + $0x540] sm:$0xff]  ;;  %4102 = vmatpush.msra.mxu3 %v3359_v25  ;;  %v3114_v25 = vmul.f32 %v8002_v16, %v6614_v60 }
 0x903   : > { %4038 = vmatpush.msra.mxu0 %v3342_v57  ;;  %3974 = vmatpush.msrb.mxu2 %v3325_v52  ;;  %v3116_v57 = vmul.f32 %v8004_v38, %v6614_v60 }
 0x904   : > { %7997 = vst [vmem:[#allocation67_spill] sm:$0xff] %v6850_v44  ;;  %3752 = vmatmul.f32.gmra.mxu2 %v3098_v40  ;;  %3817 = vmatmul.f32.gmra.mxu0 %v3099_v58  ;;  %v3357_v40 = vld [vmem:[#allocation5 + $0x538] sm:$0xff] }
 0x905   : > { %3882 = vmatmul.f32.gmra.mxu3 %v3100_v8  ;;  %v8000_v58 = vld [vmem:[#allocation100_spill] sm:$0xff]  ;;  %v8001_v8 = vld [vmem:[#allocation102_spill] sm:$0xff]  ;;  %4039 = vmatpush.msra.mxu0 %v3341_v36  ;;  %v3322_v36 = vld [vmem:[#allocation5 + $0x420] sm:$0xff] }
 0x906   : > { %v3017_v15 = vmul.f32 %v8000_v58, %v6479_v43  ;;  %4103 = vmatpush.msra.mxu3 %v3358_v27  ;;  %v3115_v28 = vmul.f32 %v8001_v8, %v6617_v30  ;;  %v3340_v58 = vld [vmem:[#allocation5 + $0x4b0] sm:$0xff]  ;;  %v3323_v8 = vld [vmem:[#allocation5 + $0x428] sm:$0xff] }
 0x907   : > { %v3493_v61 = vpop.f32.mrf.mxu2  ;;  %v6854_v51 = vpop.f32.mrf.mxu1  ;;  %v3356_v27 = vld [vmem:[#allocation5 + $0x530] sm:$0xff]  ;;  %4040 = vmatpush.msra.mxu0 %v3340_v58 }
 0x908   : > { %7999 = vst [vmem:[#allocation69_spill] sm:$0xff] %v6854_v51  ;;  %v3559_v50 = vadd.f32 %v3558_v5, %v3493_v61  ;;  %v3623_v11 = vpop.f32.mrf.mxu3  ;;  %v3310_v5 = vld [vmem:[#allocation5 + $0x3c0] sm:$0xff]  ;;  %4104 = vmatpush.msra.mxu3 %v3357_v40  ;;  %v3324_v61 = vld [vmem:[#allocation5 + $0x430] sm:$0xff]  ;;  %v3339_v51 = vld [vmem:[#allocation5 + $0x4a8] sm:$0xff] }
 0x909   : > { %v3561_v9 = vpop.f32.mrf.mxu0  ;;  %3908 = vmatpush.msra.mxu1 %v3310_v5  ;;  %3975 = vmatpush.msrb.mxu2 %v3324_v61  ;;  %v8008_v58 = vld [vmem:[#allocation107_spill] sm:$0xff] }
 0x90a   : > { %v6862_v13 = vadd.f32 %v3623_v11, %v3559_v50  ;;  %3672 = vmatmul.f32.gmra.mxu1 %v3017_v15  ;;  %v3355_v50 = vld [vmem:[#allocation5 + $0x528] sm:$0xff]  ;;  %4105 = vmatpush.msra.mxu3 %v3356_v27  ;;  %v3338_v11 = vld [vmem:[#allocation5 + $0x4a0] sm:$0xff]  ;;  %v3130_v27 = vmul.f32 %v8008_v58, %v6637_v34  ;;  %v3352_v58 = vld [vmem:[#allocation5 + $0x510] sm:$0xff] }
 0x90b   : > { %3976 = vmatpush.msrb.mxu2 %v3323_v8  ;;  %4041 = vmatpush.msra.mxu0 %v3339_v51  ;;  %v8010_v8 = vld [vmem:[#allocation109_spill] sm:$0xff] }
 0x90c   : > { %8003 = vst [vmem:[#allocation70_spill] sm:$0xff] %v6862_v13  ;;  %3755 = vmatmul.f32.gmra.mxu2 %v3114_v25  ;;  %3820 = vmatmul.f32.gmra.mxu0 %v3115_v28  ;;  %v3354_v25 = vld [vmem:[#allocation5 + $0x520] sm:$0xff]  ;;  %v8006_v28 = vld [vmem:[#allocation104_spill] sm:$0xff]  ;;  %v3132_v51 = vmul.f32 %v8010_v8, %v6637_v34 }
 0x90d   : > { %3885 = vmatmul.f32.gmra.mxu3 %v3116_v57  ;;  %v3033_v38 = vmul.f32 %v8006_v28, %v6502_v35  ;;  %v8007_v57 = vld [vmem:[#allocation106_spill] sm:$0xff]  ;;  %3977 = vmatpush.msrb.mxu2 %v3322_v36  ;;  %v3353_v28 = vld [vmem:[#allocation5 + $0x518] sm:$0xff] }
 0x90e   : > { %4106 = vmatpush.msra.mxu3 %v3355_v50  ;;  %v3131_v61 = vmul.f32 %v8007_v57, %v6640_v14  ;;  %4042 = vmatpush.msra.mxu0 %v3338_v11  ;;  %v3309_v50 = vld [vmem:[#allocation5 + $0x3b8] sm:$0xff]  ;;  %v3336_v57 = vld [vmem:[#allocation5 + $0x490] sm:$0xff]  ;;  %v3319_v36 = vld [vmem:[#allocation5 + $0x408] sm:$0xff] }
 0x90f   : > { %v3496_v52 = vpop.f32.mrf.mxu2  ;;  %v6866_v16 = vpop.f32.mrf.mxu1  ;;  %3909 = vmatpush.msra.mxu1 %v3309_v50  ;;  %v8014_v50 = vld [vmem:[#allocation111_spill] sm:$0xff] }
 0x910   : > { %8005 = vst [vmem:[#allocation71_spill] sm:$0xff] %v6866_v16  ;;  %v3562_v15 = vadd.f32 %v3561_v9, %v3496_v52  ;;  %v3626_v40 = vpop.f32.mrf.mxu3  ;;  %v3321_v9 = vld [vmem:[#allocation5 + $0x418] sm:$0xff]  ;;  %4107 = vmatpush.msra.mxu3 %v3354_v25  ;;  %v3320_v16 = vld [vmem:[#allocation5 + $0x410] sm:$0xff] }
 0x911   : > { %v3564_v5 = vpop.f32.mrf.mxu0  ;;  %v3337_v52 = vld [vmem:[#allocation5 + $0x498] sm:$0xff]  ;;  %3978 = vmatpush.msrb.mxu2 %v3321_v9 }
 0x912   : > { %v6874_v13 = vadd.f32 %v3626_v40, %v3562_v15  ;;  %3675 = vmatmul.f32.gmra.mxu1 %v3033_v38  ;;  %4043 = vmatpush.msra.mxu0 %v3337_v52  ;;  %v3335_v15 = vld [vmem:[#allocation5 + $0x488] sm:$0xff] }
 0x913   : > { %4108 = vmatpush.msra.mxu3 %v3353_v28  ;;  %3979 = vmatpush.msrb.mxu2 %v3320_v16  ;;  %v3351_v40 = vld [vmem:[#allocation5 + $0x508] sm:$0xff]  ;;  %v3146_v16 = vmul.f32 %v8014_v50, %v6660_v21 }
 0x914   : > { %8009 = vst [vmem:[#allocation73_spill] sm:$0xff] %v6874_v13  ;;  %3758 = vmatmul.f32.gmra.mxu2 %v3130_v27  ;;  %3823 = vmatmul.f32.gmra.mxu0 %v3131_v61  ;;  %v3318_v61 = vld [vmem:[#allocation5 + $0x400] sm:$0xff]  ;;  %v8012_v27 = vld [vmem:[#allocation108_spill] sm:$0xff]  ;;  %v8013_v52 = vld [vmem:[#allocation110_spill] sm:$0xff] }
 0x915   : > { %3888 = vmatmul.f32.gmra.mxu3 %v3132_v51  ;;  %4044 = vmatpush.msra.mxu0 %v3336_v57  ;;  %v3049_v9 = vmul.f32 %v8012_v27, %v6525_v53  ;;  %v3147_v28 = vmul.f32 %v8013_v52, %v6663_v10  ;;  %v8016_v57 = vld [vmem:[#allocation113_spill] sm:$0xff]  ;;  %v3308_v27 = vld [vmem:[#allocation5 + $0x3b0] sm:$0xff] }
 0x916   : > { %4109 = vmatpush.msra.mxu3 %v3352_v58  ;;  %3980 = vmatpush.msrb.mxu2 %v3319_v36  ;;  %v3148_v58 = vmul.f32 %v8016_v57, %v6660_v21  ;;  %v3307_v57 = vld [vmem:[#allocation5 + $0x3a8] sm:$0xff] }
 0x917   : > { %v3499_v11 = vpop.f32.mrf.mxu2  ;;  %v6878_v38 = vpop.f32.mrf.mxu1  ;;  %4045 = vmatpush.msra.mxu0 %v3335_v15  ;;  %3910 = vmatpush.msra.mxu1 %v3308_v27 }
 0x918   : > { %8011 = vst [vmem:[#allocation74_spill] sm:$0xff] %v6878_v38  ;;  %v3565_v25 = vadd.f32 %v3564_v5, %v3499_v11  ;;  %v3629_v8 = vpop.f32.mrf.mxu3  ;;  %4110 = vmatpush.msra.mxu3 %v3351_v40  ;;  %v3334_v5 = vld [vmem:[#allocation5 + $0x480] sm:$0xff]  ;;  %3981 = vmatpush.msrb.mxu2 %v3318_v61  ;;  %v8018_v40 = vld [vmem:[#allocation112_spill] sm:$0xff]  ;;  %v8019_v61 = vld [vmem:[#allocation114_spill] sm:$0xff] }
 0x919   : > { %v3567_v51 = vpop.f32.mrf.mxu0  ;;  %v3350_v11 = vld [vmem:[#allocation5 + $0x500] sm:$0xff]  ;;  %4046 = vmatpush.msra.mxu0 %v3334_v5  ;;  %3911 = vmatpush.msra.mxu1 %v3307_v57  ;;  %v8026_v57 = vld [vmem:[#allocation119_spill] sm:$0xff] }
 0x91a   : > { %v6886_v13 = vadd.f32 %v3629_v8, %v3565_v25  ;;  %3678 = vmatmul.f32.gmra.mxu1 %v3049_v9  ;;  %4111 = vmatpush.msra.mxu3 %v3350_v11  ;;  %v3065_v8 = vmul.f32 %v8018_v40, %v6548_v45  ;;  %v3163_v9 = vmul.f32 %v8019_v61, %v6686_v47  ;;  %v8022_v5 = vld [vmem:[#allocation117_spill] sm:$0xff]  ;;  %v8024_v61 = vld [vmem:[#allocation116_spill] sm:$0xff] }
 0x91b   : > { %v3164_v11 = vmul.f32 %v8022_v5, %v6683_v59  ;;  %v3178_v5 = vmul.f32 %v8026_v57, %v6706_v20  ;;  %v8032_v57 = vld [vmem:[#allocation123_spill] sm:$0xff] }
 0x91c   : > { %8015 = vst [vmem:[#allocation75_spill] sm:$0xff] %v6886_v13  ;;  %3761 = vmatmul.f32.gmra.mxu2 %v3146_v16  ;;  %3826 = vmatmul.f32.gmra.mxu0 %v3147_v28  ;;  %v8020_v16 = vld [vmem:[#allocation115_spill] sm:$0xff]  ;;  %v8046_v13 = vld [vmem:[#allocation132_spill] sm:$0xff] }
 0x91d   : > { %3891 = vmatmul.f32.gmra.mxu3 %v3148_v58  ;;  %v3162_v28 = vmul.f32 %v8020_v16, %v6683_v59  ;;  %v3306_v16 = vld [vmem:[#allocation5 + $0x3a0] sm:$0xff] }
 0x91e   : > { %3912 = vmatpush.msra.mxu1 %v3306_v16 }
 0x91f   : > { %v3502_v36 = vpop.f32.mrf.mxu2  ;;  %v6890_v52 = vpop.f32.mrf.mxu1 }
 0x920   : > { %8017 = vst [vmem:[#allocation77_spill] sm:$0xff] %v6890_v52  ;;  %v3568_v25 = vadd.f32 %v3567_v51, %v3502_v36  ;;  %v3632_v15 = vpop.f32.mrf.mxu3  ;;  %v3081_v52 = vmul.f32 %v8024_v61, %v6571_v33 }
 0x921   : > { %v3570_v50 = vpop.f32.mrf.mxu0 }
 0x922   : > { %v6898_v58 = vadd.f32 %v3632_v15, %v3568_v25  ;;  %3681 = vmatmul.f32.gmra.mxu1 %v3065_v8  ;;  %v8025_v25 = vld [vmem:[#allocation118_spill] sm:$0xff] }
 0x923   : > { %v3179_v15 = vmul.f32 %v8025_v25, %v6709_v42  ;;  %v8030_v25 = vld [vmem:[#allocation120_spill] sm:$0xff] }
 0x924   : > { %8021 = vst [vmem:[#allocation78_spill] sm:$0xff] %v6898_v58  ;;  %3764 = vmatmul.f32.gmra.mxu2 %v3162_v28  ;;  %3829 = vmatmul.f32.gmra.mxu0 %v3163_v9  ;;  %v8028_v9 = vld [vmem:[#allocation121_spill] sm:$0xff] }
 0x925   : > { %3894 = vmatmul.f32.gmra.mxu3 %v3164_v11  ;;  %v3180_v28 = vmul.f32 %v8028_v9, %v6706_v20 }
 0x927   : > { %v3505_v51 = vpop.f32.mrf.mxu2  ;;  %v6902_v27 = vpop.f32.mrf.mxu1 }
 0x928   : > { %8023 = vst [vmem:[#allocation79_spill] sm:$0xff] %v6902_v27  ;;  %v3571_v36 = vadd.f32 %v3570_v50, %v3505_v51  ;;  %v3635_v40 = vpop.f32.mrf.mxu3  ;;  %v3097_v27 = vmul.f32 %v8030_v25, %v6594_v19  ;;  %v8036_v25 = vld [vmem:[#allocation124_spill] sm:$0xff] }
 0x929   : > { %v3573_v38 = vpop.f32.mrf.mxu0 }
 0x92a   : > { %v6910_v8 = vadd.f32 %v3635_v40, %v3571_v36  ;;  %3684 = vmatmul.f32.gmra.mxu1 %v3081_v52  ;;  %v3305_v36 = vld [vmem:[#allocation5 + $0x398] sm:$0xff]  ;;  %v8031_v40 = vld [vmem:[#allocation122_spill] sm:$0xff]  ;;  %v2942_v52 = vmul.f32 %v8032_v57, %v6361_v62 }
 0x92b   : > { %v2943_v16 = vmul.f32 %v8031_v40, %v6364_v31  ;;  %3913 = vmatpush.msra.mxu1 %v3305_v36  ;;  %v3113_v40 = vmul.f32 %v8036_v25, %v6617_v30  ;;  %v3303_v25 = vld [vmem:[#allocation5 + $0x388] sm:$0xff] }
 0x92c   : > { %8027 = vst [vmem:[#allocation81_spill] sm:$0xff] %v6910_v8  ;;  %3767 = vmatmul.f32.gmra.mxu2 %v3178_v5  ;;  %3832 = vmatmul.f32.gmra.mxu0 %v3179_v15  ;;  %v8034_v15 = vld [vmem:[#allocation125_spill] sm:$0xff] }
 0x92d   : > { %3897 = vmatmul.f32.gmra.mxu3 %v3180_v28  ;;  %v2944_v9 = vmul.f32 %v8034_v15, %v6361_v62 }
 0x92f   : > { %v3508_v50 = vpop.f32.mrf.mxu2  ;;  %v6914_v11 = vpop.f32.mrf.mxu1 }
 0x930   : > { %8029 = vst [vmem:[#allocation80_spill] sm:$0xff] %v6914_v11  ;;  %v3574_v51 = vadd.f32 %v3573_v38, %v3508_v50  ;;  %v3638_v61 = vpop.f32.mrf.mxu3 }
 0x931   : > { %v6918_v58 = vpop.f32.mrf.mxu0 }
 0x932   : > { %v6924_v5 = vadd.f32 %v3638_v61, %v3574_v51  ;;  %3687 = vmatmul.f32.gmra.mxu1 %v3097_v27  ;;  %v3304_v51 = vld [vmem:[#allocation5 + $0x390] sm:$0xff]  ;;  %v8037_v61 = vld [vmem:[#allocation126_spill] sm:$0xff] }
 0x933   : > { %v2959_v36 = vmul.f32 %v8037_v61, %v6387_v23  ;;  %v8038_v27 = vld [vmem:[#allocation127_spill] sm:$0xff]  ;;  %3914 = vmatpush.msra.mxu1 %v3304_v51  ;;  %v8041_v61 = vld [vmem:[#allocation128_spill] sm:$0xff]  ;;  %v3302_v51 = vld [vmem:[#allocation5 + $0x380] sm:$0xff] }
 0x934   : > { %8033 = vst [vmem:[#allocation82_spill] sm:$0xff] %v6924_v5  ;;  %3982 = vmatmul.f32.vlgmr.msrb.gmra.mxu2 %v2942_v52  ;;  %4047 = vmatmul.f32.vlgmr.msra.gmra.mxu0 %v2943_v16  ;;  %v2958_v52 = vmul.f32 %v8038_v27, %v6384_v4  ;;  %v8039_v16 = vld [vmem:[#allocation129_spill] sm:$0xff]  ;;  %v3129_v5 = vmul.f32 %v8041_v61, %v6640_v14 }
 0x935   : > { %4112 = vmatmul.f32.vlgmr.msra.gmra.mxu3 %v2944_v9  ;;  %v2960_v15 = vmul.f32 %v8039_v16, %v6384_v4  ;;  %3915 = vmatpush.msra.mxu1 %v3303_v25  ;;  %v8042_v16 = vld [vmem:[#allocation130_spill] sm:$0xff] }
 0x937   : > { %v6928_v38 = vpop.f32.mrf.mxu2  ;;  %v6930_v28 = vpop.f32.mrf.mxu1  ;;  %3916 = vmatpush.msra.mxu1 %v3302_v51  ;;  %v8047_v51 = vld [vmem:[#allocation134_spill] sm:$0xff] }
 0x938   : > { %8035 = vst [vmem:[#allocation83_spill] sm:$0xff] %v6930_v28  ;;  %v6932_v50 = vpop.f32.mrf.mxu3 }
 0x939   : > { %v6936_v57 = vpop.f32.mrf.mxu0 }
 0x93a   : > { %3690 = vmatmul.f32.gmra.mxu1 %v3113_v40  ;;  %v2975_v40 = vmul.f32 %v8042_v16, %v6410_v18  ;;  %v3145_v16 = vmul.f32 %v8046_v13, %v6663_v10 }
 0x93c   : > { %3985 = vmatmul.f32.gmra.mxu2 %v2958_v52  ;;  %4050 = vmatmul.f32.gmra.mxu0 %v2959_v36  ;;  %v8043_v36 = vld [vmem:[#allocation131_spill] sm:$0xff] }
 0x93d   : > { %4115 = vmatmul.f32.gmra.mxu3 %v2960_v15  ;;  %v2974_v52 = vmul.f32 %v8043_v36, %v6407_v63  ;;  %v8044_v15 = vld [vmem:[#allocation133_spill] sm:$0xff]  ;;  %v2991_v36 = vmul.f32 %v8047_v51, %v6433_v7 }
 0x93e   : > { %v2976_v8 = vmul.f32 %v8044_v15, %v6407_v63  ;;  %v8048_v15 = vld [vmem:[#allocation135_spill] sm:$0xff]  ;;  %v8051_v63 = vld [vmem:[#allocation136_spill] sm:$0xff] }
 0x93f   : > { %v6944_v9 = vpop.f32.mrf.mxu2  ;;  %v6946_v28 = vpop.f32.mrf.mxu1  ;;  %v3161_v62 = vmul.f32 %v8051_v63, %v6686_v47 }
 0x940   : > { %8040 = vst [vmem:[#allocation85_spill] sm:$0xff] %v6946_v28  ;;  %v6948_v11 = vpop.f32.mrf.mxu3 }
 0x941   : > { %v6952_v27 = vpop.f32.mrf.mxu0 }
 0x942   : > { %3693 = vmatmul.f32.gmra.mxu1 %v3129_v5  ;;  %v2990_v5 = vmul.f32 %v8048_v15, %v6430_v26  ;;  %v8052_v15 = vld [vmem:[#allocation138_spill] sm:$0xff] }
 0x943   : > { %v3007_v46 = vmul.f32 %v8052_v15, %v6456_v32  ;;  %v8056_v15 = vld [vmem:[#allocation140_spill] sm:$0xff] }
 0x944   : > { %3988 = vmatmul.f32.gmra.mxu2 %v2974_v52  ;;  %4053 = vmatmul.f32.gmra.mxu0 %v2975_v40  ;;  %v8049_v40 = vld [vmem:[#allocation137_spill] sm:$0xff]  ;;  %v3177_v20 = vmul.f32 %v8056_v15, %v6709_v42  ;;  %v8060_v42 = vld [vmem:[#allocation144_spill] sm:$0xff] }
 0x945   : > { %4118 = vmatmul.f32.gmra.mxu3 %v2976_v8  ;;  %v2992_v8 = vmul.f32 %v8049_v40, %v6430_v26  ;;  %v8053_v40 = vld [vmem:[#allocation139_spill] sm:$0xff] }
 0x947   : > { %v6960_v25 = vpop.f32.mrf.mxu2  ;;  %v6962_v61 = vpop.f32.mrf.mxu1 }
 0x948   : > { %8045 = vst [vmem:[#allocation84_spill] sm:$0xff] %v6962_v61  ;;  %v6964_v28 = vpop.f32.mrf.mxu3 }
 0x949   : > { %v6968_v4 = vpop.f32.mrf.mxu0 }
 0x94a   : > { %3696 = vmatmul.f32.gmra.mxu1 %v3145_v16  ;;  %v3006_v16 = vmul.f32 %v8053_v40, %v6453_v6  ;;  %v8057_v40 = vld [vmem:[#allocation142_spill] sm:$0xff] }
 0x94c   : > { %3991 = vmatmul.f32.gmra.mxu2 %v2990_v5  ;;  %4056 = vmatmul.f32.gmra.mxu0 %v2991_v36  ;;  %v8054_v36 = vld [vmem:[#allocation141_spill] sm:$0xff] }
 0x94d   : > { %4121 = vmatmul.f32.gmra.mxu3 %v2992_v8  ;;  %v3008_v5 = vmul.f32 %v8054_v36, %v6453_v6  ;;  %v3381_v8 = vld [vmem:[#allocation5 + $0x5f8] sm:$0xff]  ;;  %v3023_v36 = vmul.f32 %v8057_v40, %v6479_v43  ;;  %v2941_v40 = vmul.f32 %v8060_v42, %v6364_v31 }
 0x94e   : > { %4161 = vmatpush.msrb.mxu1 %v3381_v8  ;;  %v3380_v8 = vld [vmem:[#allocation5 + $0x5f0] sm:$0xff] }
 0x94f   : > { %v6976_v52 = vpop.f32.mrf.mxu2  ;;  %v6978_v61 = vpop.f32.mrf.mxu1 }
 0x950   : > { %8050 = vst [vmem:[#allocation86_spill] sm:$0xff] %v6978_v61  ;;  %v6980_v13 = vpop.f32.mrf.mxu3  ;;  %4162 = vmatpush.msrb.mxu1 %v3380_v8 }
 0x951   : > { %v6984_v51 = vpop.f32.mrf.mxu0 }
 0x952   : > { %3699 = vmatmul.f32.gmra.mxu1 %v3161_v62  ;;  %v8058_v62 = vld [vmem:[#allocation143_spill] sm:$0xff] }
 0x954   : > { %3994 = vmatmul.f32.gmra.mxu2 %v3006_v16  ;;  %4059 = vmatmul.f32.gmra.mxu0 %v3007_v46  ;;  %v3022_v16 = vmul.f32 %v8058_v62, %v6476_v54  ;;  %v8059_v46 = vld [vmem:[#allocation145_spill] sm:$0xff]  ;;  %v8061_v62 = vld [vmem:[#allocation146_spill] sm:$0xff] }
 0x955   : > { %4124 = vmatmul.f32.gmra.mxu3 %v3008_v5  ;;  %v3024_v5 = vmul.f32 %v8059_v46, %v6476_v54  ;;  %v3039_v47 = vmul.f32 %v8061_v62, %v6502_v35  ;;  %v3379_v54 = vld [vmem:[#allocation5 + $0x5e8] sm:$0xff] }
 0x956   : > { %4163 = vmatpush.msrb.mxu1 %v3379_v54  ;;  %v8066_v54 = vld [vmem:[#allocation151_spill] sm:$0xff] }
 0x957   : > { %v6992_v61 = vpop.f32.mrf.mxu2  ;;  %v6994_v63 = vpop.f32.mrf.mxu1 }
 0x958   : > { %8055 = vst [vmem:[#allocation87_spill] sm:$0xff] %v6994_v63  ;;  %v6996_v26 = vpop.f32.mrf.mxu3 }
 0x959   : > { %v7000_v44 = vpop.f32.mrf.mxu0 }
 0x95a   : > { %3702 = vmatmul.f32.gmra.mxu1 %v3177_v20  ;;  %v8062_v20 = vld [vmem:[#allocation147_spill] sm:$0xff] }
 0x95b   : > { %v3038_v46 = vmul.f32 %v8062_v20, %v6499_v39 }
 0x95c   : > { %3997 = vmatmul.f32.gmra.mxu2 %v3022_v16  ;;  %4062 = vmatmul.f32.gmra.mxu0 %v3023_v36  ;;  %v8063_v36 = vld [vmem:[#allocation149_spill] sm:$0xff] }
 0x95d   : > { %4127 = vmatmul.f32.gmra.mxu3 %v3024_v5  ;;  %v3040_v5 = vmul.f32 %v8063_v36, %v6499_v39  ;;  %v8064_v36 = vld [vmem:[#allocation148_spill] sm:$0xff] }
 0x95e   : > { %v2957_v39 = vmul.f32 %v8064_v36, %v6387_v23 }
 0x95f   : > { %v7008_v63 = vpop.f32.mrf.mxu2  ;;  %v3658_v15 = vpop.f32.mrf.mxu1 }
 0x960   : > { %v7010_v6 = vpop.f32.mrf.mxu3  ;;  %v3659_v59 = vadd.f32 %v3658_v15, %v6745_v3 }
 0x961   : > { %v7019_v16 = vpop.f32.mrf.mxu0 }
 0x962   : > { %v3724_v8 = vadd.f32 %v6928_v38, %v3659_v59  ;;  %3917 = vmatmul.f32.vlgmr.msra.gmra.mxu1 %v2941_v40  ;;  %v8065_v38 = vld [vmem:[#allocation150_spill] sm:$0xff]  ;;  %v3054_v40 = vmul.f32 %v8066_v54, %v6522_v41 }
 0x963   : > { %v8069_v54 = vld [vmem:[#allocation154_spill] sm:$0xff] }
 0x964   : > { %4000 = vmatmul.f32.gmra.mxu2 %v3038_v46  ;;  %4065 = vmatmul.f32.gmra.mxu0 %v3039_v47  ;;  %v3789_v3 = vadd.f32 %v6918_v58, %v3724_v8  ;;  %v3055_v47 = vmul.f32 %v8065_v38, %v6525_v53  ;;  %v8067_v58 = vld [vmem:[#allocation153_spill] sm:$0xff] }
 0x965   : > { %4130 = vmatmul.f32.gmra.mxu3 %v3040_v5  ;;  %v3056_v46 = vmul.f32 %v8067_v58, %v6522_v41  ;;  %v3378_v5 = vld [vmem:[#allocation5 + $0x5e0] sm:$0xff] }
 0x966   : > { %v7028_v15 = vadd.f32 %v6932_v50, %v3789_v3  ;;  %4164 = vmatpush.msrb.mxu1 %v3378_v5  ;;  %v3397_v5 = vld [vmem:[#allocation5 + $0x678] sm:$0xff] }
 0x967   : > { %v7025_v42 = vpop.f32.mrf.mxu2  ;;  %v3661_v62 = vpop.f32.mrf.mxu1  ;;  %4226 = vmatpush.msra.mxu2 %v3397_v5  ;;  %v3427_v5 = vld [vmem:[#allocation5 + $0x768] sm:$0xff] }
 0x968   : > { %v7030_v20 = vpop.f32.mrf.mxu3  ;;  %v3662_v59 = vadd.f32 %v3661_v62, %v6756_v29 }
 0x969   : > { %v7042_v8 = vpop.f32.mrf.mxu0 }
 0x96a   : > { %v3727_v50 = vadd.f32 %v6944_v9, %v3662_v59  ;;  %3920 = vmatmul.f32.gmra.mxu1 %v2957_v39  ;;  %v8068_v9 = vld [vmem:[#allocation152_spill] sm:$0xff] }
 0x96b   : > { %v2973_v39 = vmul.f32 %v8068_v9, %v6410_v18 }
 0x96c   : > { %4003 = vmatmul.f32.gmra.mxu2 %v3054_v40  ;;  %4068 = vmatmul.f32.gmra.mxu0 %v3055_v47  ;;  %v3792_v29 = vadd.f32 %v6936_v57, %v3727_v50  ;;  %v3071_v47 = vmul.f32 %v8069_v54, %v6548_v45  ;;  %v8070_v40 = vld [vmem:[#allocation155_spill] sm:$0xff]  ;;  %v8071_v57 = vld [vmem:[#allocation157_spill] sm:$0xff]  ;;  %v3377_v50 = vld [vmem:[#allocation5 + $0x5d8] sm:$0xff] }
 0x96d   : > { %4133 = vmatmul.f32.gmra.mxu3 %v3056_v46  ;;  %v3070_v58 = vmul.f32 %v8070_v40, %v6545_v17  ;;  %v3072_v46 = vmul.f32 %v8071_v57, %v6545_v17  ;;  %4165 = vmatpush.msrb.mxu1 %v3377_v50  ;;  %v3396_v40 = vld [vmem:[#allocation5 + $0x670] sm:$0xff]  ;;  %v3411_v50 = vld [vmem:[#allocation5 + $0x6e8] sm:$0xff] }
 0x96e   : > { %v7048_v62 = vadd.f32 %v6948_v11, %v3792_v29  ;;  %v3413_v29 = vld [vmem:[#allocation5 + $0x6f8] sm:$0xff]  ;;  %4227 = vmatpush.msra.mxu2 %v3396_v40  ;;  %v8076_v40 = vld [vmem:[#allocation161_spill] sm:$0xff] }
 0x96f   : > { %v7045_v3 = vpop.f32.mrf.mxu2  ;;  %v3664_v36 = vpop.f32.mrf.mxu1  ;;  %4291 = vmatpush.msrb.mxu0 %v3413_v29  ;;  %v8074_v29 = vld [vmem:[#allocation158_spill] sm:$0xff] }
 0x970   : > { %v7050_v38 = vpop.f32.mrf.mxu3  ;;  %v3665_v59 = vadd.f32 %v3664_v36, %v6767_v49  ;;  %v3429_v49 = vld [vmem:[#allocation5 + $0x778] sm:$0xff] }
 0x971   : > { %v7063_v9 = vpop.f32.mrf.mxu0  ;;  %4356 = vmatpush.msrb.mxu3 %v3429_v49  ;;  %v3087_v49 = vmul.f32 %v8074_v29, %v6571_v33  ;;  %v3393_v29 = vld [vmem:[#allocation5 + $0x658] sm:$0xff] }
 0x972   : > { %v3730_v11 = vadd.f32 %v6960_v25, %v3665_v59  ;;  %3923 = vmatmul.f32.gmra.mxu1 %v2973_v39  ;;  %v3412_v25 = vld [vmem:[#allocation5 + $0x6f0] sm:$0xff] }
 0x973   : > { %v3428_v39 = vld [vmem:[#allocation5 + $0x770] sm:$0xff]  ;;  %4292 = vmatpush.msrb.mxu0 %v3412_v25  ;;  %v3088_v25 = vmul.f32 %v8076_v40, %v6568_v56  ;;  %v8077_v40 = vld [vmem:[#allocation160_spill] sm:$0xff] }
 0x974   : > { %4006 = vmatmul.f32.gmra.mxu2 %v3070_v58  ;;  %4071 = vmatmul.f32.gmra.mxu0 %v3071_v47  ;;  %v3795_v36 = vadd.f32 %v6952_v27, %v3730_v11  ;;  %v8073_v27 = vld [vmem:[#allocation156_spill] sm:$0xff]  ;;  %v3395_v11 = vld [vmem:[#allocation5 + $0x668] sm:$0xff] }
 0x975   : > { %4136 = vmatmul.f32.gmra.mxu3 %v3072_v46  ;;  %v2989_v57 = vmul.f32 %v8073_v27, %v6433_v7  ;;  %4228 = vmatpush.msra.mxu2 %v3395_v11  ;;  %v3376_v27 = vld [vmem:[#allocation5 + $0x5d0] sm:$0xff] }
 0x976   : > { %v7068_v59 = vadd.f32 %v6964_v28, %v3795_v36  ;;  %4357 = vmatpush.msrb.mxu3 %v3428_v39  ;;  %v8075_v28 = vld [vmem:[#allocation159_spill] sm:$0xff]  ;;  %4293 = vmatpush.msrb.mxu0 %v3411_v50  ;;  %v3410_v39 = vld [vmem:[#allocation5 + $0x6e0] sm:$0xff]  ;;  %v3425_v50 = vld [vmem:[#allocation5 + $0x758] sm:$0xff] }
 0x977   : > { %v7065_v54 = vpop.f32.mrf.mxu2  ;;  %v3667_v47 = vpop.f32.mrf.mxu1  ;;  %v3086_v36 = vmul.f32 %v8075_v28, %v6568_v56  ;;  %4166 = vmatpush.msrb.mxu1 %v3376_v27 }
 0x978   : > { %8072 = vst [vmem:[#allocation89_spill] sm:$0xff] %v7068_v59  ;;  %v7070_v58 = vpop.f32.mrf.mxu3  ;;  %v3668_v46 = vadd.f32 %v3667_v47, %v6778_v0  ;;  %4358 = vmatpush.msrb.mxu3 %v3427_v5  ;;  %v3394_v0 = vld [vmem:[#allocation5 + $0x660] sm:$0xff]  ;;  %v3409_v59 = vld [vmem:[#allocation5 + $0x6d8] sm:$0xff]  ;;  %4294 = vmatpush.msrb.mxu0 %v3410_v39 }
 0x979   : > { %v3426_v47 = vld [vmem:[#allocation5 + $0x760] sm:$0xff]  ;;  %4229 = vmatpush.msra.mxu2 %v3394_v0  ;;  %v7088_v5 = vpop.f32.mrf.mxu0  ;;  %v8079_v0 = vld [vmem:[#allocation163_spill] sm:$0xff] }
 0x97a   : > { %v3733_v17 = vadd.f32 %v6976_v52, %v3668_v46  ;;  %3926 = vmatmul.f32.gmra.mxu1 %v2989_v57  ;;  %4359 = vmatpush.msrb.mxu3 %v3426_v47  ;;  %v3392_v52 = vld [vmem:[#allocation5 + $0x650] sm:$0xff]  ;;  %v3102_v39 = vmul.f32 %v8079_v0, %v6591_v55  ;;  %v8080_v47 = vld [vmem:[#allocation165_spill] sm:$0xff]  ;;  %v3389_v0 = vld [vmem:[#allocation5 + $0x638] sm:$0xff] }
 0x97b   : > { %v3408_v57 = vld [vmem:[#allocation5 + $0x6d0] sm:$0xff]  ;;  %4230 = vmatpush.msra.mxu2 %v3393_v29  ;;  %4295 = vmatpush.msrb.mxu0 %v3409_v59  ;;  %v3104_v59 = vmul.f32 %v8080_v47, %v6591_v55 }
 0x97c   : > { %4009 = vmatmul.f32.gmra.mxu2 %v3086_v36  ;;  %4074 = vmatmul.f32.gmra.mxu0 %v3087_v49  ;;  %v3798_v11 = vadd.f32 %v6968_v4, %v3733_v17  ;;  %v3424_v36 = vld [vmem:[#allocation5 + $0x750] sm:$0xff]  ;;  %v3005_v4 = vmul.f32 %v8077_v40, %v6456_v32  ;;  %v3390_v40 = vld [vmem:[#allocation5 + $0x640] sm:$0xff] }
 0x97d   : > { %4139 = vmatmul.f32.gmra.mxu3 %v3088_v25  ;;  %v8078_v25 = vld [vmem:[#allocation162_spill] sm:$0xff]  ;;  %4231 = vmatpush.msra.mxu2 %v3392_v52 }
 0x97e   : > { %v7086_v46 = vadd.f32 %v6980_v13, %v3798_v11  ;;  %4360 = vmatpush.msrb.mxu3 %v3425_v50  ;;  %v3103_v27 = vmul.f32 %v8078_v25, %v6594_v19  ;;  %4296 = vmatpush.msrb.mxu0 %v3408_v57  ;;  %v3375_v11 = vld [vmem:[#allocation5 + $0x5c8] sm:$0xff]  ;;  %v3406_v25 = vld [vmem:[#allocation5 + $0x6c0] sm:$0xff] }
 0x97f   : > { %v7083_v28 = vpop.f32.mrf.mxu2  ;;  %v3670_v49 = vpop.f32.mrf.mxu1  ;;  %v3407_v50 = vld [vmem:[#allocation5 + $0x6c8] sm:$0xff]  ;;  %4167 = vmatpush.msrb.mxu1 %v3375_v11  ;;  %v3422_v57 = vld [vmem:[#allocation5 + $0x740] sm:$0xff]  ;;  %v8083_v11 = vld [vmem:[#allocation167_spill] sm:$0xff] }
 0x980   : > { %v3671_v17 = vadd.f32 %v3670_v49, %v6789_v48  ;;  %v7097_v13 = vpop.f32.mrf.mxu3  ;;  %4361 = vmatpush.msrb.mxu3 %v3424_v36  ;;  %v3391_v48 = vld [vmem:[#allocation5 + $0x648] sm:$0xff]  ;;  %4297 = vmatpush.msrb.mxu0 %v3407_v50  ;;  %v8084_v50 = vld [vmem:[#allocation169_spill] sm:$0xff] }
 0x981   : > { %v3423_v49 = vld [vmem:[#allocation5 + $0x748] sm:$0xff]  ;;  %4232 = vmatpush.msra.mxu2 %v3391_v48  ;;  %v3118_v48 = vmul.f32 %v8083_v11, %v6614_v60  ;;  %v8085_v11 = vld [vmem:[#allocation168_spill] sm:$0xff] }
 0x982   : > { %v3736_v29 = vadd.f32 %v6992_v61, %v3671_v17  ;;  %3929 = vmatmul.f32.gmra.mxu1 %v3005_v4  ;;  %4362 = vmatpush.msrb.mxu3 %v3423_v49  ;;  %v3405_v61 = vld [vmem:[#allocation5 + $0x6b8] sm:$0xff]  ;;  %v3120_v49 = vmul.f32 %v8084_v50, %v6614_v60 }
 0x983   : > { %4233 = vmatpush.msra.mxu2 %v3390_v40  ;;  %4298 = vmatpush.msrb.mxu0 %v3406_v25  ;;  %v3374_v25 = vld [vmem:[#allocation5 + $0x5c0] sm:$0xff] }
 0x984   : > { %4012 = vmatmul.f32.gmra.mxu2 %v3102_v39  ;;  %4077 = vmatmul.f32.gmra.mxu0 %v3103_v27  ;;  %v3801_v52 = vadd.f32 %v6984_v51, %v3736_v29  ;;  %v3421_v27 = vld [vmem:[#allocation5 + $0x738] sm:$0xff] }
 0x985   : > { %4142 = vmatmul.f32.gmra.mxu3 %v3104_v59  ;;  %v8081_v39 = vld [vmem:[#allocation164_spill] sm:$0xff]  ;;  %v8082_v59 = vld [vmem:[#allocation166_spill] sm:$0xff]  ;;  %4234 = vmatpush.msra.mxu2 %v3389_v0 }
 0x986   : > { %v7104_v4 = vadd.f32 %v6996_v26, %v3801_v52  ;;  %v3021_v47 = vmul.f32 %v8081_v39, %v6479_v43  ;;  %4363 = vmatpush.msrb.mxu3 %v3422_v57  ;;  %v3119_v29 = vmul.f32 %v8082_v59, %v6617_v30  ;;  %v7115_v26 = vpop.f32.mrf.mxu0  ;;  %4299 = vmatpush.msrb.mxu0 %v3405_v61  ;;  %v3404_v52 = vld [vmem:[#allocation5 + $0x6b0] sm:$0xff]  ;;  %v3387_v39 = vld [vmem:[#allocation5 + $0x628] sm:$0xff] }
 0x987   : > { %v3673_v36 = vpop.f32.mrf.mxu1  ;;  %v7106_v17 = vpop.f32.mrf.mxu2  ;;  %4168 = vmatpush.msrb.mxu1 %v3374_v25  ;;  %v3403_v0 = vld [vmem:[#allocation5 + $0x6a8] sm:$0xff] }
 0x988   : > { %v3674_v51 = vadd.f32 %v3673_v36, %v6802_v37  ;;  %4364 = vmatpush.msrb.mxu3 %v3421_v27  ;;  %v3388_v37 = vld [vmem:[#allocation5 + $0x630] sm:$0xff]  ;;  %v7120_v57 = vpop.f32.mrf.mxu3  ;;  %4300 = vmatpush.msrb.mxu0 %v3404_v52  ;;  %v3419_v59 = vld [vmem:[#allocation5 + $0x728] sm:$0xff]  ;;  %v3402_v27 = vld [vmem:[#allocation5 + $0x6a0] sm:$0xff] }
 0x989   : > { %v3420_v36 = vld [vmem:[#allocation5 + $0x730] sm:$0xff]  ;;  %4235 = vmatpush.msra.mxu2 %v3388_v37  ;;  %v3136_v37 = vmul.f32 %v6319_v1, %v6637_v34  ;;  %v3383_v1 = vld [vmem:[#allocation5 + $0x608] sm:$0xff] }
 0x98a   : > { %v3739_v40 = vadd.f32 %v7008_v63, %v3674_v51  ;;  %3932 = vmatmul.f32.gmra.mxu1 %v3021_v47  ;;  %4365 = vmatpush.msrb.mxu3 %v3420_v36  ;;  %v3386_v63 = vld [vmem:[#allocation5 + $0x620] sm:$0xff]  ;;  %v3417_v36 = vld [vmem:[#allocation5 + $0x718] sm:$0xff] }
 0x98b   : > { %4236 = vmatpush.msra.mxu2 %v3387_v39  ;;  %4301 = vmatpush.msrb.mxu0 %v3403_v0  ;;  %v3373_v0 = vld [vmem:[#allocation5 + $0x5b8] sm:$0xff] }
 0x98c   : > { %4015 = vmatmul.f32.gmra.mxu2 %v3118_v48  ;;  %4080 = vmatmul.f32.gmra.mxu0 %v3119_v29  ;;  %v3804_v61 = vadd.f32 %v7000_v44, %v3739_v40  ;;  %v3418_v29 = vld [vmem:[#allocation5 + $0x720] sm:$0xff]  ;;  %v3037_v48 = vmul.f32 %v8085_v11, %v6502_v35  ;;  %v8086_v44 = vld [vmem:[#allocation170_spill] sm:$0xff]  ;;  %v3134_v40 = vmul.f32 %v6315_v24, %v6637_v34  ;;  %v3384_v24 = vld [vmem:[#allocation5 + $0x610] sm:$0xff] }
 0x98d   : > { %4145 = vmatmul.f32.gmra.mxu3 %v3120_v49  ;;  %v3135_v49 = vmul.f32 %v8086_v44, %v6640_v14  ;;  %4237 = vmatpush.msra.mxu2 %v3386_v63 }
 0x98e   : > { %v7124_v47 = vadd.f32 %v7010_v6, %v3804_v61  ;;  %4366 = vmatpush.msrb.mxu3 %v3419_v59  ;;  %4302 = vmatpush.msrb.mxu0 %v3402_v27  ;;  %v3385_v6 = vld [vmem:[#allocation5 + $0x618] sm:$0xff]  ;;  %v7138_v39 = vpop.f32.mrf.mxu0  ;;  %v3400_v61 = vld [vmem:[#allocation5 + $0x690] sm:$0xff] }
 0x98f   : > { %v3676_v51 = vpop.f32.mrf.mxu1  ;;  %v7133_v25 = vpop.f32.mrf.mxu2  ;;  %4238 = vmatpush.msra.mxu2 %v3385_v6  ;;  %v3416_v59 = vld [vmem:[#allocation5 + $0x710] sm:$0xff]  ;;  %4169 = vmatpush.msrb.mxu1 %v3373_v0  ;;  %v8089_v6 = vld [vmem:[#allocation173_spill] sm:$0xff] }
 0x990   : > { %v3677_v50 = vadd.f32 %v3676_v51, %v6814_v22  ;;  %4367 = vmatpush.msrb.mxu3 %v3418_v29  ;;  %v3401_v22 = vld [vmem:[#allocation5 + $0x698] sm:$0xff]  ;;  %v7141_v27 = vpop.f32.mrf.mxu3  ;;  %v3415_v51 = vld [vmem:[#allocation5 + $0x708] sm:$0xff]  ;;  %v3414_v0 = vld [vmem:[#allocation5 + $0x700] sm:$0xff] }
 0x991   : > { %4303 = vmatpush.msrb.mxu0 %v3401_v22  ;;  %4239 = vmatpush.msra.mxu2 %v3384_v24  ;;  %v3372_v24 = vld [vmem:[#allocation5 + $0x5b0] sm:$0xff] }
 0x992   : > { %v3742_v52 = vadd.f32 %v7025_v42, %v3677_v50  ;;  %3935 = vmatmul.f32.gmra.mxu1 %v3037_v48  ;;  %4368 = vmatpush.msrb.mxu3 %v3417_v36  ;;  %v3399_v42 = vld [vmem:[#allocation5 + $0x688] sm:$0xff]  ;;  %v3382_v48 = vld [vmem:[#allocation5 + $0x600] sm:$0xff]  ;;  %v8087_v50 = vld [vmem:[#allocation171_spill] sm:$0xff] }
 0x993   : > { %4304 = vmatpush.msrb.mxu0 %v3400_v61  ;;  %v3053_v44 = vmul.f32 %v8087_v50, %v6525_v53  ;;  %4240 = vmatpush.msra.mxu2 %v3383_v1  ;;  %v8093_v50 = vld [vmem:[#allocation176_spill] sm:$0xff] }
 0x994   : > { %4018 = vmatmul.f32.gmra.mxu2 %v3134_v40  ;;  %4083 = vmatmul.f32.gmra.mxu0 %v3135_v49  ;;  %v3807_v63 = vadd.f32 %v7019_v16, %v3742_v52  ;;  %v8088_v49 = vld [vmem:[#allocation172_spill] sm:$0xff]  ;;  %v8090_v52 = vld [vmem:[#allocation175_spill] sm:$0xff] }
 0x995   : > { %4148 = vmatmul.f32.gmra.mxu3 %v3136_v37  ;;  %v3151_v40 = vmul.f32 %v8088_v49, %v6663_v10  ;;  %v3150_v37 = vmul.f32 %v8089_v6, %v6660_v21  ;;  %4305 = vmatpush.msrb.mxu0 %v3399_v42  ;;  %v3152_v22 = vmul.f32 %v8090_v52, %v6660_v21  ;;  %v8091_v42 = vld [vmem:[#allocation174_spill] sm:$0xff] }
 0x996   : > { %v7144_v29 = vadd.f32 %v7030_v20, %v3807_v63  ;;  %4369 = vmatpush.msrb.mxu3 %v3416_v59  ;;  %v3398_v20 = vld [vmem:[#allocation5 + $0x680] sm:$0xff]  ;;  %4241 = vmatpush.msra.mxu2 %v3382_v48  ;;  %v7159_v59 = vpop.f32.mrf.mxu0  ;;  %v8092_v48 = vld [vmem:[#allocation68_spill] sm:$0xff] }
 0x997   : > { %v3679_v11 = vpop.f32.mrf.mxu1  ;;  %4306 = vmatpush.msrb.mxu0 %v3398_v20  ;;  %4170 = vmatpush.msrb.mxu1 %v3372_v24 }
 0x998   : > { %v3680_v16 = vadd.f32 %v3679_v11, %v6826_v12  ;;  %4370 = vmatpush.msrb.mxu3 %v3415_v51  ;;  %v7156_v12 = vpop.f32.mrf.mxu2  ;;  %v3069_v51 = vmul.f32 %v8091_v42, %v6548_v45  ;;  %v8100_v42 = vld [vmem:[#allocation180_spill] sm:$0xff] }
 0x99a   : > { %v3745_v36 = vadd.f32 %v7045_v3, %v3680_v16  ;;  %3938 = vmatmul.f32.gmra.mxu1 %v3053_v44  ;;  %4371 = vmatpush.msrb.mxu3 %v3414_v0  ;;  %v7164_v3 = vpop.f32.mrf.mxu3  ;;  %v3167_v44 = vmul.f32 %v8093_v50, %v8092_v48  ;;  %v8094_v16 = vld [vmem:[#allocation22_spill] sm:$0xff] }
 0x99b   : > { %v8097_v0 = vld [vmem:[#allocation178_spill] sm:$0xff] }
 0x99c   : > { %4021 = vmatmul.f32.gmra.mxu2 %v3150_v37  ;;  %4086 = vmatmul.f32.gmra.mxu0 %v3151_v40  ;;  %v3810_v61 = vadd.f32 %v7042_v8, %v3745_v36  ;;  %v8095_v8 = vld [vmem:[#allocation177_spill] sm:$0xff]  ;;  %v8096_v40 = vld [vmem:[#allocation179_spill] sm:$0xff]  ;;  %v3371_v37 = vld [vmem:[#allocation5 + $0x5a8] sm:$0xff]  ;;  %v3085_v24 = vmul.f32 %v8097_v0, %v6571_v33 }
 0x99d   : > { %4151 = vmatmul.f32.gmra.mxu3 %v3152_v22  ;;  %v3166_v49 = vmul.f32 %v8095_v8, %v8094_v16  ;;  %v3168_v6 = vmul.f32 %v8096_v40, %v8094_v16  ;;  %4171 = vmatpush.msrb.mxu1 %v3371_v37  ;;  %v8102_v50 = vld [vmem:[#allocation182_spill] sm:$0xff]  ;;  %v8103_v8 = vld [vmem:[#allocation184_spill] sm:$0xff]  ;;  %v3370_v40 = vld [vmem:[#allocation5 + $0x5a0] sm:$0xff] }
 0x99e   : > { %v7162_v63 = vadd.f32 %v7050_v38, %v3810_v61  ;;  %v7182_v22 = vpop.f32.mrf.mxu0 }
 0x99f   : > { %v3682_v1 = vpop.f32.mrf.mxu1  ;;  %4172 = vmatpush.msrb.mxu1 %v3370_v40 }
 0x9a0   : > { %v3683_v11 = vadd.f32 %v3682_v1, %v6838_v2  ;;  %v7177_v2 = vpop.f32.mrf.mxu2  ;;  %v8099_v1 = vld [vmem:[#allocation72_spill] sm:$0xff] }
 0x9a2   : > { %v3748_v38 = vadd.f32 %v7065_v54, %v3683_v11  ;;  %3941 = vmatmul.f32.gmra.mxu1 %v3069_v51  ;;  %v8098_v54 = vld [vmem:[#allocation67_spill] sm:$0xff]  ;;  %v3183_v51 = vmul.f32 %v8100_v42, %v8099_v1 }
 0x9a3   : > { %v8101_v11 = vld [vmem:[#allocation23_spill] sm:$0xff] }
 0x9a4   : > { %4024 = vmatmul.f32.gmra.mxu2 %v3166_v49  ;;  %4089 = vmatmul.f32.gmra.mxu0 %v3167_v44  ;;  %v3813_v20 = vadd.f32 %v7063_v9, %v3748_v38  ;;  %v3182_v44 = vmul.f32 %v8102_v50, %v8101_v11  ;;  %v7191_v9 = vpop.f32.mrf.mxu3 }
 0x9a5   : > { %4154 = vmatmul.f32.gmra.mxu3 %v3168_v6 }
 0x9a6   : > { %v7180_v52 = vadd.f32 %v7070_v58, %v3813_v20  ;;  %v3184_v58 = vmul.f32 %v8103_v8, %v8101_v11 }
 0x9a7   : > { %v3685_v36 = vpop.f32.mrf.mxu1 }
 0x9a8   : > { %v3686_v61 = vadd.f32 %v3685_v36, %v8098_v54  ;;  %v7200_v37 = vpop.f32.mrf.mxu2  ;;  %v8104_v36 = vld [vmem:[#allocation183_spill] sm:$0xff]  ;;  %v8105_v54 = vld [vmem:[#allocation70_spill] sm:$0xff] }
 0x9a9   : > { %v3101_v0 = vmul.f32 %v8104_v36, %v6594_v19  ;;  %v8110_v36 = vld [vmem:[#allocation188_spill] sm:$0xff] }
 0x9aa   : > { %v3751_v49 = vadd.f32 %v7083_v28, %v3686_v61  ;;  %3944 = vmatmul.f32.gmra.mxu1 %v3085_v24  ;;  %v8106_v28 = vld [vmem:[#allocation185_spill] sm:$0xff] }
 0x9ab   : > { %v2947_v24 = vmul.f32 %v8106_v28, %v6364_v31  ;;  %v8107_v61 = vld [vmem:[#allocation181_spill] sm:$0xff] }
 0x9ac   : > { %4027 = vmatmul.f32.gmra.mxu2 %v3182_v44  ;;  %4092 = vmatmul.f32.gmra.mxu0 %v3183_v51  ;;  %v3816_v6 = vadd.f32 %v7088_v5, %v3751_v49  ;;  %v8108_v51 = vld [vmem:[#allocation187_spill] sm:$0xff]  ;;  %v7209_v44 = vpop.f32.mrf.mxu0  ;;  %v8109_v5 = vld [vmem:[#allocation189_spill] sm:$0xff]  ;;  %v7214_v49 = vpop.f32.mrf.mxu3 }
 0x9ad   : > { %4157 = vmatmul.f32.gmra.mxu3 %v3184_v58  ;;  %v2946_v50 = vmul.f32 %v8108_v51, %v8107_v61  ;;  %v3369_v58 = vld [vmem:[#allocation5 + $0x598] sm:$0xff]  ;;  %v8111_v28 = vld [vmem:[#allocation73_spill] sm:$0xff] }
 0x9ae   : > { %v7198_v38 = vadd.f32 %v7097_v13, %v3816_v6  ;;  %v2948_v13 = vmul.f32 %v8109_v5, %v8107_v61  ;;  %4173 = vmatpush.msrb.mxu1 %v3369_v58  ;;  %v8114_v51 = vld [vmem:[#allocation192_spill] sm:$0xff]  ;;  %v8115_v5 = vld [vmem:[#allocation194_spill] sm:$0xff] }
 0x9af   : > { %v3688_v20 = vpop.f32.mrf.mxu1 }
 0x9b0   : > { %v3689_v42 = vadd.f32 %v3688_v20, %v8105_v54  ;;  %v3117_v54 = vmul.f32 %v8110_v36, %v6617_v30 }
 0x9b2   : > { %v3754_v8 = vadd.f32 %v7106_v17, %v3689_v42  ;;  %3947 = vmatmul.f32.gmra.mxu1 %v3101_v0  ;;  %v8112_v17 = vld [vmem:[#allocation190_spill] sm:$0xff] }
 0x9b3   : > { %v2963_v0 = vmul.f32 %v8112_v17, %v6387_v23  ;;  %v8113_v42 = vld [vmem:[#allocation186_spill] sm:$0xff] }
 0x9b4   : > { %4242 = vmatmul.f32.vlgmr.msra.gmra.mxu2 %v2946_v50  ;;  %4307 = vmatmul.f32.vlgmr.msrb.gmra.mxu0 %v2947_v24  ;;  %v3819_v40 = vadd.f32 %v7115_v26, %v3754_v8  ;;  %v2962_v50 = vmul.f32 %v8114_v51, %v8113_v42  ;;  %v7227_v24 = vpop.f32.mrf.mxu2  ;;  %v2964_v26 = vmul.f32 %v8115_v5, %v8113_v42  ;;  %v7232_v8 = vpop.f32.mrf.mxu0  ;;  %v3366_v42 = vld [vmem:[#allocation5 + $0x580] sm:$0xff] }
 0x9b5   : > { %4372 = vmatmul.f32.vlgmr.msrb.gmra.mxu3 %v2948_v13  ;;  %v3368_v13 = vld [vmem:[#allocation5 + $0x590] sm:$0xff]  ;;  %v8120_v5 = vld [vmem:[#allocation197_spill] sm:$0xff] }
 0x9b6   : > { %v7218_v6 = vadd.f32 %v7120_v57, %v3819_v40  ;;  %4174 = vmatpush.msrb.mxu1 %v3368_v13  ;;  %v7235_v40 = vpop.f32.mrf.mxu3 }
 0x9b7   : > { %v3691_v20 = vpop.f32.mrf.mxu1 }
 0x9b8   : > { %v3692_v61 = vadd.f32 %v3691_v20, %v8111_v28  ;;  %v3367_v20 = vld [vmem:[#allocation5 + $0x588] sm:$0xff] }
 0x9b9   : > { %4175 = vmatpush.msrb.mxu1 %v3367_v20 }
 0x9ba   : > { %v3757_v57 = vadd.f32 %v7133_v25, %v3692_v61  ;;  %3950 = vmatmul.f32.gmra.mxu1 %v3117_v54  ;;  %v8116_v25 = vld [vmem:[#allocation193_spill] sm:$0xff]  ;;  %v8117_v61 = vld [vmem:[#allocation75_spill] sm:$0xff] }
 0x9bb   : > { %v3133_v54 = vmul.f32 %v8116_v25, %v6640_v14  ;;  %4176 = vmatpush.msrb.mxu1 %v3366_v42  ;;  %v8122_v42 = vld [vmem:[#allocation198_spill] sm:$0xff] }
 0x9bc   : > { %4245 = vmatmul.f32.gmra.mxu2 %v2962_v50  ;;  %4310 = vmatmul.f32.gmra.mxu0 %v2963_v0  ;;  %v3822_v58 = vadd.f32 %v7138_v39, %v3757_v57  ;;  %v8118_v0 = vld [vmem:[#allocation195_spill] sm:$0xff]  ;;  %v7250_v13 = vpop.f32.mrf.mxu2  ;;  %v7253_v20 = vpop.f32.mrf.mxu0 }
 0x9bd   : > { %4375 = vmatmul.f32.gmra.mxu3 %v2964_v26  ;;  %v2979_v51 = vmul.f32 %v8118_v0, %v6410_v18  ;;  %v8119_v50 = vld [vmem:[#allocation191_spill] sm:$0xff]  ;;  %v3149_v0 = vmul.f32 %v8122_v42, %v6663_v10 }
 0x9be   : > { %v7238_v36 = vadd.f32 %v7141_v27, %v3822_v58  ;;  %v2978_v39 = vmul.f32 %v8120_v5, %v8119_v50  ;;  %v8121_v26 = vld [vmem:[#allocation199_spill] sm:$0xff]  ;;  %v7258_v25 = vpop.f32.mrf.mxu3  ;;  %v8126_v5 = vld [vmem:[#allocation202_spill] sm:$0xff] }
 0x9bf   : > { %v3694_v28 = vpop.f32.mrf.mxu1  ;;  %v2980_v57 = vmul.f32 %v8121_v26, %v8119_v50 }
 0x9c0   : > { %v3695_v17 = vadd.f32 %v3694_v28, %v8117_v61 }
 0x9c2   : > { %v3760_v27 = vadd.f32 %v7156_v12, %v3695_v17  ;;  %3953 = vmatmul.f32.gmra.mxu1 %v3133_v54  ;;  %v8123_v12 = vld [vmem:[#allocation78_spill] sm:$0xff]  ;;  %v8124_v17 = vld [vmem:[#allocation200_spill] sm:$0xff] }
 0x9c3   : > { %v2995_v50 = vmul.f32 %v8124_v17, %v6433_v7 }
 0x9c4   : > { %4248 = vmatmul.f32.gmra.mxu2 %v2978_v39  ;;  %4313 = vmatmul.f32.gmra.mxu0 %v2979_v51  ;;  %v3825_v58 = vadd.f32 %v7159_v59, %v3760_v27  ;;  %v8125_v51 = vld [vmem:[#allocation196_spill] sm:$0xff]  ;;  %v3986_v27 = vpop.f32.mrf.mxu2 }
 0x9c5   : > { %4378 = vmatmul.f32.gmra.mxu3 %v2980_v57  ;;  %v2994_v39 = vmul.f32 %v8126_v5, %v8125_v51  ;;  %v8127_v59 = vld [vmem:[#allocation204_spill] sm:$0xff]  ;;  %v8130_v5 = vld [vmem:[#allocation81_spill] sm:$0xff] }
 0x9c6   : > { %v7256_v28 = vadd.f32 %v7164_v3, %v3825_v58  ;;  %v2996_v26 = vmul.f32 %v8127_v59, %v8125_v51  ;;  %v7283_v59 = vpop.f32.mrf.mxu3 }
 0x9c7   : > { %v3697_v61 = vpop.f32.mrf.mxu1 }
 0x9c8   : > { %v3698_v54 = vadd.f32 %v3697_v61, %v8123_v12  ;;  %v7274_v61 = vpop.f32.mrf.mxu0  ;;  %v8129_v12 = vld [vmem:[#allocation203_spill] sm:$0xff] }
 0x9c9   : > { %v3165_v17 = vmul.f32 %v8129_v12, %v8092_v48 }
 0x9ca   : > { %v3763_v3 = vadd.f32 %v7177_v2, %v3698_v54  ;;  %3956 = vmatmul.f32.gmra.mxu1 %v3149_v0  ;;  %v8131_v2 = vld [vmem:[#allocation205_spill] sm:$0xff] }
 0x9cb   : > { %v3011_v0 = vmul.f32 %v8131_v2, %v6456_v32  ;;  %v8132_v54 = vld [vmem:[#allocation201_spill] sm:$0xff]  ;;  %v8135_v2 = vld [vmem:[#allocation208_spill] sm:$0xff] }
 0x9cc   : > { %4251 = vmatmul.f32.gmra.mxu2 %v2994_v39  ;;  %4316 = vmatmul.f32.gmra.mxu0 %v2995_v50  ;;  %v3828_v57 = vadd.f32 %v7182_v22, %v3763_v3  ;;  %v8133_v50 = vld [vmem:[#allocation207_spill] sm:$0xff]  ;;  %v8134_v22 = vld [vmem:[#allocation209_spill] sm:$0xff]  ;;  %v3445_v3 = vld [vmem:[#allocation5 + $0x7f8] sm:$0xff]  ;;  %v3989_v12 = vpop.f32.mrf.mxu2 }
 0x9cd   : > { %4381 = vmatmul.f32.gmra.mxu3 %v2996_v26  ;;  %v3010_v39 = vmul.f32 %v8133_v50, %v8132_v54  ;;  %4421 = vmatpush.msra.mxu1 %v3445_v3  ;;  %v3181_v50 = vmul.f32 %v8135_v2, %v8099_v1  ;;  %v8141_v2 = vld [vmem:[#allocation213_spill] sm:$0xff] }
 0x9ce   : > { %v7272_v58 = vadd.f32 %v7191_v9, %v3828_v57  ;;  %v3012_v9 = vmul.f32 %v8134_v22, %v8132_v54  ;;  %v4119_v3 = vpop.f32.mrf.mxu3 }
 0x9cf   : > { %v3700_v42 = vpop.f32.mrf.mxu1 }
 0x9d0   : > { %8128 = vst [vmem:[#allocation88_spill] sm:$0xff] %v7272_v58  ;;  %v3701_v51 = vadd.f32 %v3700_v42, %v8130_v5  ;;  %v8136_v58 = vld [vmem:[#allocation82_spill] sm:$0xff]  ;;  %v4054_v22 = vpop.f32.mrf.mxu0 }
 0x9d2   : > { %v3766_v26 = vadd.f32 %v7200_v37, %v3701_v51  ;;  %3959 = vmatmul.f32.gmra.mxu1 %v3165_v17  ;;  %v8137_v37 = vld [vmem:[#allocation210_spill] sm:$0xff] }
 0x9d3   : > { %v3027_v17 = vmul.f32 %v8137_v37, %v6479_v43  ;;  %v8138_v51 = vld [vmem:[#allocation206_spill] sm:$0xff]  ;;  %v2945_v37 = vmul.f32 %v8141_v2, %v6364_v31  ;;  %v8146_v2 = vld [vmem:[#allocation25_spill] sm:$0xff] }
 0x9d4   : > { %4254 = vmatmul.f32.gmra.mxu2 %v3010_v39  ;;  %4319 = vmatmul.f32.gmra.mxu0 %v3011_v0  ;;  %v3831_v57 = vadd.f32 %v7209_v44, %v3766_v26  ;;  %v8139_v39 = vld [vmem:[#allocation212_spill] sm:$0xff]  ;;  %v3444_v26 = vld [vmem:[#allocation5 + $0x7f0] sm:$0xff] }
 0x9d5   : > { %4384 = vmatmul.f32.gmra.mxu3 %v3012_v9  ;;  %v3026_v0 = vmul.f32 %v8139_v39, %v8138_v51  ;;  %v8140_v9 = vld [vmem:[#allocation214_spill] sm:$0xff]  ;;  %4422 = vmatpush.msra.mxu1 %v3444_v26 }
 0x9d6   : > { %v7290_v42 = vadd.f32 %v7214_v49, %v3831_v57  ;;  %v3028_v44 = vmul.f32 %v8140_v9, %v8138_v51  ;;  %v8144_v39 = vld [vmem:[#allocation26_spill] sm:$0xff]  ;;  %v8145_v9 = vld [vmem:[#allocation27_spill] sm:$0xff]  ;;  %v4122_v26 = vpop.f32.mrf.mxu3 }
 0x9d7   : > { %v3703_v5 = vpop.f32.mrf.mxu1 }
 0x9d8   : > { %v3704_v54 = vadd.f32 %v3703_v5, %v8136_v58 }
 0x9da   : > { %v3769_v49 = vadd.f32 %v7227_v24, %v3704_v54  ;;  %3962 = vmatmul.f32.gmra.mxu1 %v3181_v50  ;;  %v8142_v24 = vld [vmem:[#allocation215_spill] sm:$0xff] }
 0x9db   : > { %v3043_v50 = vmul.f32 %v8142_v24, %v6502_v35  ;;  %v8143_v54 = vld [vmem:[#allocation211_spill] sm:$0xff]  ;;  %v2961_v24 = vmul.f32 %v8146_v2, %v6387_v23 }
 0x9dc   : > { %4257 = vmatmul.f32.gmra.mxu2 %v3026_v0  ;;  %4322 = vmatmul.f32.gmra.mxu0 %v3027_v17  ;;  %v3834_v58 = vadd.f32 %v7232_v8, %v3769_v49  ;;  %v3042_v0 = vmul.f32 %v8144_v39, %v8143_v54  ;;  %v3992_v17 = vpop.f32.mrf.mxu2  ;;  %v4057_v49 = vpop.f32.mrf.mxu0  ;;  %v8149_v39 = vld [vmem:[#allocation28_spill] sm:$0xff] }
 0x9dd   : > { %4387 = vmatmul.f32.gmra.mxu3 %v3028_v44  ;;  %v3044_v44 = vmul.f32 %v8145_v9, %v8143_v54  ;;  %v3442_v9 = vld [vmem:[#allocation5 + $0x7e0] sm:$0xff] }
 0x9de   : > { %v7304_v57 = vadd.f32 %v7235_v40, %v3834_v58  ;;  %v3443_v40 = vld [vmem:[#allocation5 + $0x7e8] sm:$0xff] }
 0x9df   : > { %v3918_v5 = vpop.f32.mrf.mxu1  ;;  %4423 = vmatpush.msra.mxu1 %v3443_v40  ;;  %v4125_v40 = vpop.f32.mrf.mxu3 }
 0x9e0   : > { %v3919_v51 = vadd.f32 %v3918_v5, %v7028_v15 }
 0x9e1   : > { %4424 = vmatpush.msra.mxu1 %v3442_v9 }
 0x9e2   : > { %v3984_v8 = vadd.f32 %v7250_v13, %v3919_v51  ;;  %4177 = vmatmul.f32.vlgmr.msrb.gmra.mxu1 %v2945_v37  ;;  %v8147_v13 = vld [vmem:[#allocation216_spill] sm:$0xff] }
 0x9e3   : > { %v3059_v37 = vmul.f32 %v8147_v13, %v6525_v53  ;;  %v8148_v51 = vld [vmem:[#allocation48_spill] sm:$0xff]  ;;  %v8153_v13 = vld [vmem:[#allocation17_spill] sm:$0xff] }
 0x9e4   : > { %4260 = vmatmul.f32.gmra.mxu2 %v3042_v0  ;;  %4325 = vmatmul.f32.gmra.mxu0 %v3043_v50  ;;  %v4049_v15 = vadd.f32 %v7253_v20, %v3984_v8  ;;  %v3058_v50 = vmul.f32 %v8148_v51, %v6522_v41  ;;  %v3060_v0 = vmul.f32 %v8149_v39, %v6522_v41  ;;  %v8151_v41 = vld [vmem:[#allocation89_spill] sm:$0xff] }
 0x9e5   : > { %4390 = vmatmul.f32.gmra.mxu3 %v3044_v44 }
 0x9e6   : > { %v7318_v58 = vadd.f32 %v7258_v25, %v4049_v15  ;;  %v3995_v25 = vpop.f32.mrf.mxu2 }
 0x9e7   : > { %v3921_v5 = vpop.f32.mrf.mxu1 }
 0x9e8   : > { %v3922_v54 = vadd.f32 %v3921_v5, %v7048_v62  ;;  %v4060_v62 = vpop.f32.mrf.mxu0  ;;  %v8150_v5 = vld [vmem:[#allocation29_spill] sm:$0xff] }
 0x9e9   : > { %v2977_v2 = vmul.f32 %v8150_v5, %v6410_v18  ;;  %v8156_v5 = vld [vmem:[#allocation52_spill] sm:$0xff] }
 0x9ea   : > { %v3987_v20 = vadd.f32 %v3986_v27, %v3922_v54  ;;  %4180 = vmatmul.f32.gmra.mxu1 %v2961_v24  ;;  %v8152_v24 = vld [vmem:[#allocation30_spill] sm:$0xff] }
 0x9eb   : > { %v3075_v54 = vmul.f32 %v8152_v24, %v6548_v45 }
 0x9ec   : > { %4263 = vmatmul.f32.gmra.mxu2 %v3058_v50  ;;  %4328 = vmatmul.f32.gmra.mxu0 %v3059_v37  ;;  %v4052_v44 = vadd.f32 %v7274_v61, %v3987_v20  ;;  %v8154_v37 = vld [vmem:[#allocation18_spill] sm:$0xff]  ;;  %v8155_v50 = vld [vmem:[#allocation32_spill] sm:$0xff] }
 0x9ed   : > { %4393 = vmatmul.f32.gmra.mxu3 %v3060_v0  ;;  %v3074_v51 = vmul.f32 %v8154_v37, %v8153_v13  ;;  %v3076_v61 = vmul.f32 %v8155_v50, %v8153_v13  ;;  %v8157_v13 = vld [vmem:[#allocation31_spill] sm:$0xff]  ;;  %v8159_v37 = vld [vmem:[#allocation56_spill] sm:$0xff] }
 0x9ee   : > { %v7331_v8 = vadd.f32 %v7283_v59, %v4052_v44  ;;  %v3441_v59 = vld [vmem:[#allocation5 + $0x7d8] sm:$0xff]  ;;  %v3998_v20 = vpop.f32.mrf.mxu2 }
 0x9ef   : > { %v3924_v15 = vpop.f32.mrf.mxu1  ;;  %4425 = vmatpush.msra.mxu1 %v3441_v59  ;;  %v8160_v59 = vld [vmem:[#allocation19_spill] sm:$0xff] }
 0x9f0   : > { %v3925_v27 = vadd.f32 %v3924_v15, %v8151_v41  ;;  %v4063_v44 = vpop.f32.mrf.mxu0  ;;  %v2993_v41 = vmul.f32 %v8156_v5, %v6433_v7  ;;  %v8161_v5 = vld [vmem:[#allocation35_spill] sm:$0xff] }
 0x9f2   : > { %v3990_v39 = vadd.f32 %v3989_v12, %v3925_v27  ;;  %4183 = vmatmul.f32.gmra.mxu1 %v2977_v2  ;;  %v3091_v12 = vmul.f32 %v8157_v13, %v6571_v33  ;;  %v8158_v2 = vld [vmem:[#allocation33_spill] sm:$0xff]  ;;  %v8163_v13 = vld [vmem:[#allocation20_spill] sm:$0xff] }
 0x9f3   : > { %v3090_v27 = vmul.f32 %v8158_v2, %v6568_v56 }
 0x9f4   : > { %4266 = vmatmul.f32.gmra.mxu2 %v3074_v51  ;;  %4331 = vmatmul.f32.gmra.mxu0 %v3075_v54  ;;  %v4055_v0 = vadd.f32 %v4054_v22, %v3990_v39  ;;  %v4128_v54 = vpop.f32.mrf.mxu3  ;;  %v3092_v22 = vmul.f32 %v8159_v37, %v6568_v56  ;;  %v3107_v56 = vmul.f32 %v8161_v5, %v6594_v19 }
 0x9f5   : > { %4396 = vmatmul.f32.gmra.mxu3 %v3076_v61 }
 0x9f6   : > { %v7342_v9 = vadd.f32 %v4119_v3, %v4055_v0  ;;  %v3440_v3 = vld [vmem:[#allocation5 + $0x7d0] sm:$0xff]  ;;  %v3009_v0 = vmul.f32 %v8160_v59, %v6456_v32 }
 0x9f7   : > { %v3927_v15 = vpop.f32.mrf.mxu1  ;;  %4426 = vmatpush.msra.mxu1 %v3440_v3 }
 0x9f8   : > { %v3928_v24 = vadd.f32 %v3927_v15, %v7086_v46  ;;  %v4001_v46 = vpop.f32.mrf.mxu2 }
 0x9fa   : > { %v3993_v51 = vadd.f32 %v3992_v17, %v3928_v24  ;;  %4186 = vmatmul.f32.gmra.mxu1 %v2993_v41  ;;  %v8162_v17 = vld [vmem:[#allocation34_spill] sm:$0xff]  ;;  %v4066_v24 = vpop.f32.mrf.mxu0 }
 0x9fb   : > { %v3106_v41 = vmul.f32 %v8162_v17, %v6591_v55 }
 0x9fc   : > { %4269 = vmatmul.f32.gmra.mxu2 %v3090_v27  ;;  %4334 = vmatmul.f32.gmra.mxu0 %v3091_v12  ;;  %v4058_v50 = vadd.f32 %v4057_v49, %v3993_v51  ;;  %v3108_v12 = vmul.f32 %v8163_v13, %v6591_v55  ;;  %v4131_v2 = vpop.f32.mrf.mxu3  ;;  %v8168_v13 = vld [vmem:[#allocation37_spill] sm:$0xff] }
 0x9fd   : > { %4399 = vmatmul.f32.gmra.mxu3 %v3092_v22  ;;  %v8164_v22 = vld [vmem:[#allocation36_spill] sm:$0xff] }
 0x9fe   : > { %v7353_v61 = vadd.f32 %v4122_v26, %v4058_v50  ;;  %v3439_v26 = vld [vmem:[#allocation5 + $0x7c8] sm:$0xff]  ;;  %v3025_v51 = vmul.f32 %v8164_v22, %v6479_v43  ;;  %v8165_v50 = vld [vmem:[#allocation60_spill] sm:$0xff] }
 0x9ff   : > { %v3930_v39 = vpop.f32.mrf.mxu1  ;;  %4427 = vmatpush.msra.mxu1 %v3439_v26  ;;  %v3123_v55 = vmul.f32 %v8165_v50, %v6617_v30  ;;  %v8170_v26 = vld [vmem:[#allocation64_spill] sm:$0xff] }
 0xa00   : > { %v3931_v15 = vadd.f32 %v3930_v39, %v7104_v4  ;;  %v4004_v59 = vpop.f32.mrf.mxu2 }
 0xa02   : > { %v3996_v49 = vadd.f32 %v3995_v25, %v3931_v15  ;;  %4189 = vmatmul.f32.gmra.mxu1 %v3009_v0  ;;  %v8166_v25 = vld [vmem:[#allocation38_spill] sm:$0xff]  ;;  %v8167_v0 = vld [vmem:[#allocation39_spill] sm:$0xff] }
 0xa03   : > { %v3122_v39 = vmul.f32 %v8166_v25, %v6614_v60  ;;  %v3124_v15 = vmul.f32 %v8167_v0, %v6614_v60  ;;  %v8169_v60 = vld [vmem:[#allocation21_spill] sm:$0xff] }
 0xa04   : > { %4272 = vmatmul.f32.gmra.mxu2 %v3106_v41  ;;  %4337 = vmatmul.f32.gmra.mxu0 %v3107_v56  ;;  %v4061_v27 = vadd.f32 %v4060_v62, %v3996_v49  ;;  %v3438_v62 = vld [vmem:[#allocation5 + $0x7c0] sm:$0xff] }
 0xa05   : > { %4402 = vmatmul.f32.gmra.mxu3 %v3108_v12  ;;  %4428 = vmatpush.msra.mxu1 %v3438_v62  ;;  %v3041_v12 = vmul.f32 %v8168_v13, %v6502_v35 }
 0xa06   : > { %v7364_v4 = vadd.f32 %v4125_v40, %v4061_v27  ;;  %v4069_v40 = vpop.f32.mrf.mxu0  ;;  %v3138_v27 = vmul.f32 %v8170_v26, %v6637_v34 }
 0xa07   : > { %v3933_v37 = vpop.f32.mrf.mxu1 }
 0xa08   : > { %v3934_v3 = vadd.f32 %v3933_v37, %v7124_v47  ;;  %v4134_v47 = vpop.f32.mrf.mxu3  ;;  %v8171_v37 = vld [vmem:[#allocation40_spill] sm:$0xff] }
 0xa09   : > { %v3140_v22 = vmul.f32 %v8171_v37, %v6637_v34  ;;  %v8173_v34 = vld [vmem:[#allocation42_spill] sm:$0xff] }
 0xa0a   : > { %v3999_v5 = vadd.f32 %v3998_v20, %v3934_v3  ;;  %4192 = vmatmul.f32.gmra.mxu1 %v3025_v51  ;;  %v3139_v20 = vmul.f32 %v8169_v60, %v6640_v14  ;;  %v8178_v37 = vld [vmem:[#allocation46_spill] sm:$0xff] }
 0xa0c   : > { %4275 = vmatmul.f32.gmra.mxu2 %v3122_v39  ;;  %4340 = vmatmul.f32.gmra.mxu0 %v3123_v55  ;;  %v4064_v56 = vadd.f32 %v4063_v44, %v3999_v5  ;;  %v3437_v44 = vld [vmem:[#allocation5 + $0x7b8] sm:$0xff]  ;;  %v8172_v39 = vld [vmem:[#allocation41_spill] sm:$0xff] }
 0xa0d   : > { %4405 = vmatmul.f32.gmra.mxu3 %v3124_v15  ;;  %4429 = vmatpush.msra.mxu1 %v3437_v44  ;;  %v3057_v0 = vmul.f32 %v8172_v39, %v6525_v53  ;;  %v8174_v5 = vld [vmem:[#allocation44_spill] sm:$0xff]  ;;  %v8179_v44 = vld [vmem:[#allocation51_spill] sm:$0xff] }
 0xa0e   : > { %v7375_v17 = vadd.f32 %v4128_v54, %v4064_v56  ;;  %v4007_v54 = vpop.f32.mrf.mxu2  ;;  %v4072_v50 = vpop.f32.mrf.mxu0  ;;  %v3154_v62 = vmul.f32 %v8174_v5, %v6660_v21  ;;  %v8175_v56 = vld [vmem:[#allocation45_spill] sm:$0xff]  ;;  %v8181_v5 = vld [vmem:[#allocation24_spill] sm:$0xff] }
 0xa0f   : > { %v3936_v41 = vpop.f32.mrf.mxu1 }
 0xa10   : > { %v3937_v49 = vadd.f32 %v3936_v41, %v7144_v29  ;;  %v4137_v55 = vpop.f32.mrf.mxu3  ;;  %v3156_v41 = vmul.f32 %v8175_v56, %v6660_v21  ;;  %v8177_v21 = vld [vmem:[#allocation47_spill] sm:$0xff] }
 0xa12   : > { %v4002_v51 = vadd.f32 %v4001_v46, %v3937_v49  ;;  %4195 = vmatmul.f32.gmra.mxu1 %v3041_v12  ;;  %v3155_v46 = vmul.f32 %v8173_v34, %v6663_v10 }
 0xa14   : > { %4278 = vmatmul.f32.gmra.mxu2 %v3138_v27  ;;  %4343 = vmatmul.f32.gmra.mxu0 %v3139_v20  ;;  %v4067_v3 = vadd.f32 %v4066_v24, %v4002_v51  ;;  %v8176_v20 = vld [vmem:[#allocation43_spill] sm:$0xff] }
 0xa15   : > { %4408 = vmatmul.f32.gmra.mxu3 %v3140_v22  ;;  %v3073_v26 = vmul.f32 %v8176_v20, %v6548_v45  ;;  %v3170_v22 = vmul.f32 %v8178_v37, %v8094_v16  ;;  %v8184_v20 = vld [vmem:[#allocation50_spill] sm:$0xff] }
 0xa16   : > { %v7386_v29 = vadd.f32 %v4131_v2, %v4067_v3  ;;  %v3436_v2 = vld [vmem:[#allocation5 + $0x7b0] sm:$0xff]  ;;  %v4010_v12 = vpop.f32.mrf.mxu2 }
 0xa17   : > { %v3939_v25 = vpop.f32.mrf.mxu1  ;;  %4430 = vmatpush.msra.mxu1 %v3436_v2 }
 0xa18   : > { %v3940_v15 = vadd.f32 %v3939_v25, %v7162_v63  ;;  %v4075_v63 = vpop.f32.mrf.mxu0  ;;  %v4140_v51 = vpop.f32.mrf.mxu3 }
 0xa1a   : > { %v4005_v24 = vadd.f32 %v4004_v59, %v3940_v15  ;;  %4198 = vmatmul.f32.gmra.mxu1 %v3057_v0  ;;  %v3171_v59 = vmul.f32 %v8177_v21, %v8092_v48  ;;  %v8180_v15 = vld [vmem:[#allocation49_spill] sm:$0xff] }
 0xa1b   : > { %v3089_v34 = vmul.f32 %v8180_v15, %v6571_v33  ;;  %v3431_v15 = vld [vmem:[#allocation5 + $0x788] sm:$0xff] }
 0xa1c   : > { %4281 = vmatmul.f32.gmra.mxu2 %v3154_v62  ;;  %4346 = vmatmul.f32.gmra.mxu0 %v3155_v46  ;;  %v4070_v13 = vadd.f32 %v4069_v40, %v4005_v24  ;;  %v3172_v40 = vmul.f32 %v8179_v44, %v8094_v16  ;;  %v3187_v16 = vmul.f32 %v8181_v5, %v8099_v1 }
 0xa1d   : > { %4411 = vmatmul.f32.gmra.mxu3 %v3156_v41  ;;  %v8183_v41 = vld [vmem:[#allocation53_spill] sm:$0xff] }
 0xa1e   : > { %v7397_v49 = vadd.f32 %v4134_v47, %v4070_v13  ;;  %v3435_v47 = vld [vmem:[#allocation5 + $0x7a8] sm:$0xff]  ;;  %v3188_v24 = vmul.f32 %v8183_v41, %v8101_v11 }
 0xa1f   : > { %v3942_v60 = vpop.f32.mrf.mxu1  ;;  %4431 = vmatpush.msra.mxu1 %v3435_v47 }
 0xa20   : > { %v3943_v27 = vadd.f32 %v3942_v60, %v7180_v52  ;;  %v4013_v52 = vpop.f32.mrf.mxu2  ;;  %v4078_v56 = vpop.f32.mrf.mxu0 }
 0xa21   : > { %v4143_v2 = vpop.f32.mrf.mxu3 }
 0xa22   : > { %v4008_v3 = vadd.f32 %v4007_v54, %v3943_v27  ;;  %4201 = vmatmul.f32.gmra.mxu1 %v3073_v26  ;;  %v8182_v54 = vld [vmem:[#allocation76_spill] sm:$0xff]  ;;  %v3105_v26 = vmul.f32 %v8184_v20, %v6594_v19 }
 0xa23   : > { %v3186_v62 = vmul.f32 %v8182_v54, %v8101_v11  ;;  %v3433_v11 = vld [vmem:[#allocation5 + $0x798] sm:$0xff] }
 0xa24   : > { %4284 = vmatmul.f32.gmra.mxu2 %v3170_v22  ;;  %4349 = vmatmul.f32.gmra.mxu0 %v3171_v59  ;;  %v4073_v25 = vadd.f32 %v4072_v50, %v4008_v3  ;;  %v8188_v20 = vld [vmem:[#allocation88_spill] sm:$0xff] }
 0xa25   : > { %4414 = vmatmul.f32.gmra.mxu3 %v3172_v40 }
 0xa26   : > { %v7408_v39 = vadd.f32 %v4137_v55, %v4073_v25  ;;  %v3434_v55 = vld [vmem:[#allocation5 + $0x7a0] sm:$0xff]  ;;  %v3432_v25 = vld [vmem:[#allocation5 + $0x790] sm:$0xff] }
 0xa27   : > { %v3945_v0 = vpop.f32.mrf.mxu1  ;;  %4432 = vmatpush.msra.mxu1 %v3434_v55 }
 0xa28   : > { %v3946_v46 = vadd.f32 %v3945_v0, %v7198_v38  ;;  %v4016_v21 = vpop.f32.mrf.mxu2 }
 0xa29   : > { %4433 = vmatpush.msra.mxu1 %v3433_v11  ;;  %v4146_v22 = vpop.f32.mrf.mxu3 }
 0xa2a   : > { %v4011_v50 = vadd.f32 %v4010_v12, %v3946_v46  ;;  %4204 = vmatmul.f32.gmra.mxu1 %v3089_v34  ;;  %v4081_v12 = vpop.f32.mrf.mxu0 }
 0xa2b   : > { %4434 = vmatpush.msra.mxu1 %v3432_v25 }
 0xa2c   : > { %4287 = vmatmul.f32.gmra.mxu2 %v3186_v62  ;;  %4352 = vmatmul.f32.gmra.mxu0 %v3187_v16  ;;  %v4076_v13 = vadd.f32 %v4075_v63, %v4011_v50  ;;  %v8185_v63 = vld [vmem:[#allocation55_spill] sm:$0xff]  ;;  %v8186_v16 = vld [vmem:[#allocation54_spill] sm:$0xff] }
 0xa2d   : > { %4417 = vmatmul.f32.gmra.mxu3 %v3188_v24  ;;  %4435 = vmatpush.msra.mxu1 %v3431_v15  ;;  %v3137_v54 = vmul.f32 %v8186_v16, %v6640_v14 }
 0xa2e   : > { %v7419_v38 = vadd.f32 %v4140_v51, %v4076_v13  ;;  %v3121_v51 = vmul.f32 %v8185_v63, %v6617_v30  ;;  %v8187_v13 = vld [vmem:[#allocation57_spill] sm:$0xff] }
 0xa2f   : > { %v3948_v60 = vpop.f32.mrf.mxu1 }
 0xa30   : > { %v3949_v27 = vadd.f32 %v3948_v60, %v7218_v6  ;;  %v4019_v6 = vpop.f32.mrf.mxu2  ;;  %v3153_v60 = vmul.f32 %v8187_v13, %v6663_v10  ;;  %v8193_v13 = vld [vmem:[#allocation63_spill] sm:$0xff] }
 0xa31   : > { %v4149_v46 = vpop.f32.mrf.mxu3 }
 0xa32   : > { %v4014_v59 = vadd.f32 %v4013_v52, %v3949_v27  ;;  %4207 = vmatmul.f32.gmra.mxu1 %v3105_v26  ;;  %v4084_v0 = vpop.f32.mrf.mxu0 }
 0xa34   : > { %v4079_v37 = vadd.f32 %v4078_v56, %v4014_v59  ;;  %v3430_v56 = vld [vmem:[#allocation5 + $0x780] sm:$0xff] }
 0xa35   : > { %4436 = vmatpush.msra.mxu1 %v3430_v56 }
 0xa36   : > { %v7424_v44 = vadd.f32 %v4143_v2, %v4079_v37  ;;  %v8189_v37 = vld [vmem:[#allocation58_spill] sm:$0xff] }
 0xa37   : > { %v3951_v40 = vpop.f32.mrf.mxu1 }
 0xa38   : > { %v3952_v3 = vadd.f32 %v3951_v40, %v7238_v36  ;;  %v4022_v24 = vpop.f32.mrf.mxu2 }
 0xa39   : > { %v4152_v27 = vpop.f32.mrf.mxu3 }
 0xa3a   : > { %v4017_v47 = vadd.f32 %v4016_v21, %v3952_v3  ;;  %4210 = vmatmul.f32.gmra.mxu1 %v3121_v51  ;;  %v4087_v55 = vpop.f32.mrf.mxu0 }
 0xa3c   : > { %v4082_v52 = vadd.f32 %v4081_v12, %v4017_v47 }
 0xa3e   : > { %v7429_v34 = vadd.f32 %v4146_v22, %v4082_v52  ;;  %v3169_v22 = vmul.f32 %v8189_v37, %v8092_v48  ;;  %v8190_v52 = vld [vmem:[#allocation59_spill] sm:$0xff] }
 0xa3f   : > { %v3954_v5 = vpop.f32.mrf.mxu1  ;;  %v8197_v37 = vld [vmem:[#allocation71_spill] sm:$0xff] }
 0xa40   : > { %v3955_v62 = vadd.f32 %v3954_v5, %v7256_v28  ;;  %v4025_v11 = vpop.f32.mrf.mxu2 }
 0xa41   : > { %v4155_v3 = vpop.f32.mrf.mxu3 }
 0xa42   : > { %v4020_v36 = vadd.f32 %v4019_v6, %v3955_v62  ;;  %4213 = vmatmul.f32.gmra.mxu1 %v3137_v54  ;;  %v4090_v63 = vpop.f32.mrf.mxu0 }
 0xa44   : > { %v4085_v41 = vadd.f32 %v4084_v0, %v4020_v36  ;;  %v3185_v0 = vmul.f32 %v8190_v52, %v8099_v1  ;;  %v8191_v36 = vld [vmem:[#allocation61_spill] sm:$0xff] }
 0xa46   : > { %v7434_v50 = vadd.f32 %v4149_v46, %v4085_v41  ;;  %v2949_v41 = vmul.f32 %v8191_v36, %v6364_v31  ;;  %v8203_v36 = vld [vmem:[#allocation85_spill] sm:$0xff] }
 0xa47   : > { %v3957_v2 = vpop.f32.mrf.mxu1 }
 0xa48   : > { %v3958_v26 = vadd.f32 %v3957_v2, %v8188_v20  ;;  %v4028_v46 = vpop.f32.mrf.mxu2 }
 0xa49   : > { %v4158_v62 = vpop.f32.mrf.mxu3 }
 0xa4a   : > { %v4023_v21 = vadd.f32 %v4022_v24, %v3958_v26  ;;  %4216 = vmatmul.f32.gmra.mxu1 %v3153_v60  ;;  %v4093_v16 = vpop.f32.mrf.mxu0  ;;  %v2981_v60 = vmul.f32 %v8193_v13, %v6410_v18  ;;  %v8194_v26 = vld [vmem:[#allocation65_spill] sm:$0xff]  ;;  %v8204_v13 = vld [vmem:[#allocation84_spill] sm:$0xff] }
 0xa4c   : > { %v4088_v59 = vadd.f32 %v4087_v55, %v4023_v21  ;;  %v8192_v55 = vld [vmem:[#allocation62_spill] sm:$0xff] }
 0xa4d   : > { %v2965_v2 = vmul.f32 %v8192_v55, %v6387_v23  ;;  %v8195_v21 = vld [vmem:[#allocation66_spill] sm:$0xff] }
 0xa4e   : > { %v7439_v28 = vadd.f32 %v4152_v27, %v4088_v59  ;;  %v2997_v27 = vmul.f32 %v8194_v26, %v6433_v7  ;;  %v3013_v59 = vmul.f32 %v8195_v21, %v6456_v32 }
 0xa4f   : > { %v3960_v12 = vpop.f32.mrf.mxu1 }
 0xa50   : > { %v3961_v40 = vadd.f32 %v3960_v12, %v7290_v42 }
 0xa52   : > { %v4026_v51 = vadd.f32 %v4025_v11, %v3961_v40  ;;  %4219 = vmatmul.f32.gmra.mxu1 %v3169_v22  ;;  %v8196_v11 = vld [vmem:[#allocation69_spill] sm:$0xff]  ;;  %v3045_v22 = vmul.f32 %v8197_v37, %v6502_v35  ;;  %v8198_v40 = vld [vmem:[#allocation74_spill] sm:$0xff] }
 0xa53   : > { %v3029_v12 = vmul.f32 %v8196_v11, %v6479_v43 }
 0xa54   : > { %v4091_v47 = vadd.f32 %v4090_v63, %v4026_v51  ;;  %v3061_v63 = vmul.f32 %v8198_v40, %v6525_v53  ;;  %v8199_v51 = vld [vmem:[#allocation77_spill] sm:$0xff]  ;;  %v8201_v53 = vld [vmem:[#allocation80_spill] sm:$0xff] }
 0xa56   : > { %v7444_v25 = vadd.f32 %v4155_v3, %v4091_v47  ;;  %v3077_v3 = vmul.f32 %v8199_v51, %v6548_v45  ;;  %v4243_v45 = vpop.f32.mrf.mxu2 }
 0xa57   : > { %v3963_v6 = vpop.f32.mrf.mxu1 }
 0xa58   : > { %v3964_v15 = vadd.f32 %v3963_v6, %v7304_v57  ;;  %v8200_v6 = vld [vmem:[#allocation79_spill] sm:$0xff] }
 0xa59   : > { %v3093_v52 = vmul.f32 %v8200_v6, %v6571_v33  ;;  %v4308_v33 = vpop.f32.mrf.mxu0 }
 0xa5a   : > { %v4029_v5 = vadd.f32 %v4028_v46, %v3964_v15  ;;  %4222 = vmatmul.f32.gmra.mxu1 %v3185_v0  ;;  %v3109_v15 = vmul.f32 %v8201_v53, %v6594_v19 }
 0xa5c   : > { %v4094_v54 = vadd.f32 %v4093_v16, %v4029_v5  ;;  %v8202_v5 = vld [vmem:[#allocation83_spill] sm:$0xff] }
 0xa5d   : > { %v3125_v16 = vmul.f32 %v8202_v5, %v6617_v30  ;;  %v3157_v30 = vmul.f32 %v8204_v13, %v6663_v10 }
 0xa5e   : > { %v7449_v42 = vadd.f32 %v4158_v62, %v4094_v54 }
 0xa5f   : > { %v4178_v56 = vpop.f32.mrf.mxu1 }
 0xa60   : > { %v4179_v11 = vadd.f32 %v4178_v56, %v7318_v58 }
 0xa61   : > { %v4311_v55 = vpop.f32.mrf.mxu0 }
 0xa62   : > { %4437 = vmatmul.f32.vlgmr.msra.gmra.mxu1 %v2949_v41  ;;  %v3141_v41 = vmul.f32 %v8203_v36, %v6640_v14  ;;  %v8205_v14 = vld [vmem:[#allocation86_spill] sm:$0xff] }
 0xa67   : > { %v7453_v24 = vpop.f32.mrf.mxu1 }
 0xa6a   : > { %4440 = vmatmul.f32.gmra.mxu1 %v2965_v2 }
 0xa6f   : > { %v7457_v57 = vpop.f32.mrf.mxu1 }
 0xa72   : > { %4443 = vmatmul.f32.gmra.mxu1 %v2981_v60 }
 0xa77   : > { %v7461_v20 = vpop.f32.mrf.mxu1 }
 0xa7a   : > { %4446 = vmatmul.f32.gmra.mxu1 %v2997_v27  ;;  %v4314_v27 = vpop.f32.mrf.mxu0 }
 0xa7f   : > { %v7465_v31 = vpop.f32.mrf.mxu1 }
 0xa80   : > { %v4191_v36 = vadd.f32 %v7465_v31, %v7364_v4 }
 0xa82   : > { %4449 = vmatmul.f32.gmra.mxu1 %v3013_v59 }
 0xa87   : > { %v7469_v23 = vpop.f32.mrf.mxu1 }
 0xa8a   : > { %4452 = vmatmul.f32.gmra.mxu1 %v3029_v12 }
 0xa8f   : > { %v7473_v18 = vpop.f32.mrf.mxu1 }
 0xa92   : > { %4455 = vmatmul.f32.gmra.mxu1 %v3045_v22  ;;  %v8206_v22 = vld [vmem:[#allocation87_spill] sm:$0xff] }
 0xa93   : > { %v3189_v40 = vmul.f32 %v8206_v22, %v8099_v1  ;;  %v4185_v1 = vadd.f32 %v7457_v57, %v7342_v9 }
 0xa97   : > { %v7477_v7 = vpop.f32.mrf.mxu1 }
 0xa9a   : > { %4458 = vmatmul.f32.gmra.mxu1 %v3061_v63 }
 0xa9f   : > { %v4202_v32 = vpop.f32.mrf.mxu1 }
 0xaa0   : > { %v7484_v47 = vadd.f32 %v4202_v32, %v7408_v39  ;;  %v4317_v32 = vpop.f32.mrf.mxu0 }
 0xaa2   : > { %4461 = vmatmul.f32.gmra.mxu1 %v3077_v3 }
 0xaa7   : > { %v4205_v43 = vpop.f32.mrf.mxu1 }
 0xaa8   : > { %v7489_v35 = vadd.f32 %v4205_v43, %v7419_v38  ;;  %v4373_v38 = vpop.f32.mrf.mxu3 }
 0xaaa   : > { %4464 = vmatmul.f32.gmra.mxu1 %v3093_v52 }
 0xaaf   : > { %v4208_v0 = vpop.f32.mrf.mxu1 }
 0xab0   : > { %v7494_v46 = vadd.f32 %v4208_v0, %v7424_v44  ;;  %v4246_v44 = vpop.f32.mrf.mxu2  ;;  %v4376_v60 = vpop.f32.mrf.mxu3 }
 0xab2   : > { %4467 = vmatmul.f32.gmra.mxu1 %v3109_v15 }
 0xab7   : > { %v4211_v39 = vpop.f32.mrf.mxu1 }
 0xab8   : > { %v7499_v54 = vadd.f32 %v4211_v39, %v7429_v34  ;;  %v4249_v26 = vpop.f32.mrf.mxu2  ;;  %v4379_v10 = vpop.f32.mrf.mxu3  ;;  %v4188_v39 = vadd.f32 %v7461_v20, %v7353_v61 }
 0xaba   : > { %4470 = vmatmul.f32.gmra.mxu1 %v3125_v16 }
 0xabf   : > { %v4214_v62 = vpop.f32.mrf.mxu1 }
 0xac0   : > { %v7504_v19 = vadd.f32 %v4214_v62, %v7434_v50  ;;  %v3173_v50 = vmul.f32 %v8205_v14, %v8092_v48  ;;  %v4252_v12 = vpop.f32.mrf.mxu2  ;;  %v4182_v48 = vadd.f32 %v7453_v24, %v7331_v8  ;;  %v4382_v58 = vpop.f32.mrf.mxu3  ;;  %v4250_v24 = vadd.f32 %v4249_v26, %v4185_v1 }
 0xac1   : > { %v4320_v8 = vpop.f32.mrf.mxu0  ;;  %v4253_v57 = vadd.f32 %v4252_v12, %v4188_v39 }
 0xac2   : > { %4473 = vmatmul.f32.gmra.mxu1 %v3141_v41  ;;  %v4247_v56 = vadd.f32 %v4246_v44, %v4182_v48  ;;  %v4315_v5 = vadd.f32 %v4314_v27, %v4250_v24 }
 0xac3   : > { %v4318_v41 = vadd.f32 %v4317_v32, %v4253_v57 }
 0xac4   : > { %v4380_v16 = vadd.f32 %v4379_v10, %v4315_v5 }
 0xac7   : > { %v4217_v2 = vpop.f32.mrf.mxu1 }
 0xac8   : > { %v7509_v34 = vadd.f32 %v4217_v2, %v7439_v28  ;;  %v4244_v28 = vadd.f32 %v4243_v45, %v4179_v11  ;;  %v4255_v3 = vpop.f32.mrf.mxu2  ;;  %v4385_v0 = vpop.f32.mrf.mxu3  ;;  %v4383_v2 = vadd.f32 %v4382_v58, %v4318_v41  ;;  %v4197_v11 = vadd.f32 %v7473_v18, %v7386_v29 }
 0xac9   : > { %v4323_v9 = vpop.f32.mrf.mxu0 }
 0xaca   : > { %4476 = vmatmul.f32.gmra.mxu1 %v3157_v30  ;;  %v4194_v30 = vadd.f32 %v7469_v23, %v7375_v17 }
 0xacf   : > { %v4220_v21 = vpop.f32.mrf.mxu1 }
 0xad0   : > { %v7514_v59 = vadd.f32 %v4220_v21, %v7444_v25  ;;  %v4309_v25 = vadd.f32 %v4308_v33, %v4244_v28  ;;  %v4258_v45 = vpop.f32.mrf.mxu2  ;;  %v4388_v62 = vpop.f32.mrf.mxu3 }
 0xad1   : > { %v4326_v13 = vpop.f32.mrf.mxu0  ;;  %v4259_v21 = vadd.f32 %v4258_v45, %v4194_v30 }
 0xad2   : > { %4479 = vmatmul.f32.gmra.mxu1 %v3173_v50  ;;  %v4374_v51 = vadd.f32 %v4373_v38, %v4309_v25 }
 0xad3   : > { %v4324_v10 = vadd.f32 %v4323_v9, %v4259_v21 }
 0xad7   : > { %v4223_v37 = vpop.f32.mrf.mxu1 }
 0xad8   : > { %v7520_v63 = vadd.f32 %v4223_v37, %v7449_v42  ;;  %v4312_v42 = vadd.f32 %v4311_v55, %v4247_v56  ;;  %v4261_v44 = vpop.f32.mrf.mxu2  ;;  %v4256_v55 = vadd.f32 %v4255_v3, %v4191_v36  ;;  %v4391_v26 = vpop.f32.mrf.mxu3  ;;  %v4389_v37 = vadd.f32 %v4388_v62, %v4324_v10 }
 0xad9   : > { %v4329_v50 = vpop.f32.mrf.mxu0  ;;  %v4262_v28 = vadd.f32 %v4261_v44, %v4197_v11 }
 0xada   : > { %4482 = vmatmul.f32.gmra.mxu1 %v3189_v40  ;;  %v4377_v52 = vadd.f32 %v4376_v60, %v4312_v42  ;;  %v4321_v60 = vadd.f32 %v4320_v8, %v4256_v55  ;;  %v4200_v40 = vadd.f32 %v7477_v7, %v7397_v49 }
 0xadb   : > { %v4327_v32 = vadd.f32 %v4326_v13, %v4262_v28 }
 0xadc   : > { %v4386_v14 = vadd.f32 %v4385_v0, %v4321_v60 }
 0xadd   : > { %v4392_v58 = vadd.f32 %v4391_v26, %v4327_v32 }
 0xadf   : > { %v4438_v43 = vpop.f32.mrf.mxu1 }
 0xae0   : > { %v4439_v6 = vadd.f32 %v4438_v43, %v4374_v51  ;;  %v4264_v27 = vpop.f32.mrf.mxu2  ;;  %v4394_v12 = vpop.f32.mrf.mxu3 }
 0xae1   : > { %v4332_v48 = vpop.f32.mrf.mxu0  ;;  %v4265_v25 = vadd.f32 %v4264_v27, %v4200_v40 }
 0xae2   : > { %4486 = vst [vmem:[%s7529_s18] sm:$0xff] %v4439_v6 }
 0xae3   : > { %v4330_v3 = vadd.f32 %v4329_v50, %v4265_v25 }
 0xae5   : > { %v4395_v1 = vadd.f32 %v4394_v12, %v4330_v3 }
 0xae7   : > { %v4441_v53 = vpop.f32.mrf.mxu1 }
 0xae8   : > { %v4442_v15 = vadd.f32 %v4441_v53, %v4377_v52  ;;  %v4267_v17 = vpop.f32.mrf.mxu2  ;;  %v4397_v56 = vpop.f32.mrf.mxu3 }
 0xae9   : > { %v4335_v43 = vpop.f32.mrf.mxu0  ;;  %v4268_v6 = vadd.f32 %v4267_v17, %v7484_v47 }
 0xaea   : > { %4487 = vst [vmem:[%s7529_s18 + $0x8] sm:$0xff] %v4442_v15 }
 0xaeb   : > { %v4333_v7 = vadd.f32 %v4332_v48, %v4268_v6 }
 0xaed   : > { %v4398_v0 = vadd.f32 %v4397_v56, %v4333_v7 }
 0xaef   : > { %v4444_v33 = vpop.f32.mrf.mxu1 }
 0xaf0   : > { %v4445_v38 = vadd.f32 %v4444_v33, %v4380_v16  ;;  %v4270_v51 = vpop.f32.mrf.mxu2  ;;  %v4400_v49 = vpop.f32.mrf.mxu3 }
 0xaf1   : > { %v4271_v52 = vadd.f32 %v4270_v51, %v7489_v35  ;;  %v4338_v53 = vpop.f32.mrf.mxu0 }
 0xaf2   : > { %4488 = vst [vmem:[%s7529_s18 + $0x10] sm:$0xff] %v4445_v38 }
 0xaf3   : > { %v4336_v39 = vadd.f32 %v4335_v43, %v4271_v52 }
 0xaf5   : > { %v4401_v57 = vadd.f32 %v4400_v49, %v4336_v39 }
 0xaf7   : > { %v4447_v61 = vpop.f32.mrf.mxu1 }
 0xaf8   : > { %v4448_v20 = vadd.f32 %v4447_v61, %v4383_v2  ;;  %v4273_v24 = vpop.f32.mrf.mxu2  ;;  %v4403_v5 = vpop.f32.mrf.mxu3 }
 0xaf9   : > { %v4274_v47 = vadd.f32 %v4273_v24, %v7494_v46  ;;  %v4341_v38 = vpop.f32.mrf.mxu0 }
 0xafa   : > { %4489 = vst [vmem:[%s7529_s18 + $0x18] sm:$0xff] %v4448_v20 }
 0xafb   : > { %v4339_v62 = vadd.f32 %v4338_v53, %v4274_v47 }
 0xafd   : > { %v4404_v41 = vadd.f32 %v4403_v5, %v4339_v62 }
 0xaff   : > { %v4450_v4 = vpop.f32.mrf.mxu1 }
 0xb00   : > { %v4451_v31 = vadd.f32 %v4450_v4, %v4386_v14  ;;  %v4276_v9 = vpop.f32.mrf.mxu2  ;;  %v4406_v36 = vpop.f32.mrf.mxu3 }
 0xb01   : > { %v4277_v35 = vadd.f32 %v4276_v9, %v7499_v54  ;;  %v4344_v61 = vpop.f32.mrf.mxu0 }
 0xb02   : > { %4490 = vst [vmem:[%s7529_s18 + $0x20] sm:$0xff] %v4451_v31 }
 0xb03   : > { %v4342_v13 = vadd.f32 %v4341_v38, %v4277_v35 }
 0xb05   : > { %v4407_v20 = vadd.f32 %v4406_v36, %v4342_v13 }
 0xb07   : > { %v4453_v23 = vpop.f32.mrf.mxu1 }
 0xb08   : > { %v4454_v22 = vadd.f32 %v4453_v23, %v4389_v37  ;;  %v4279_v44 = vpop.f32.mrf.mxu2  ;;  %v4409_v30 = vpop.f32.mrf.mxu3 }
 0xb09   : > { %v4280_v46 = vadd.f32 %v4279_v44, %v7504_v19  ;;  %v4347_v14 = vpop.f32.mrf.mxu0 }
 0xb0a   : > { %4491 = vst [vmem:[%s7529_s18 + $0x28] sm:$0xff] %v4454_v22 }
 0xb0b   : > { %v4345_v21 = vadd.f32 %v4344_v61, %v4280_v46 }
 0xb0d   : > { %v4410_v4 = vadd.f32 %v4409_v30, %v4345_v21 }
 0xb0f   : > { %v4456_v29 = vpop.f32.mrf.mxu1 }
 0xb10   : > { %v4457_v18 = vadd.f32 %v4456_v29, %v4392_v58  ;;  %v4282_v27 = vpop.f32.mrf.mxu2  ;;  %v4412_v11 = vpop.f32.mrf.mxu3 }
 0xb11   : > { %v4283_v54 = vadd.f32 %v4282_v27, %v7509_v34  ;;  %v4350_v37 = vpop.f32.mrf.mxu0 }
 0xb12   : > { %4492 = vst [vmem:[%s7529_s18 + $0x30] sm:$0xff] %v4457_v18 }
 0xb13   : > { %v4348_v10 = vadd.f32 %v4347_v14, %v4283_v54 }
 0xb15   : > { %v4413_v28 = vadd.f32 %v4412_v11, %v4348_v10 }
 0xb17   : > { %v4459_v42 = vpop.f32.mrf.mxu1 }
 0xb18   : > { %v4460_v8 = vadd.f32 %v4459_v42, %v4395_v1  ;;  %v4285_v12 = vpop.f32.mrf.mxu2  ;;  %v4415_v40 = vpop.f32.mrf.mxu3 }
 0xb19   : > { %v4286_v19 = vadd.f32 %v4285_v12, %v7514_v59  ;;  %v4353_v56 = vpop.f32.mrf.mxu0 }
 0xb1a   : > { %4493 = vst [vmem:[%s7529_s18 + $0x38] sm:$0xff] %v4460_v8 }
 0xb1b   : > { %v4351_v22 = vadd.f32 %v4350_v37, %v4286_v19 }
 0xb1d   : > { %v4416_v48 = vadd.f32 %v4415_v40, %v4351_v22 }
 0xb1f   : > { %v4462_v15 = vpop.f32.mrf.mxu1 }
 0xb20   : > { %v4463_v45 = vadd.f32 %v4462_v15, %v4398_v0  ;;  %v4288_v34 = vpop.f32.mrf.mxu2  ;;  %v4418_v29 = vpop.f32.mrf.mxu3 }
 0xb21   : > { %v4289_v32 = vadd.f32 %v4288_v34, %v7520_v63 }
 0xb22   : > { %4494 = vst [vmem:[%s7529_s18 + $0x40] sm:$0xff] %v4463_v45 }
 0xb23   : > { %v4354_v59 = vadd.f32 %v4353_v56, %v4289_v32 }
 0xb25   : > { %v4419_v18 = vadd.f32 %v4418_v29, %v4354_v59 }
 0xb27   : > { %v4465_v16 = vpop.f32.mrf.mxu1 }
 0xb28   : > { %v4466_v33 = vadd.f32 %v4465_v16, %v4401_v57 }
 0xb2a   : > { %4495 = vst [vmem:[%s7529_s18 + $0x48] sm:$0xff] %v4466_v33 }
 0xb2f   : > { %v4468_v55 = vpop.f32.mrf.mxu1 }
 0xb30   : > { %v4469_v2 = vadd.f32 %v4468_v55, %v4404_v41 }
 0xb32   : > { %4496 = vst [vmem:[%s7529_s18 + $0x50] sm:$0xff] %v4469_v2 }
 0xb37   : > { %v4471_v60 = vpop.f32.mrf.mxu1 }
 0xb38   : > { %v4472_v26 = vadd.f32 %v4471_v60, %v4407_v20 }
 0xb3a   : > { %4497 = vst [vmem:[%s7529_s18 + $0x58] sm:$0xff] %v4472_v26 }
 0xb3f   : > { %v4474_v31 = vpop.f32.mrf.mxu1 }
 0xb40   : > { %v4475_v50 = vadd.f32 %v4474_v31, %v4410_v4 }
 0xb42   : > { %4498 = vst [vmem:[%s7529_s18 + $0x60] sm:$0xff] %v4475_v50 }
 0xb47   : > { %v4477_v17 = vpop.f32.mrf.mxu1 }
 0xb48   : > { %v4478_v23 = vadd.f32 %v4477_v17, %v4413_v28 }
 0xb4a   : > { %4499 = vst [vmem:[%s7529_s18 + $0x68] sm:$0xff] %v4478_v23 }
 0xb4f   : > { %v4480_v25 = vpop.f32.mrf.mxu1 }
 0xb50   : > { %v4481_v58 = vadd.f32 %v4480_v25, %v4416_v48 }
 0xb52   : > { %4500 = vst [vmem:[%s7529_s18 + $0x70] sm:$0xff] %v4481_v58 }
 0xb57   : > { %v4483_v51 = vpop.f32.mrf.mxu1 }
 0xb58   : > { %v4484_v63 = vadd.f32 %v4483_v51, %v4419_v18 }
 0xb5a   : > { %4501 = vst [vmem:[%s7529_s18 + $0x78] sm:$0xff] %v4484_v63 }
 0xb5b   : > { %4892 = shalt.err (!%p4889_p8)
}
 0xb5c   : > { %s4948_s27 = smov 128   ;;  %s4949_s18 = smov 8  }
 0xb5d   : > { %4718 = dma.vmem_to_hbm [thread:$0]  (%p5073_p5), %s4516_s17, 2048, %s4518_s20, %s4503_s25, %s4948_s27, %s4948_s27, %s4949_s18  }
 0xb5e PF: > { %s8207_s19 = sld [smem:[#allocation13_spill]] }
 0xb5f   : > { %s8208_s1 = sld [smem:[#allocation11_spill]] }
 0xb64   : > { %p4735_p9 = scmp.ge.s32.totalorder %s8207_s19, 2 }
 0xb65   : > { %s4532_s24 = sand.u32 1, %s8208_s1  }
 0xb66   : > { %p4728_p10 = pnand %p4735_p9, %p5077_p6  ;;  %s4533_s30 = scalar_lea.sflag [#allocation4], %s4532_s24 }
 0xb68   : > { %p4729_p11 = pneg %p4728_p10 }
 0xb6a   : > { %4918 = dma.done.wait (%p4729_p11), %s4533_s30, 2048  }
 0xb6b   : > { %4920 = vsyncadd (%p4729_p11), %s4533_s30, 4294965248  ;;  %s8210_s24 = sld [smem:[#allocation14_spill]]  ;;  %s8213_s21 = smov %s4927_s22 }
 0xb6c   : > { %s8211_s23 = sld [smem:[#allocation12_spill]] }
 0xb6d   : > { %s8212_s26 = sld [smem:[#allocation15_spill]] }
 0xb71   : > { %p28_p12 = scmp.ge.s32.totalorder %s8210_s24, 4  }
 0xb72   : > { %s8214_s22 = smov %s8211_s23 }
 0xb73   : > { %s8215_s23 = smov %s8212_s26  ;;  %30 = sbr.rel (!%p28_p12) target bundleno = 9 (0x9), region = 131 }
 0xb78   :  { %4539 = vsyncpa [#allocation3], 1 }
 0xb79   :  { %4541 = vsyncpa [#allocation3 + $0x1], 1 }
 0xb7a   :  { %4542 = vsyncpa [#allocation6], 1 }
 0xb7b   :  { %4543 = vsyncpa [#allocation4], 1 }
 0xb7c   :  { %4545 = vsyncpa [#allocation4 + $0x1], 1 }

</bundles_post_ra>
